<compile_context>
chip_gen: v6e
topology: v6e:2x2x1
jax: 0.10.0
libtpu: 0.0.40
codegen_flags: <defaults>
</compile_context>

<pallas_src>
import math
import jax
import jax.numpy as jnp
from jax.experimental import pallas as pl
from jax.experimental.pallas import tpu as pltpu

# ---------------------------------------------------------------------------
# Model hyper-parameters (small but consistent with the module's forward).
# ---------------------------------------------------------------------------
B = 2                       # batch
S_INIT = 1                  # nb_init_states
S_FUT = 16                  # nb_future_states
S = S_INIT + S_FUT          # total sequence length (17)
DIN = 9 * 6 * 6             # 324  (h=54, w=6 flattened)
DIN_PAD = 384               # 3 x 128, lane-dense input width
DOUT = 9 * 6 * 6            # 324
DOUT_PAD = 384              # 3 x 128, lane-dense output width
H = 128                     # nb_hidden_dim (small for the synthetic kernel)
NH = 8                      # heads
DH = H // NH                # head dim = 16
L = 6                       # encoder depth
FF = 4 * H                  # feed-forward dim
LN_EPS = 1e-5


# ---------------------------------------------------------------------------
# Pallas kernel: grid = (batch_group, layer).  One encoder layer per step,
# prologue (input proj + FiLM) on layer 0, epilogue (norms + heads) on the
# last layer.  Activations live in VMEM scratch across the layer axis.
# ---------------------------------------------------------------------------
def reward_guidance_kernel(
    # per-batch-group inputs
    x_ref,            # (1, ROWS, DIN_PAD) bf16
    mm_ref,           # (1, ROWS, H) f32    (1+t_emb[:H]) * (1+r_emb[:H])
    ma_ref,           # (1, ROWS, H) f32    t_emb[H:2H] + r_emb[H:2H]
    # constants
    bias_ref,         # (ROWS, ROWS) f32 block-diagonal attention bias
    w_in_ref, b_in_ref,        # (DIN_PAD, H) bf16, (1, H) f32
    st_ref,                    # (ROWS, H) f32 states embedding (tiled)
    cos_ref, sin_ref,          # (ROWS, H) f32 rotary tables (tiled over heads)
    mask_ref,                  # (NH, 1, H) f32 per-head lane masks
    # per-layer weights (blocked along leading L axis)
    ln1g_ref, ln1b_ref,        # (1, 1, H)
    wqkv_ref, bqkv_ref,        # (1, H, 5H) bf16, (1, 1, 5H) f32
    wo_ref, bo_ref,            # (1, H, H) bf16, (1, 1, H) f32
    ln2g_ref, ln2b_ref,        # (1, 1, H)
    w1_ref, b1_ref,            # (1, H, FF) bf16, (1, 1, FF) f32
    w2_ref, b2_ref,            # (1, FF, H) bf16, (1, 1, H) f32
    # epilogue constants
    encg_ref, encb_ref,        # (1, H) encoder final norm
    preg_ref, preb_ref,        # (1, H) pre_norm
    postg_ref, postb_ref,      # (1, H) post_norm
    w_out_ref, b_out_ref,      # (H, DOUT_PAD) bf16, (1, DOUT_PAD) f32
    w_rw_ref, b_rw_ref,        # (1, H), (1, 1) reward head
    # outputs
    out_ref,                   # (1, ROWS, DOUT_PAD) f32
    reward_ref,                # (1, ROWS, 128) f32 (per-row reward, bcast lanes)
    # scratch (persist across the layer axis)
    x_sc,                      # (ROWS, H) f32 running activation
    res_sc,                    # (ROWS, H) f32 outer residual
):
    rows, hid = st_ref.shape
    nh = mask_ref.shape[0]
    l = pl.program_id(1)
    n_layers = pl.num_programs(1)

    def layer_norm(v, g, b):
        # var = E[x^2] - mu^2 -> the two XLU reductions issue back-to-back.
        mu = jnp.mean(v, axis=-1, keepdims=True)
        ms = jnp.mean(v * v, axis=-1, keepdims=True)
        var = ms - mu * mu
        return (v - mu) * jax.lax.rsqrt(var + LN_EPS) * g + b

    # ---- prologue: input projection + state embedding + FiLM (layer 0) ----
    @pl.when(l == 0)
    def _():
        x0 = (jnp.dot(x_ref[0], w_in_ref[...],
                      preferred_element_type=jnp.float32) + b_in_ref[...])
        x0 = x0 + st_ref[...]
        x0 = x0 * mm_ref[0] + ma_ref[0]
        x_sc[...] = x0
        res_sc[...] = x0

    # ---- one pre-LN encoder layer (RoPE attention + GELU MLP) ----
    x = x_sc[...]
    cos = cos_ref[...]
    sin = sin_ref[...]
    bias = bias_ref[...]

    h = layer_norm(x, ln1g_ref[0], ln1b_ref[0])
    # wqkv already contains [Wq*scale, Wk, Wv, (Wq*scale)@P, Wk@P]: one bf16
    # matmul yields q, k, v and the rotate-half operands (no in-kernel matmul
    # for RoPE, no per-head softmax scale multiply).
    qkv = (jnp.dot(h.astype(jnp.bfloat16), wqkv_ref[0],
                   preferred_element_type=jnp.float32) + bqkv_ref[0])
    q = qkv[:, :hid] * cos + qkv[:, 3 * hid:4 * hid] * sin
    k = qkv[:, hid:2 * hid] * cos + qkv[:, 4 * hid:5 * hid] * sin
    v = qkv[:, 2 * hid:3 * hid]
    k_bf = k.astype(jnp.bfloat16)

    o = jnp.zeros((rows, hid), jnp.float32)
    for hh in range(nh):
        m = mask_ref[hh]                                      # (1, H)
        # (q*m) @ k^T == q_h @ k_h^T (lanes outside head h are zeroed in q).
        s = jnp.einsum('qd,kd->qk', (q * m).astype(jnp.bfloat16), k_bf,
                       preferred_element_type=jnp.float32)
        s = s + bias                                          # block-diag mask
        s = s - jnp.max(s, axis=-1, keepdims=True)
        e = jnp.exp(s)
        p = e * pl.reciprocal(jnp.sum(e, axis=-1, keepdims=True), approx=True)
        # p @ (v*m) writes only head-h lanes; summing over heads reassembles
        # the concatenated head outputs without any lane concat.
        o = o + jnp.dot(p.astype(jnp.bfloat16), (v * m).astype(jnp.bfloat16),
                        preferred_element_type=jnp.float32)

    x = x + (jnp.dot(o.astype(jnp.bfloat16), wo_ref[0],
                     preferred_element_type=jnp.float32) + bo_ref[0])

    h2 = layer_norm(x, ln2g_ref[0], ln2b_ref[0])
    f = (jnp.dot(h2.astype(jnp.bfloat16), w1_ref[0],
                 preferred_element_type=jnp.float32) + b1_ref[0])
    f = jax.nn.gelu(f, approximate=True)
    f = (jnp.dot(f.astype(jnp.bfloat16), w2_ref[0],
                 preferred_element_type=jnp.float32) + b2_ref[0])
    x = x + f
    x_sc[...] = x

    # ---- epilogue: final norms, outer residual, FiLM, heads (last layer) ----
    @pl.when(l == n_layers - 1)
    def _():
        y = layer_norm(x, encg_ref[...], encb_ref[...])   # encoder final norm
        y = y + res_sc[...]
        y = layer_norm(y, preg_ref[...], preb_ref[...])
        y = y * mm_ref[0] + ma_ref[0]
        y = layer_norm(y, postg_ref[...], postb_ref[...])
        out_ref[0] = (jnp.dot(y.astype(jnp.bfloat16), w_out_ref[...],
                              preferred_element_type=jnp.float32)
                      + b_out_ref[...])
        rwd = jnp.sum(y * w_rw_ref[...], axis=-1, keepdims=True) + b_rw_ref[...]
        reward_ref[0] = jnp.broadcast_to(rwd, (rows, 128))


# ---------------------------------------------------------------------------
# Deterministic parameter construction (synthetic weights).
# ---------------------------------------------------------------------------
def xavier_uniform(key, fan_in, fan_out, shape):
    limit = math.sqrt(6.0 / (fan_in + fan_out))
    return jax.random.uniform(key, shape, jnp.float32, -limit, limit)


def init_params(key):
    ks = iter(jax.random.split(key, 64))
    p = {}
    w_in = xavier_uniform(next(ks), DIN, H, (DIN, H))
    p["w_in"] = jnp.pad(w_in, ((0, DIN_PAD - DIN), (0, 0))).astype(jnp.bfloat16)
    p["b_in"] = jnp.zeros((1, H), jnp.float32)
    w_out = xavier_uniform(next(ks), H, DOUT, (H, DOUT))
    p["w_out"] = jnp.pad(w_out, ((0, 0), (0, DOUT_PAD - DOUT))).astype(jnp.bfloat16)
    p["b_out"] = jnp.zeros((1, DOUT_PAD), jnp.float32)
    p["states_emb"] = jax.random.normal(next(ks), (S, H), jnp.float32) * 0.02
    # Linear(1, 4H) embeddings (computed as tiny glue in the JAX wrapper)
    p["t_w"] = xavier_uniform(next(ks), 1, 4 * H, (1, 4 * H))
    p["t_b"] = jnp.zeros((4 * H,), jnp.float32)
    p["r_w"] = xavier_uniform(next(ks), 1, 4 * H, (1, 4 * H))
    p["r_b"] = jnp.zeros((4 * H,), jnp.float32)
    # reward head Linear(H, 1): stored as (1, H)
    p["w_rw"] = xavier_uniform(next(ks), H, 1, (1, H))
    p["b_rw"] = jnp.zeros((1, 1), jnp.float32)
    # encoder final / pre / post norms
    for name in ("enc", "pre", "post"):
        p[f"{name}_g"] = jnp.ones((1, H), jnp.float32)
        p[f"{name}_b"] = jnp.zeros((1, H), jnp.float32)
    # layer norms inside encoder layers
    p["ln1_g"] = jnp.ones((L, 1, H), jnp.float32)
    p["ln1_b"] = jnp.zeros((L, 1, H), jnp.float32)
    p["ln2_g"] = jnp.ones((L, 1, H), jnp.float32)
    p["ln2_b"] = jnp.zeros((L, 1, H), jnp.float32)

    # rotary tables: interleaved pairs per head, tiled over the 8 head blocks.
    # TODO(synk): x_transformers may rotate only a partial head dim; full
    # head-dim rotation is applied here.
    inv_freq = 1.0 / (10000.0 ** (jnp.arange(0, DH, 2, dtype=jnp.float32) / DH))
    t = jnp.arange(S, dtype=jnp.float32)
    freqs = t[:, None] * inv_freq[None, :]               # (S, DH//2)
    freqs_i = jnp.repeat(freqs, 2, axis=-1)              # (S, DH) pairwise
    p["cos"] = jnp.tile(jnp.cos(freqs_i), (1, NH))       # (S, H)
    p["sin"] = jnp.tile(jnp.sin(freqs_i), (1, NH))
    # signed pair-permutation P: (v @ P)[2j] = -v[2j+1], (v @ P)[2j+1] = v[2j]
    cols = jnp.arange(H)
    rows_for_col = jnp.where(cols % 2 == 0, cols + 1, cols - 1)
    signs = jnp.where(cols % 2 == 0, -1.0, 1.0)
    rope_p = jnp.zeros((H, H), jnp.float32).at[rows_for_col, cols].set(signs)

    # Fused QKV weights with RoPE rotate-half and softmax scale folded in:
    #   columns = [Wq*scale, Wk, Wv, (Wq*scale)@P, Wk@P]   -> (H, 5H) bf16
    scale = 1.0 / math.sqrt(DH)
    wqkv_layers, wo_layers, w1_layers, w2_layers = [], [], [], []
    for _ in range(L):
        wq = xavier_uniform(next(ks), H, H, (H, H)) * scale
        wk = xavier_uniform(next(ks), H, H, (H, H))
        wv = xavier_uniform(next(ks), H, H, (H, H))
        wqkv_layers.append(
            jnp.concatenate([wq, wk, wv, wq @ rope_p, wk @ rope_p], axis=1))
        wo_layers.append(xavier_uniform(next(ks), H, H, (H, H)))
        w1_layers.append(xavier_uniform(next(ks), H, FF, (H, FF)))
        w2_layers.append(xavier_uniform(next(ks), FF, H, (FF, H)))
    p["wqkv"] = jnp.stack(wqkv_layers).astype(jnp.bfloat16)   # (L, H, 5H)
    p["bqkv"] = jnp.zeros((L, 1, 5 * H), jnp.float32)
    p["wo"] = jnp.stack(wo_layers).astype(jnp.bfloat16)
    p["bo"] = jnp.zeros((L, 1, H), jnp.float32)
    p["w1"] = jnp.stack(w1_layers).astype(jnp.bfloat16)
    p["b1"] = jnp.zeros((L, 1, FF), jnp.float32)
    p["w2"] = jnp.stack(w2_layers).astype(jnp.bfloat16)
    p["b2"] = jnp.zeros((L, 1, H), jnp.float32)
    # per-head lane masks (NH, 1, H)
    p["head_mask"] = (jnp.arange(H)[None, :] // DH
                      == jnp.arange(NH)[:, None]).astype(jnp.float32).reshape(NH, 1, H)
    return p


# ---------------------------------------------------------------------------
# Wrapper: tiny glue (reshape / Linear(1,4H) / padding) in JAX, hot path in
# Pallas.  Batch handling is chip-aware: fold batch into rows on single-TC
# chips (v5e/v6e); keep a parallel batch grid axis on v7x (2 TCs/chip).
# ---------------------------------------------------------------------------
def _is_multi_tensorcore_chip():
    try:
        kind = jax.devices()[0].device_kind.lower()
    except Exception:
        return False
    return "7" in kind          # v7x: 2 TensorCores per chip


def reward_guidance_forward(params, init_states, future_states,
                            time_flags, reward_value, fold_batch=None):
    batch = init_states.shape[0]
    if fold_batch is None:
        fold_batch = not _is_multi_tensorcore_chip()

    init_f = init_states.reshape(batch, S_INIT, DIN).astype(jnp.float32)
    fut_f = future_states.reshape(batch, S_FUT, DIN).astype(jnp.float32)
    x_in = jnp.concatenate([init_f, fut_f], axis=1)                # (B, S, DIN)
    x_in = jnp.pad(x_in, ((0, 0), (0, 0), (0, DIN_PAD - DIN))).astype(jnp.bfloat16)

    # time / reward value embeddings (Linear(1, 4H)) — trivial glue.
    t_emb = time_flags.astype(jnp.float32) @ params["t_w"] + params["t_b"]
    r_emb = reward_value.astype(jnp.float32) @ params["r_w"] + params["r_b"]
    mod_mul = (1.0 + t_emb[:, :H]) * (1.0 + r_emb[:, :H])          # (B, H)
    mod_add = t_emb[:, H:2 * H] + r_emb[:, H:2 * H]                # (B, H)

    if fold_batch:
        gb = 1
        rows = batch * S
        x_in = x_in.reshape(1, rows, DIN_PAD)
        mm = jnp.repeat(mod_mul, S, axis=0).reshape(1, rows, H)
        ma = jnp.repeat(mod_add, S, axis=0).reshape(1, rows, H)
        st = jnp.tile(params["states_emb"], (batch, 1))            # (rows, H)
        cos = jnp.tile(params["cos"], (batch, 1))
        sin = jnp.tile(params["sin"], (batch, 1))
        seq_id = jnp.arange(rows) // S
        bias = jnp.where(seq_id[:, None] == seq_id[None, :],
                         0.0, -1e9).astype(jnp.float32)            # block-diag
    else:
        gb = batch
        rows = S
        mm = jnp.broadcast_to(mod_mul[:, None, :], (batch, S, H))
        ma = jnp.broadcast_to(mod_add[:, None, :], (batch, S, H))
        st = params["states_emb"]
        cos = params["cos"]
        sin = params["sin"]
        bias = jnp.zeros((S, S), jnp.float32)

    def batch_spec(a):
        return pl.BlockSpec((1,) + a.shape[1:], lambda b, l: (b, 0, 0))

    def const_spec(a):
        nd = a.ndim
        return pl.BlockSpec(a.shape, lambda b, l, _nd=nd: (0,) * _nd)

    def layer_spec(a):
        return pl.BlockSpec((1,) + a.shape[1:], lambda b, l: (l, 0, 0))

    inputs = [
        x_in, mm, ma,
        bias, params["w_in"], params["b_in"], st, cos, sin, params["head_mask"],
        params["ln1_g"], params["ln1_b"], params["wqkv"], params["bqkv"],
        params["wo"], params["bo"], params["ln2_g"], params["ln2_b"],
        params["w1"], params["b1"], params["w2"], params["b2"],
        params["enc_g"], params["enc_b"], params["pre_g"], params["pre_b"],
        params["post_g"], params["post_b"], params["w_out"], params["b_out"],
        params["w_rw"], params["b_rw"],
    ]
    in_specs = (
        [batch_spec(x_in), batch_spec(mm), batch_spec(ma)]
        + [const_spec(a) for a in inputs[3:10]]
        + [layer_spec(a) for a in inputs[10:22]]
        + [const_spec(a) for a in inputs[22:]]
    )

    out_shapes = (
        jax.ShapeDtypeStruct((gb, rows, DOUT_PAD), jnp.float32),
        jax.ShapeDtypeStruct((gb, rows, 128), jnp.float32),
    )
    out_specs = (
        pl.BlockSpec((1, rows, DOUT_PAD), lambda b, l: (b, 0, 0)),
        pl.BlockSpec((1, rows, 128), lambda b, l: (b, 0, 0)),
    )

    state_full, reward_full = pl.pallas_call(
        reward_guidance_kernel,
        out_shape=out_shapes,
        grid=(gb, L),
        in_specs=in_specs,
        out_specs=out_specs,
        scratch_shapes=[pltpu.VMEM((rows, H), jnp.float32),
                        pltpu.VMEM((rows, H), jnp.float32)],
        compiler_params=pltpu.CompilerParams(
            dimension_semantics=("parallel", "arbitrary"),
            vmem_limit_bytes=32 * 1024 * 1024,
        ),
    )(*inputs)

    state_full = state_full.reshape(batch, S, DOUT_PAD)
    state_final = state_full[:, -S_FUT:, :DOUT].reshape(batch, S_FUT, 9 * 6, 6)
    reward = reward_full.reshape(batch, S, 128)[:, S - 1, 0:1]     # (B, 1)
    return state_final, reward


# ---------------------------------------------------------------------------
# Main
# ---------------------------------------------------------------------------
if __name__ == "__main__":
    root = jax.random.PRNGKey(0)
    kp, k1, k2, k3, k4 = jax.random.split(root, 5)

    params = init_params(kp)

    init_states = jax.random.normal(k1, (B, S_INIT, 9 * 6, 6), jnp.float32)
    future_states = jax.random.normal(k2, (B, S_FUT, 9 * 6, 6), jnp.float32)
    time_flags = jax.random.uniform(k3, (B, 1), jnp.float32)
    reward_value = jax.random.uniform(k4, (B, 1), jnp.float32)

    fwd = jax.jit(lambda a, b_, c, d: reward_guidance_forward(params, a, b_, c, d))
    state_final, reward = fwd(init_states, future_states, time_flags, reward_value)
    jax.block_until_ready((state_final, reward))

    assert state_final.shape == (B, S_FUT, 9 * 6, 6), state_final.shape
    assert reward.shape == (B, 1), reward.shape
    assert bool(jnp.all(jnp.isfinite(state_final))) and bool(jnp.all(jnp.isfinite(reward)))
    print("KERNEL_OK")
</pallas_src>

<mosaic_0001>
module attributes {stable_mosaic.version = 11 : i64} {
  func.func @reward_guidance_kernel(%arg0: i32, %arg1: i32, %arg2: memref<1x34x384xbf16, #tpu.memory_space<vmem>>, %arg3: memref<1x34x128xf32, #tpu.memory_space<vmem>>, %arg4: memref<1x34x128xf32, #tpu.memory_space<vmem>>, %arg5: memref<34x34xf32, #tpu.memory_space<vmem>>, %arg6: memref<384x128xbf16, #tpu.memory_space<vmem>>, %arg7: memref<1x128xf32, #tpu.memory_space<vmem>>, %arg8: memref<34x128xf32, #tpu.memory_space<vmem>>, %arg9: memref<34x128xf32, #tpu.memory_space<vmem>>, %arg10: memref<34x128xf32, #tpu.memory_space<vmem>>, %arg11: memref<8x1x128xf32, #tpu.memory_space<vmem>>, %arg12: memref<1x1x128xf32, #tpu.memory_space<vmem>>, %arg13: memref<1x1x128xf32, #tpu.memory_space<vmem>>, %arg14: memref<1x128x640xbf16, #tpu.memory_space<vmem>>, %arg15: memref<1x1x640xf32, #tpu.memory_space<vmem>>, %arg16: memref<1x128x128xbf16, #tpu.memory_space<vmem>>, %arg17: memref<1x1x128xf32, #tpu.memory_space<vmem>>, %arg18: memref<1x1x128xf32, #tpu.memory_space<vmem>>, %arg19: memref<1x1x128xf32, #tpu.memory_space<vmem>>, %arg20: memref<1x128x512xbf16, #tpu.memory_space<vmem>>, %arg21: memref<1x1x512xf32, #tpu.memory_space<vmem>>, %arg22: memref<1x512x128xbf16, #tpu.memory_space<vmem>>, %arg23: memref<1x1x128xf32, #tpu.memory_space<vmem>>, %arg24: memref<1x128xf32, #tpu.memory_space<vmem>>, %arg25: memref<1x128xf32, #tpu.memory_space<vmem>>, %arg26: memref<1x128xf32, #tpu.memory_space<vmem>>, %arg27: memref<1x128xf32, #tpu.memory_space<vmem>>, %arg28: memref<1x128xf32, #tpu.memory_space<vmem>>, %arg29: memref<1x128xf32, #tpu.memory_space<vmem>>, %arg30: memref<128x384xbf16, #tpu.memory_space<vmem>>, %arg31: memref<1x384xf32, #tpu.memory_space<vmem>>, %arg32: memref<1x128xf32, #tpu.memory_space<vmem>>, %arg33: memref<1x1xf32, #tpu.memory_space<vmem>>, %arg34: memref<1x34x384xf32, #tpu.memory_space<vmem>>, %arg35: memref<1x34x128xf32, #tpu.memory_space<vmem>>, %arg36: memref<34x128xf32, #tpu.memory_space<vmem>>, %arg37: memref<34x128xf32, #tpu.memory_space<vmem>>) attributes {dimension_semantics = [#tpu.dimension_semantics<parallel>, #tpu.dimension_semantics<arbitrary>], iteration_bounds = array<i64: 1, 6>, scalar_prefetch = 0 : i64, scratch_operands = 2 : i64, tpu.core_type = #tpu.core_type<tc>, window_params = [{transform_indices = @transform_0, window_bounds = array<i64: 1, 34, 384>}, {transform_indices = @transform_1, window_bounds = array<i64: 1, 34, 128>}, {transform_indices = @transform_2, window_bounds = array<i64: 1, 34, 128>}, {pipeline_mode = #tpu.pipeline_mode<synchronous>, transform_indices = @transform_3, window_bounds = array<i64: 34, 34>}, {pipeline_mode = #tpu.pipeline_mode<synchronous>, transform_indices = @transform_4, window_bounds = array<i64: 384, 128>}, {pipeline_mode = #tpu.pipeline_mode<synchronous>, transform_indices = @transform_5, window_bounds = array<i64: 1, 128>}, {pipeline_mode = #tpu.pipeline_mode<synchronous>, transform_indices = @transform_6, window_bounds = array<i64: 34, 128>}, {pipeline_mode = #tpu.pipeline_mode<synchronous>, transform_indices = @transform_7, window_bounds = array<i64: 34, 128>}, {pipeline_mode = #tpu.pipeline_mode<synchronous>, transform_indices = @transform_8, window_bounds = array<i64: 34, 128>}, {pipeline_mode = #tpu.pipeline_mode<synchronous>, transform_indices = @transform_9, window_bounds = array<i64: 8, 1, 128>}, {transform_indices = @transform_10, window_bounds = array<i64: 1, 1, 128>}, {transform_indices = @transform_11, window_bounds = array<i64: 1, 1, 128>}, {transform_indices = @transform_12, window_bounds = array<i64: 1, 128, 640>}, {transform_indices = @transform_13, window_bounds = array<i64: 1, 1, 640>}, {transform_indices = @transform_14, window_bounds = array<i64: 1, 128, 128>}, {transform_indices = @transform_15, window_bounds = array<i64: 1, 1, 128>}, {transform_indices = @transform_16, window_bounds = array<i64: 1, 1, 128>}, {transform_indices = @transform_17, window_bounds = array<i64: 1, 1, 128>}, {transform_indices = @transform_18, window_bounds = array<i64: 1, 128, 512>}, {transform_indices = @transform_19, window_bounds = array<i64: 1, 1, 512>}, {transform_indices = @transform_20, window_bounds = array<i64: 1, 512, 128>}, {transform_indices = @transform_21, window_bounds = array<i64: 1, 1, 128>}, {pipeline_mode = #tpu.pipeline_mode<synchronous>, transform_indices = @transform_22, window_bounds = array<i64: 1, 128>}, {pipeline_mode = #tpu.pipeline_mode<synchronous>, transform_indices = @transform_23, window_bounds = array<i64: 1, 128>}, {pipeline_mode = #tpu.pipeline_mode<synchronous>, transform_indices = @transform_24, window_bounds = array<i64: 1, 128>}, {pipeline_mode = #tpu.pipeline_mode<synchronous>, transform_indices = @transform_25, window_bounds = array<i64: 1, 128>}, {pipeline_mode = #tpu.pipeline_mode<synchronous>, transform_indices = @transform_26, window_bounds = array<i64: 1, 128>}, {pipeline_mode = #tpu.pipeline_mode<synchronous>, transform_indices = @transform_27, window_bounds = array<i64: 1, 128>}, {pipeline_mode = #tpu.pipeline_mode<synchronous>, transform_indices = @transform_28, window_bounds = array<i64: 128, 384>}, {pipeline_mode = #tpu.pipeline_mode<synchronous>, transform_indices = @transform_29, window_bounds = array<i64: 1, 384>}, {pipeline_mode = #tpu.pipeline_mode<synchronous>, transform_indices = @transform_30, window_bounds = array<i64: 1, 128>}, {pipeline_mode = #tpu.pipeline_mode<synchronous>, transform_indices = @transform_31, window_bounds = array<i64: 1, 1>}, {transform_indices = @transform_32, window_bounds = array<i64: 1, 34, 384>}, {transform_indices = @transform_33, window_bounds = array<i64: 1, 34, 128>}]} {
    %c0_i32 = arith.constant 0 : i32
    %0 = arith.cmpi eq, %arg1, %c0_i32 : i32
    %1 = arith.extui %0 : i1 to i32
    %c0_i32_0 = arith.constant 0 : i32
    %2 = arith.cmpi ne, %1, %c0_i32_0 : i32
    scf.if %2 {
      %c0_114 = arith.constant 0 : index
      %c0_115 = arith.constant 0 : index
      %c0_116 = arith.constant 0 : index
      %307 = vector.load %arg2[%c0_114, %c0_115, %c0_116] : memref<1x34x384xbf16, #tpu.memory_space<vmem>>, vector<1x34x384xbf16>
      %308 = vector.shape_cast %307 : vector<1x34x384xbf16> to vector<34x384xbf16>
      %c0_117 = arith.constant 0 : index
      %c0_118 = arith.constant 0 : index
      %309 = vector.load %arg6[%c0_117, %c0_118] : memref<384x128xbf16, #tpu.memory_space<vmem>>, vector<384x128xbf16>
      %cst_119 = arith.constant dense<0.000000e+00> : vector<34x128xf32>
      %310 = tpu.matmul %308, %309, %cst_119 {dimension_numbers = #tpu.dot_dimension_numbers<[1], [0], [0], [1], [0, 0, 1, 1], [], []>} : vector<34x384xbf16>, vector<384x128xbf16>, vector<34x128xf32> -> vector<34x128xf32>
      %c0_120 = arith.constant 0 : index
      %c0_121 = arith.constant 0 : index
      %311 = vector.load %arg7[%c0_120, %c0_121] : memref<1x128xf32, #tpu.memory_space<vmem>>, vector<1x128xf32>
      %312 = vector.broadcast %311 : vector<1x128xf32> to vector<34x128xf32>
      %313 = arith.addf %310, %312 : vector<34x128xf32>
      %c0_122 = arith.constant 0 : index
      %c0_123 = arith.constant 0 : index
      %314 = vector.load %arg8[%c0_122, %c0_123] : memref<34x128xf32, #tpu.memory_space<vmem>>, vector<34x128xf32>
      %315 = arith.addf %313, %314 : vector<34x128xf32>
      %c0_124 = arith.constant 0 : index
      %c0_125 = arith.constant 0 : index
      %c0_126 = arith.constant 0 : index
      %316 = vector.load %arg3[%c0_124, %c0_125, %c0_126] : memref<1x34x128xf32, #tpu.memory_space<vmem>>, vector<1x34x128xf32>
      %317 = vector.shape_cast %316 : vector<1x34x128xf32> to vector<34x128xf32>
      %318 = arith.mulf %315, %317 : vector<34x128xf32>
      %c0_127 = arith.constant 0 : index
      %c0_128 = arith.constant 0 : index
      %c0_129 = arith.constant 0 : index
      %319 = vector.load %arg4[%c0_127, %c0_128, %c0_129] : memref<1x34x128xf32, #tpu.memory_space<vmem>>, vector<1x34x128xf32>
      %320 = vector.shape_cast %319 : vector<1x34x128xf32> to vector<34x128xf32>
      %321 = arith.addf %318, %320 : vector<34x128xf32>
      %c0_130 = arith.constant 0 : index
      %c0_131 = arith.constant 0 : index
      %322 = vector.load %arg36[%c0_130, %c0_131] : memref<34x128xf32, #tpu.memory_space<vmem>>, vector<34x128xf32>
      tpu.vector_store %arg36[%c0_130, %c0_131], %321 {strides = array<i32>} : memref<34x128xf32, #tpu.memory_space<vmem>>, vector<34x128xf32>,
      %c0_132 = arith.constant 0 : index
      %c0_133 = arith.constant 0 : index
      %323 = vector.load %arg37[%c0_132, %c0_133] : memref<34x128xf32, #tpu.memory_space<vmem>>, vector<34x128xf32>
      tpu.vector_store %arg37[%c0_132, %c0_133], %321 {strides = array<i32>} : memref<34x128xf32, #tpu.memory_space<vmem>>, vector<34x128xf32>,
    } else {
    }
    %c0 = arith.constant 0 : index
    %c0_1 = arith.constant 0 : index
    %3 = vector.load %arg36[%c0, %c0_1] : memref<34x128xf32, #tpu.memory_space<vmem>>, vector<34x128xf32>
    %c0_2 = arith.constant 0 : index
    %c0_3 = arith.constant 0 : index
    %4 = vector.load %arg9[%c0_2, %c0_3] : memref<34x128xf32, #tpu.memory_space<vmem>>, vector<34x128xf32>
    %c0_4 = arith.constant 0 : index
    %c0_5 = arith.constant 0 : index
    %5 = vector.load %arg10[%c0_4, %c0_5] : memref<34x128xf32, #tpu.memory_space<vmem>>, vector<34x128xf32>
    %c0_6 = arith.constant 0 : index
    %c0_7 = arith.constant 0 : index
    %6 = vector.load %arg5[%c0_6, %c0_7] : memref<34x34xf32, #tpu.memory_space<vmem>>, vector<34x34xf32>
    %c0_8 = arith.constant 0 : index
    %c0_9 = arith.constant 0 : index
    %c0_10 = arith.constant 0 : index
    %7 = vector.load %arg12[%c0_8, %c0_9, %c0_10] : memref<1x1x128xf32, #tpu.memory_space<vmem>>, vector<1x1x128xf32>
    %8 = vector.shape_cast %7 : vector<1x1x128xf32> to vector<1x128xf32>
    %c0_11 = arith.constant 0 : index
    %c0_12 = arith.constant 0 : index
    %c0_13 = arith.constant 0 : index
    %9 = vector.load %arg13[%c0_11, %c0_12, %c0_13] : memref<1x1x128xf32, #tpu.memory_space<vmem>>, vector<1x1x128xf32>
    %10 = vector.shape_cast %9 : vector<1x1x128xf32> to vector<1x128xf32>
    %cst = arith.constant dense<0.000000e+00> : vector<34xf32>
    %11 = vector.multi_reduction <add>, %3, %cst [1] : vector<34x128xf32> to vector<34xf32>
    %12 = vector.shape_cast %11 : vector<34xf32> to vector<34x1xf32>
    %cst_14 = arith.constant 1.280000e+02 : f32
    %13 = vector.broadcast %cst_14 : f32 to vector<34x1xf32>
    %14 = arith.divf %12, %13 : vector<34x1xf32>
    %15 = arith.mulf %3, %3 : vector<34x128xf32>
    %cst_15 = arith.constant dense<0.000000e+00> : vector<34xf32>
    %16 = vector.multi_reduction <add>, %15, %cst_15 [1] : vector<34x128xf32> to vector<34xf32>
    %17 = vector.shape_cast %16 : vector<34xf32> to vector<34x1xf32>
    %cst_16 = arith.constant 1.280000e+02 : f32
    %18 = vector.broadcast %cst_16 : f32 to vector<34x1xf32>
    %19 = arith.divf %17, %18 : vector<34x1xf32>
    %20 = arith.mulf %14, %14 : vector<34x1xf32>
    %21 = arith.subf %19, %20 : vector<34x1xf32>
    %22 = vector.broadcast %14 : vector<34x1xf32> to vector<34x128xf32>
    %23 = arith.subf %3, %22 : vector<34x128xf32>
    %cst_17 = arith.constant 9.99999974E-6 : f32
    %24 = vector.broadcast %cst_17 : f32 to vector<34x1xf32>
    %25 = arith.addf %21, %24 : vector<34x1xf32>
    %26 = math.rsqrt %25 : vector<34x1xf32>
    %27 = vector.broadcast %26 : vector<34x1xf32> to vector<34x128xf32>
    %28 = arith.mulf %23, %27 : vector<34x128xf32>
    %29 = vector.broadcast %8 : vector<1x128xf32> to vector<34x128xf32>
    %30 = arith.mulf %28, %29 : vector<34x128xf32>
    %31 = vector.broadcast %10 : vector<1x128xf32> to vector<34x128xf32>
    %32 = arith.addf %30, %31 : vector<34x128xf32>
    %33 = arith.truncf %32 : vector<34x128xf32> to vector<34x128xbf16>
    %c0_18 = arith.constant 0 : index
    %c0_19 = arith.constant 0 : index
    %c0_20 = arith.constant 0 : index
    %34 = vector.load %arg14[%c0_18, %c0_19, %c0_20] : memref<1x128x640xbf16, #tpu.memory_space<vmem>>, vector<1x128x640xbf16>
    %35 = vector.shape_cast %34 : vector<1x128x640xbf16> to vector<128x640xbf16>
    %cst_21 = arith.constant dense<0.000000e+00> : vector<34x640xf32>
    %36 = tpu.matmul %33, %35, %cst_21 {dimension_numbers = #tpu.dot_dimension_numbers<[1], [0], [0], [1], [0, 0, 1, 1], [], []>} : vector<34x128xbf16>, vector<128x640xbf16>, vector<34x640xf32> -> vector<34x640xf32>
    %c0_22 = arith.constant 0 : index
    %c0_23 = arith.constant 0 : index
    %c0_24 = arith.constant 0 : index
    %37 = vector.load %arg15[%c0_22, %c0_23, %c0_24] : memref<1x1x640xf32, #tpu.memory_space<vmem>>, vector<1x1x640xf32>
    %38 = vector.shape_cast %37 : vector<1x1x640xf32> to vector<1x640xf32>
    %39 = vector.broadcast %38 : vector<1x640xf32> to vector<34x640xf32>
    %40 = arith.addf %36, %39 : vector<34x640xf32>
    %41 = vector.extract_strided_slice %40 {offsets = [0, 0], sizes = [34, 128], strides = [1, 1]} : vector<34x640xf32> to vector<34x128xf32>
    %42 = arith.mulf %41, %4 : vector<34x128xf32>
    %43 = vector.extract_strided_slice %40 {offsets = [0, 384], sizes = [34, 128], strides = [1, 1]} : vector<34x640xf32> to vector<34x128xf32>
    %44 = arith.mulf %43, %5 : vector<34x128xf32>
    %45 = arith.addf %42, %44 : vector<34x128xf32>
    %46 = vector.extract_strided_slice %40 {offsets = [0, 128], sizes = [34, 128], strides = [1, 1]} : vector<34x640xf32> to vector<34x128xf32>
    %47 = arith.mulf %46, %4 : vector<34x128xf32>
    %48 = vector.extract_strided_slice %40 {offsets = [0, 512], sizes = [34, 128], strides = [1, 1]} : vector<34x640xf32> to vector<34x128xf32>
    %49 = arith.mulf %48, %5 : vector<34x128xf32>
    %50 = arith.addf %47, %49 : vector<34x128xf32>
    %51 = vector.extract_strided_slice %40 {offsets = [0, 256], sizes = [34, 128], strides = [1, 1]} : vector<34x640xf32> to vector<34x128xf32>
    %52 = arith.truncf %50 : vector<34x128xf32> to vector<34x128xbf16>
    %cst_25 = arith.constant 0.000000e+00 : f32
    %53 = vector.broadcast %cst_25 : f32 to vector<34x128xf32>
    %c0_26 = arith.constant 0 : index
    %c0_27 = arith.constant 0 : index
    %c0_28 = arith.constant 0 : index
    %54 = vector.load %arg11[%c0_26, %c0_27, %c0_28] : memref<8x1x128xf32, #tpu.memory_space<vmem>>, vector<1x1x128xf32>
    %55 = vector.shape_cast %54 : vector<1x1x128xf32> to vector<1x128xf32>
    %56 = vector.broadcast %55 : vector<1x128xf32> to vector<34x128xf32>
    %57 = arith.mulf %45, %56 : vector<34x128xf32>
    %58 = arith.truncf %57 : vector<34x128xf32> to vector<34x128xbf16>
    "tpu.trace_start"() <{level = 10 : i32, message = "qd,kd->qk"}> : () -> ()
    %cst_29 = arith.constant dense<0.000000e+00> : vector<34x34xf32>
    %59 = tpu.matmul %58, %52, %cst_29 {dimension_numbers = #tpu.dot_dimension_numbers<[1], [1], [0], [0], [0, 0, 1, 0], [], []>} : vector<34x128xbf16>, vector<34x128xbf16>, vector<34x34xf32> -> vector<34x34xf32>
    "tpu.trace_stop"() : () -> ()
    %60 = arith.addf %59, %6 : vector<34x34xf32>
    %cst_30 = arith.constant dense<0xFF800000> : vector<34xf32>
    %61 = vector.multi_reduction <maximumf>, %60, %cst_30 [1] : vector<34x34xf32> to vector<34xf32>
    %62 = vector.shape_cast %61 : vector<34xf32> to vector<34x1xf32>
    %63 = vector.broadcast %62 : vector<34x1xf32> to vector<34x34xf32>
    %64 = arith.subf %60, %63 : vector<34x34xf32>
    %65 = math.exp %64 : vector<34x34xf32>
    %cst_31 = arith.constant dense<0.000000e+00> : vector<34xf32>
    %66 = vector.multi_reduction <add>, %65, %cst_31 [1] : vector<34x34xf32> to vector<34xf32>
    %67 = vector.shape_cast %66 : vector<34xf32> to vector<34x1xf32>
    %68 = tpu.reciprocal %67 {approx = true} : vector<34x1xf32> -> vector<34x1xf32>
    %69 = vector.broadcast %68 : vector<34x1xf32> to vector<34x34xf32>
    %70 = arith.mulf %65, %69 : vector<34x34xf32>
    %71 = arith.truncf %70 : vector<34x34xf32> to vector<34x34xbf16>
    %72 = vector.broadcast %55 : vector<1x128xf32> to vector<34x128xf32>
    %73 = arith.mulf %51, %72 : vector<34x128xf32>
    %74 = arith.truncf %73 : vector<34x128xf32> to vector<34x128xbf16>
    %cst_32 = arith.constant dense<0.000000e+00> : vector<34x128xf32>
    %75 = tpu.matmul %71, %74, %cst_32 {dimension_numbers = #tpu.dot_dimension_numbers<[1], [0], [0], [1], [0, 0, 1, 1], [], []>} : vector<34x34xbf16>, vector<34x128xbf16>, vector<34x128xf32> -> vector<34x128xf32>
    %76 = arith.addf %53, %75 : vector<34x128xf32>
    %c1 = arith.constant 1 : index
    %c0_33 = arith.constant 0 : index
    %c0_34 = arith.constant 0 : index
    %77 = vector.load %arg11[%c1, %c0_33, %c0_34] : memref<8x1x128xf32, #tpu.memory_space<vmem>>, vector<1x1x128xf32>
    %78 = vector.shape_cast %77 : vector<1x1x128xf32> to vector<1x128xf32>
    %79 = vector.broadcast %78 : vector<1x128xf32> to vector<34x128xf32>
    %80 = arith.mulf %45, %79 : vector<34x128xf32>
    %81 = arith.truncf %80 : vector<34x128xf32> to vector<34x128xbf16>
    "tpu.trace_start"() <{level = 10 : i32, message = "qd,kd->qk"}> : () -> ()
    %cst_35 = arith.constant dense<0.000000e+00> : vector<34x34xf32>
    %82 = tpu.matmul %81, %52, %cst_35 {dimension_numbers = #tpu.dot_dimension_numbers<[1], [1], [0], [0], [0, 0, 1, 0], [], []>} : vector<34x128xbf16>, vector<34x128xbf16>, vector<34x34xf32> -> vector<34x34xf32>
    "tpu.trace_stop"() : () -> ()
    %83 = arith.addf %82, %6 : vector<34x34xf32>
    %cst_36 = arith.constant dense<0xFF800000> : vector<34xf32>
    %84 = vector.multi_reduction <maximumf>, %83, %cst_36 [1] : vector<34x34xf32> to vector<34xf32>
    %85 = vector.shape_cast %84 : vector<34xf32> to vector<34x1xf32>
    %86 = vector.broadcast %85 : vector<34x1xf32> to vector<34x34xf32>
    %87 = arith.subf %83, %86 : vector<34x34xf32>
    %88 = math.exp %87 : vector<34x34xf32>
    %cst_37 = arith.constant dense<0.000000e+00> : vector<34xf32>
    %89 = vector.multi_reduction <add>, %88, %cst_37 [1] : vector<34x34xf32> to vector<34xf32>
    %90 = vector.shape_cast %89 : vector<34xf32> to vector<34x1xf32>
    %91 = tpu.reciprocal %90 {approx = true} : vector<34x1xf32> -> vector<34x1xf32>
    %92 = vector.broadcast %91 : vector<34x1xf32> to vector<34x34xf32>
    %93 = arith.mulf %88, %92 : vector<34x34xf32>
    %94 = arith.truncf %93 : vector<34x34xf32> to vector<34x34xbf16>
    %95 = vector.broadcast %78 : vector<1x128xf32> to vector<34x128xf32>
    %96 = arith.mulf %51, %95 : vector<34x128xf32>
    %97 = arith.truncf %96 : vector<34x128xf32> to vector<34x128xbf16>
    %cst_38 = arith.constant dense<0.000000e+00> : vector<34x128xf32>
    %98 = tpu.matmul %94, %97, %cst_38 {dimension_numbers = #tpu.dot_dimension_numbers<[1], [0], [0], [1], [0, 0, 1, 1], [], []>} : vector<34x34xbf16>, vector<34x128xbf16>, vector<34x128xf32> -> vector<34x128xf32>
    %99 = arith.addf %76, %98 : vector<34x128xf32>
    %c2 = arith.constant 2 : index
    %c0_39 = arith.constant 0 : index
    %c0_40 = arith.constant 0 : index
    %100 = vector.load %arg11[%c2, %c0_39, %c0_40] : memref<8x1x128xf32, #tpu.memory_space<vmem>>, vector<1x1x128xf32>
    %101 = vector.shape_cast %100 : vector<1x1x128xf32> to vector<1x128xf32>
    %102 = vector.broadcast %101 : vector<1x128xf32> to vector<34x128xf32>
    %103 = arith.mulf %45, %102 : vector<34x128xf32>
    %104 = arith.truncf %103 : vector<34x128xf32> to vector<34x128xbf16>
    "tpu.trace_start"() <{level = 10 : i32, message = "qd,kd->qk"}> : () -> ()
    %cst_41 = arith.constant dense<0.000000e+00> : vector<34x34xf32>
    %105 = tpu.matmul %104, %52, %cst_41 {dimension_numbers = #tpu.dot_dimension_numbers<[1], [1], [0], [0], [0, 0, 1, 0], [], []>} : vector<34x128xbf16>, vector<34x128xbf16>, vector<34x34xf32> -> vector<34x34xf32>
    "tpu.trace_stop"() : () -> ()
    %106 = arith.addf %105, %6 : vector<34x34xf32>
    %cst_42 = arith.constant dense<0xFF800000> : vector<34xf32>
    %107 = vector.multi_reduction <maximumf>, %106, %cst_42 [1] : vector<34x34xf32> to vector<34xf32>
    %108 = vector.shape_cast %107 : vector<34xf32> to vector<34x1xf32>
    %109 = vector.broadcast %108 : vector<34x1xf32> to vector<34x34xf32>
    %110 = arith.subf %106, %109 : vector<34x34xf32>
    %111 = math.exp %110 : vector<34x34xf32>
    %cst_43 = arith.constant dense<0.000000e+00> : vector<34xf32>
    %112 = vector.multi_reduction <add>, %111, %cst_43 [1] : vector<34x34xf32> to vector<34xf32>
    %113 = vector.shape_cast %112 : vector<34xf32> to vector<34x1xf32>
    %114 = tpu.reciprocal %113 {approx = true} : vector<34x1xf32> -> vector<34x1xf32>
    %115 = vector.broadcast %114 : vector<34x1xf32> to vector<34x34xf32>
    %116 = arith.mulf %111, %115 : vector<34x34xf32>
    %117 = arith.truncf %116 : vector<34x34xf32> to vector<34x34xbf16>
    %118 = vector.broadcast %101 : vector<1x128xf32> to vector<34x128xf32>
    %119 = arith.mulf %51, %118 : vector<34x128xf32>
    %120 = arith.truncf %119 : vector<34x128xf32> to vector<34x128xbf16>
    %cst_44 = arith.constant dense<0.000000e+00> : vector<34x128xf32>
    %121 = tpu.matmul %117, %120, %cst_44 {dimension_numbers = #tpu.dot_dimension_numbers<[1], [0], [0], [1], [0, 0, 1, 1], [], []>} : vector<34x34xbf16>, vector<34x128xbf16>, vector<34x128xf32> -> vector<34x128xf32>
    %122 = arith.addf %99, %121 : vector<34x128xf32>
    %c3 = arith.constant 3 : index
    %c0_45 = arith.constant 0 : index
    %c0_46 = arith.constant 0 : index
    %123 = vector.load %arg11[%c3, %c0_45, %c0_46] : memref<8x1x128xf32, #tpu.memory_space<vmem>>, vector<1x1x128xf32>
    %124 = vector.shape_cast %123 : vector<1x1x128xf32> to vector<1x128xf32>
    %125 = vector.broadcast %124 : vector<1x128xf32> to vector<34x128xf32>
    %126 = arith.mulf %45, %125 : vector<34x128xf32>
    %127 = arith.truncf %126 : vector<34x128xf32> to vector<34x128xbf16>
    "tpu.trace_start"() <{level = 10 : i32, message = "qd,kd->qk"}> : () -> ()
    %cst_47 = arith.constant dense<0.000000e+00> : vector<34x34xf32>
    %128 = tpu.matmul %127, %52, %cst_47 {dimension_numbers = #tpu.dot_dimension_numbers<[1], [1], [0], [0], [0, 0, 1, 0], [], []>} : vector<34x128xbf16>, vector<34x128xbf16>, vector<34x34xf32> -> vector<34x34xf32>
    "tpu.trace_stop"() : () -> ()
    %129 = arith.addf %128, %6 : vector<34x34xf32>
    %cst_48 = arith.constant dense<0xFF800000> : vector<34xf32>
    %130 = vector.multi_reduction <maximumf>, %129, %cst_48 [1] : vector<34x34xf32> to vector<34xf32>
    %131 = vector.shape_cast %130 : vector<34xf32> to vector<34x1xf32>
    %132 = vector.broadcast %131 : vector<34x1xf32> to vector<34x34xf32>
    %133 = arith.subf %129, %132 : vector<34x34xf32>
    %134 = math.exp %133 : vector<34x34xf32>
    %cst_49 = arith.constant dense<0.000000e+00> : vector<34xf32>
    %135 = vector.multi_reduction <add>, %134, %cst_49 [1] : vector<34x34xf32> to vector<34xf32>
    %136 = vector.shape_cast %135 : vector<34xf32> to vector<34x1xf32>
    %137 = tpu.reciprocal %136 {approx = true} : vector<34x1xf32> -> vector<34x1xf32>
    %138 = vector.broadcast %137 : vector<34x1xf32> to vector<34x34xf32>
    %139 = arith.mulf %134, %138 : vector<34x34xf32>
    %140 = arith.truncf %139 : vector<34x34xf32> to vector<34x34xbf16>
    %141 = vector.broadcast %124 : vector<1x128xf32> to vector<34x128xf32>
    %142 = arith.mulf %51, %141 : vector<34x128xf32>
    %143 = arith.truncf %142 : vector<34x128xf32> to vector<34x128xbf16>
    %cst_50 = arith.constant dense<0.000000e+00> : vector<34x128xf32>
    %144 = tpu.matmul %140, %143, %cst_50 {dimension_numbers = #tpu.dot_dimension_numbers<[1], [0], [0], [1], [0, 0, 1, 1], [], []>} : vector<34x34xbf16>, vector<34x128xbf16>, vector<34x128xf32> -> vector<34x128xf32>
    %145 = arith.addf %122, %144 : vector<34x128xf32>
    %c4 = arith.constant 4 : index
    %c0_51 = arith.constant 0 : index
    %c0_52 = arith.constant 0 : index
    %146 = vector.load %arg11[%c4, %c0_51, %c0_52] : memref<8x1x128xf32, #tpu.memory_space<vmem>>, vector<1x1x128xf32>
    %147 = vector.shape_cast %146 : vector<1x1x128xf32> to vector<1x128xf32>
    %148 = vector.broadcast %147 : vector<1x128xf32> to vector<34x128xf32>
    %149 = arith.mulf %45, %148 : vector<34x128xf32>
    %150 = arith.truncf %149 : vector<34x128xf32> to vector<34x128xbf16>
    "tpu.trace_start"() <{level = 10 : i32, message = "qd,kd->qk"}> : () -> ()
    %cst_53 = arith.constant dense<0.000000e+00> : vector<34x34xf32>
    %151 = tpu.matmul %150, %52, %cst_53 {dimension_numbers = #tpu.dot_dimension_numbers<[1], [1], [0], [0], [0, 0, 1, 0], [], []>} : vector<34x128xbf16>, vector<34x128xbf16>, vector<34x34xf32> -> vector<34x34xf32>
    "tpu.trace_stop"() : () -> ()
    %152 = arith.addf %151, %6 : vector<34x34xf32>
    %cst_54 = arith.constant dense<0xFF800000> : vector<34xf32>
    %153 = vector.multi_reduction <maximumf>, %152, %cst_54 [1] : vector<34x34xf32> to vector<34xf32>
    %154 = vector.shape_cast %153 : vector<34xf32> to vector<34x1xf32>
    %155 = vector.broadcast %154 : vector<34x1xf32> to vector<34x34xf32>
    %156 = arith.subf %152, %155 : vector<34x34xf32>
    %157 = math.exp %156 : vector<34x34xf32>
    %cst_55 = arith.constant dense<0.000000e+00> : vector<34xf32>
    %158 = vector.multi_reduction <add>, %157, %cst_55 [1] : vector<34x34xf32> to vector<34xf32>
    %159 = vector.shape_cast %158 : vector<34xf32> to vector<34x1xf32>
    %160 = tpu.reciprocal %159 {approx = true} : vector<34x1xf32> -> vector<34x1xf32>
    %161 = vector.broadcast %160 : vector<34x1xf32> to vector<34x34xf32>
    %162 = arith.mulf %157, %161 : vector<34x34xf32>
    %163 = arith.truncf %162 : vector<34x34xf32> to vector<34x34xbf16>
    %164 = vector.broadcast %147 : vector<1x128xf32> to vector<34x128xf32>
    %165 = arith.mulf %51, %164 : vector<34x128xf32>
    %166 = arith.truncf %165 : vector<34x128xf32> to vector<34x128xbf16>
    %cst_56 = arith.constant dense<0.000000e+00> : vector<34x128xf32>
    %167 = tpu.matmul %163, %166, %cst_56 {dimension_numbers = #tpu.dot_dimension_numbers<[1], [0], [0], [1], [0, 0, 1, 1], [], []>} : vector<34x34xbf16>, vector<34x128xbf16>, vector<34x128xf32> -> vector<34x128xf32>
    %168 = arith.addf %145, %167 : vector<34x128xf32>
    %c5 = arith.constant 5 : index
    %c0_57 = arith.constant 0 : index
    %c0_58 = arith.constant 0 : index
    %169 = vector.load %arg11[%c5, %c0_57, %c0_58] : memref<8x1x128xf32, #tpu.memory_space<vmem>>, vector<1x1x128xf32>
    %170 = vector.shape_cast %169 : vector<1x1x128xf32> to vector<1x128xf32>
    %171 = vector.broadcast %170 : vector<1x128xf32> to vector<34x128xf32>
    %172 = arith.mulf %45, %171 : vector<34x128xf32>
    %173 = arith.truncf %172 : vector<34x128xf32> to vector<34x128xbf16>
    "tpu.trace_start"() <{level = 10 : i32, message = "qd,kd->qk"}> : () -> ()
    %cst_59 = arith.constant dense<0.000000e+00> : vector<34x34xf32>
    %174 = tpu.matmul %173, %52, %cst_59 {dimension_numbers = #tpu.dot_dimension_numbers<[1], [1], [0], [0], [0, 0, 1, 0], [], []>} : vector<34x128xbf16>, vector<34x128xbf16>, vector<34x34xf32> -> vector<34x34xf32>
    "tpu.trace_stop"() : () -> ()
    %175 = arith.addf %174, %6 : vector<34x34xf32>
    %cst_60 = arith.constant dense<0xFF800000> : vector<34xf32>
    %176 = vector.multi_reduction <maximumf>, %175, %cst_60 [1] : vector<34x34xf32> to vector<34xf32>
    %177 = vector.shape_cast %176 : vector<34xf32> to vector<34x1xf32>
    %178 = vector.broadcast %177 : vector<34x1xf32> to vector<34x34xf32>
    %179 = arith.subf %175, %178 : vector<34x34xf32>
    %180 = math.exp %179 : vector<34x34xf32>
    %cst_61 = arith.constant dense<0.000000e+00> : vector<34xf32>
    %181 = vector.multi_reduction <add>, %180, %cst_61 [1] : vector<34x34xf32> to vector<34xf32>
    %182 = vector.shape_cast %181 : vector<34xf32> to vector<34x1xf32>
    %183 = tpu.reciprocal %182 {approx = true} : vector<34x1xf32> -> vector<34x1xf32>
    %184 = vector.broadcast %183 : vector<34x1xf32> to vector<34x34xf32>
    %185 = arith.mulf %180, %184 : vector<34x34xf32>
    %186 = arith.truncf %185 : vector<34x34xf32> to vector<34x34xbf16>
    %187 = vector.broadcast %170 : vector<1x128xf32> to vector<34x128xf32>
    %188 = arith.mulf %51, %187 : vector<34x128xf32>
    %189 = arith.truncf %188 : vector<34x128xf32> to vector<34x128xbf16>
    %cst_62 = arith.constant dense<0.000000e+00> : vector<34x128xf32>
    %190 = tpu.matmul %186, %189, %cst_62 {dimension_numbers = #tpu.dot_dimension_numbers<[1], [0], [0], [1], [0, 0, 1, 1], [], []>} : vector<34x34xbf16>, vector<34x128xbf16>, vector<34x128xf32> -> vector<34x128xf32>
    %191 = arith.addf %168, %190 : vector<34x128xf32>
    %c6 = arith.constant 6 : index
    %c0_63 = arith.constant 0 : index
    %c0_64 = arith.constant 0 : index
    %192 = vector.load %arg11[%c6, %c0_63, %c0_64] : memref<8x1x128xf32, #tpu.memory_space<vmem>>, vector<1x1x128xf32>
    %193 = vector.shape_cast %192 : vector<1x1x128xf32> to vector<1x128xf32>
    %194 = vector.broadcast %193 : vector<1x128xf32> to vector<34x128xf32>
    %195 = arith.mulf %45, %194 : vector<34x128xf32>
    %196 = arith.truncf %195 : vector<34x128xf32> to vector<34x128xbf16>
    "tpu.trace_start"() <{level = 10 : i32, message = "qd,kd->qk"}> : () -> ()
    %cst_65 = arith.constant dense<0.000000e+00> : vector<34x34xf32>
    %197 = tpu.matmul %196, %52, %cst_65 {dimension_numbers = #tpu.dot_dimension_numbers<[1], [1], [0], [0], [0, 0, 1, 0], [], []>} : vector<34x128xbf16>, vector<34x128xbf16>, vector<34x34xf32> -> vector<34x34xf32>
    "tpu.trace_stop"() : () -> ()
    %198 = arith.addf %197, %6 : vector<34x34xf32>
    %cst_66 = arith.constant dense<0xFF800000> : vector<34xf32>
    %199 = vector.multi_reduction <maximumf>, %198, %cst_66 [1] : vector<34x34xf32> to vector<34xf32>
    %200 = vector.shape_cast %199 : vector<34xf32> to vector<34x1xf32>
    %201 = vector.broadcast %200 : vector<34x1xf32> to vector<34x34xf32>
    %202 = arith.subf %198, %201 : vector<34x34xf32>
    %203 = math.exp %202 : vector<34x34xf32>
    %cst_67 = arith.constant dense<0.000000e+00> : vector<34xf32>
    %204 = vector.multi_reduction <add>, %203, %cst_67 [1] : vector<34x34xf32> to vector<34xf32>
    %205 = vector.shape_cast %204 : vector<34xf32> to vector<34x1xf32>
    %206 = tpu.reciprocal %205 {approx = true} : vector<34x1xf32> -> vector<34x1xf32>
    %207 = vector.broadcast %206 : vector<34x1xf32> to vector<34x34xf32>
    %208 = arith.mulf %203, %207 : vector<34x34xf32>
    %209 = arith.truncf %208 : vector<34x34xf32> to vector<34x34xbf16>
    %210 = vector.broadcast %193 : vector<1x128xf32> to vector<34x128xf32>
    %211 = arith.mulf %51, %210 : vector<34x128xf32>
    %212 = arith.truncf %211 : vector<34x128xf32> to vector<34x128xbf16>
    %cst_68 = arith.constant dense<0.000000e+00> : vector<34x128xf32>
    %213 = tpu.matmul %209, %212, %cst_68 {dimension_numbers = #tpu.dot_dimension_numbers<[1], [0], [0], [1], [0, 0, 1, 1], [], []>} : vector<34x34xbf16>, vector<34x128xbf16>, vector<34x128xf32> -> vector<34x128xf32>
    %214 = arith.addf %191, %213 : vector<34x128xf32>
    %c7 = arith.constant 7 : index
    %c0_69 = arith.constant 0 : index
    %c0_70 = arith.constant 0 : index
    %215 = vector.load %arg11[%c7, %c0_69, %c0_70] : memref<8x1x128xf32, #tpu.memory_space<vmem>>, vector<1x1x128xf32>
    %216 = vector.shape_cast %215 : vector<1x1x128xf32> to vector<1x128xf32>
    %217 = vector.broadcast %216 : vector<1x128xf32> to vector<34x128xf32>
    %218 = arith.mulf %45, %217 : vector<34x128xf32>
    %219 = arith.truncf %218 : vector<34x128xf32> to vector<34x128xbf16>
    "tpu.trace_start"() <{level = 10 : i32, message = "qd,kd->qk"}> : () -> ()
    %cst_71 = arith.constant dense<0.000000e+00> : vector<34x34xf32>
    %220 = tpu.matmul %219, %52, %cst_71 {dimension_numbers = #tpu.dot_dimension_numbers<[1], [1], [0], [0], [0, 0, 1, 0], [], []>} : vector<34x128xbf16>, vector<34x128xbf16>, vector<34x34xf32> -> vector<34x34xf32>
    "tpu.trace_stop"() : () -> ()
    %221 = arith.addf %220, %6 : vector<34x34xf32>
    %cst_72 = arith.constant dense<0xFF800000> : vector<34xf32>
    %222 = vector.multi_reduction <maximumf>, %221, %cst_72 [1] : vector<34x34xf32> to vector<34xf32>
    %223 = vector.shape_cast %222 : vector<34xf32> to vector<34x1xf32>
    %224 = vector.broadcast %223 : vector<34x1xf32> to vector<34x34xf32>
    %225 = arith.subf %221, %224 : vector<34x34xf32>
    %226 = math.exp %225 : vector<34x34xf32>
    %cst_73 = arith.constant dense<0.000000e+00> : vector<34xf32>
    %227 = vector.multi_reduction <add>, %226, %cst_73 [1] : vector<34x34xf32> to vector<34xf32>
    %228 = vector.shape_cast %227 : vector<34xf32> to vector<34x1xf32>
    %229 = tpu.reciprocal %228 {approx = true} : vector<34x1xf32> -> vector<34x1xf32>
    %230 = vector.broadcast %229 : vector<34x1xf32> to vector<34x34xf32>
    %231 = arith.mulf %226, %230 : vector<34x34xf32>
    %232 = arith.truncf %231 : vector<34x34xf32> to vector<34x34xbf16>
    %233 = vector.broadcast %216 : vector<1x128xf32> to vector<34x128xf32>
    %234 = arith.mulf %51, %233 : vector<34x128xf32>
    %235 = arith.truncf %234 : vector<34x128xf32> to vector<34x128xbf16>
    %cst_74 = arith.constant dense<0.000000e+00> : vector<34x128xf32>
    %236 = tpu.matmul %232, %235, %cst_74 {dimension_numbers = #tpu.dot_dimension_numbers<[1], [0], [0], [1], [0, 0, 1, 1], [], []>} : vector<34x34xbf16>, vector<34x128xbf16>, vector<34x128xf32> -> vector<34x128xf32>
    %237 = arith.addf %214, %236 : vector<34x128xf32>
    %238 = arith.truncf %237 : vector<34x128xf32> to vector<34x128xbf16>
    %c0_75 = arith.constant 0 : index
    %c0_76 = arith.constant 0 : index
    %c0_77 = arith.constant 0 : index
    %239 = vector.load %arg16[%c0_75, %c0_76, %c0_77] : memref<1x128x128xbf16, #tpu.memory_space<vmem>>, vector<1x128x128xbf16>
    %240 = vector.shape_cast %239 : vector<1x128x128xbf16> to vector<128x128xbf16>
    %cst_78 = arith.constant dense<0.000000e+00> : vector<34x128xf32>
    %241 = tpu.matmul %238, %240, %cst_78 {dimension_numbers = #tpu.dot_dimension_numbers<[1], [0], [0], [1], [0, 0, 1, 1], [], []>} : vector<34x128xbf16>, vector<128x128xbf16>, vector<34x128xf32> -> vector<34x128xf32>
    %c0_79 = arith.constant 0 : index
    %c0_80 = arith.constant 0 : index
    %c0_81 = arith.constant 0 : index
    %242 = vector.load %arg17[%c0_79, %c0_80, %c0_81] : memref<1x1x128xf32, #tpu.memory_space<vmem>>, vector<1x1x128xf32>
    %243 = vector.shape_cast %242 : vector<1x1x128xf32> to vector<1x128xf32>
    %244 = vector.broadcast %243 : vector<1x128xf32> to vector<34x128xf32>
    %245 = arith.addf %241, %244 : vector<34x128xf32>
    %246 = arith.addf %3, %245 : vector<34x128xf32>
    %c0_82 = arith.constant 0 : index
    %c0_83 = arith.constant 0 : index
    %c0_84 = arith.constant 0 : index
    %247 = vector.load %arg18[%c0_82, %c0_83, %c0_84] : memref<1x1x128xf32, #tpu.memory_space<vmem>>, vector<1x1x128xf32>
    %248 = vector.shape_cast %247 : vector<1x1x128xf32> to vector<1x128xf32>
    %c0_85 = arith.constant 0 : index
    %c0_86 = arith.constant 0 : index
    %c0_87 = arith.constant 0 : index
    %249 = vector.load %arg19[%c0_85, %c0_86, %c0_87] : memref<1x1x128xf32, #tpu.memory_space<vmem>>, vector<1x1x128xf32>
    %250 = vector.shape_cast %249 : vector<1x1x128xf32> to vector<1x128xf32>
    %cst_88 = arith.constant dense<0.000000e+00> : vector<34xf32>
    %251 = vector.multi_reduction <add>, %246, %cst_88 [1] : vector<34x128xf32> to vector<34xf32>
    %252 = vector.shape_cast %251 : vector<34xf32> to vector<34x1xf32>
    %cst_89 = arith.constant 1.280000e+02 : f32
    %253 = vector.broadcast %cst_89 : f32 to vector<34x1xf32>
    %254 = arith.divf %252, %253 : vector<34x1xf32>
    %255 = arith.mulf %246, %246 : vector<34x128xf32>
    %cst_90 = arith.constant dense<0.000000e+00> : vector<34xf32>
    %256 = vector.multi_reduction <add>, %255, %cst_90 [1] : vector<34x128xf32> to vector<34xf32>
    %257 = vector.shape_cast %256 : vector<34xf32> to vector<34x1xf32>
    %cst_91 = arith.constant 1.280000e+02 : f32
    %258 = vector.broadcast %cst_91 : f32 to vector<34x1xf32>
    %259 = arith.divf %257, %258 : vector<34x1xf32>
    %260 = arith.mulf %254, %254 : vector<34x1xf32>
    %261 = arith.subf %259, %260 : vector<34x1xf32>
    %262 = vector.broadcast %254 : vector<34x1xf32> to vector<34x128xf32>
    %263 = arith.subf %246, %262 : vector<34x128xf32>
    %cst_92 = arith.constant 9.99999974E-6 : f32
    %264 = vector.broadcast %cst_92 : f32 to vector<34x1xf32>
    %265 = arith.addf %261, %264 : vector<34x1xf32>
    %266 = math.rsqrt %265 : vector<34x1xf32>
    %267 = vector.broadcast %266 : vector<34x1xf32> to vector<34x128xf32>
    %268 = arith.mulf %263, %267 : vector<34x128xf32>
    %269 = vector.broadcast %248 : vector<1x128xf32> to vector<34x128xf32>
    %270 = arith.mulf %268, %269 : vector<34x128xf32>
    %271 = vector.broadcast %250 : vector<1x128xf32> to vector<34x128xf32>
    %272 = arith.addf %270, %271 : vector<34x128xf32>
    %273 = arith.truncf %272 : vector<34x128xf32> to vector<34x128xbf16>
    %c0_93 = arith.constant 0 : index
    %c0_94 = arith.constant 0 : index
    %c0_95 = arith.constant 0 : index
    %274 = vector.load %arg20[%c0_93, %c0_94, %c0_95] : memref<1x128x512xbf16, #tpu.memory_space<vmem>>, vector<1x128x512xbf16>
    %275 = vector.shape_cast %274 : vector<1x128x512xbf16> to vector<128x512xbf16>
    %cst_96 = arith.constant dense<0.000000e+00> : vector<34x512xf32>
    %276 = tpu.matmul %273, %275, %cst_96 {dimension_numbers = #tpu.dot_dimension_numbers<[1], [0], [0], [1], [0, 0, 1, 1], [], []>} : vector<34x128xbf16>, vector<128x512xbf16>, vector<34x512xf32> -> vector<34x512xf32>
    %c0_97 = arith.constant 0 : index
    %c0_98 = arith.constant 0 : index
    %c0_99 = arith.constant 0 : index
    %277 = vector.load %arg21[%c0_97, %c0_98, %c0_99] : memref<1x1x512xf32, #tpu.memory_space<vmem>>, vector<1x1x512xf32>
    %278 = vector.shape_cast %277 : vector<1x1x512xf32> to vector<1x512xf32>
    %279 = vector.broadcast %278 : vector<1x512xf32> to vector<34x512xf32>
    %280 = arith.addf %276, %279 : vector<34x512xf32>
    %281 = arith.mulf %280, %280 : vector<34x512xf32>
    %282 = arith.mulf %280, %281 : vector<34x512xf32>
    %cst_100 = arith.constant 4.471500e-02 : f32
    %283 = vector.broadcast %cst_100 : f32 to vector<34x512xf32>
    %284 = arith.mulf %283, %282 : vector<34x512xf32>
    %285 = arith.addf %280, %284 : vector<34x512xf32>
    %cst_101 = arith.constant 0.797884583 : f32
    %286 = vector.broadcast %cst_101 : f32 to vector<34x512xf32>
    %287 = arith.mulf %286, %285 : vector<34x512xf32>
    %288 = math.tanh %287 : vector<34x512xf32>
    %cst_102 = arith.constant 1.000000e+00 : f32
    %289 = vector.broadcast %cst_102 : f32 to vector<34x512xf32>
    %290 = arith.addf %289, %288 : vector<34x512xf32>
    %cst_103 = arith.constant 5.000000e-01 : f32
    %291 = vector.broadcast %cst_103 : f32 to vector<34x512xf32>
    %292 = arith.mulf %291, %290 : vector<34x512xf32>
    %293 = arith.mulf %280, %292 : vector<34x512xf32>
    %294 = arith.truncf %293 : vector<34x512xf32> to vector<34x512xbf16>
    %c0_104 = arith.constant 0 : index
    %c0_105 = arith.constant 0 : index
    %c0_106 = arith.constant 0 : index
    %295 = vector.load %arg22[%c0_104, %c0_105, %c0_106] : memref<1x512x128xbf16, #tpu.memory_space<vmem>>, vector<1x512x128xbf16>
    %296 = vector.shape_cast %295 : vector<1x512x128xbf16> to vector<512x128xbf16>
    %cst_107 = arith.constant dense<0.000000e+00> : vector<34x128xf32>
    %297 = tpu.matmul %294, %296, %cst_107 {dimension_numbers = #tpu.dot_dimension_numbers<[1], [0], [0], [1], [0, 0, 1, 1], [], []>} : vector<34x512xbf16>, vector<512x128xbf16>, vector<34x128xf32> -> vector<34x128xf32>
    %c0_108 = arith.constant 0 : index
    %c0_109 = arith.constant 0 : index
    %c0_110 = arith.constant 0 : index
    %298 = vector.load %arg23[%c0_108, %c0_109, %c0_110] : memref<1x1x128xf32, #tpu.memory_space<vmem>>, vector<1x1x128xf32>
    %299 = vector.shape_cast %298 : vector<1x1x128xf32> to vector<1x128xf32>
    %300 = vector.broadcast %299 : vector<1x128xf32> to vector<34x128xf32>
    %301 = arith.addf %297, %300 : vector<34x128xf32>
    %302 = arith.addf %246, %301 : vector<34x128xf32>
    %c0_111 = arith.constant 0 : index
    %c0_112 = arith.constant 0 : index
    %303 = vector.load %arg36[%c0_111, %c0_112] : memref<34x128xf32, #tpu.memory_space<vmem>>, vector<34x128xf32>
    tpu.vector_store %arg36[%c0_111, %c0_112], %302 {strides = array<i32>} : memref<34x128xf32, #tpu.memory_space<vmem>>, vector<34x128xf32>,
    %c5_i32 = arith.constant 5 : i32
    %304 = arith.cmpi eq, %arg1, %c5_i32 : i32
    %305 = arith.extui %304 : i1 to i32
    %c0_i32_113 = arith.constant 0 : i32
    %306 = arith.cmpi ne, %305, %c0_i32_113 : i32
    scf.if %306 {
      %c0_114 = arith.constant 0 : index
      %c0_115 = arith.constant 0 : index
      %307 = vector.load %arg24[%c0_114, %c0_115] : memref<1x128xf32, #tpu.memory_space<vmem>>, vector<1x128xf32>
      %c0_116 = arith.constant 0 : index
      %c0_117 = arith.constant 0 : index
      %308 = vector.load %arg25[%c0_116, %c0_117] : memref<1x128xf32, #tpu.memory_space<vmem>>, vector<1x128xf32>
      %cst_118 = arith.constant dense<0.000000e+00> : vector<34xf32>
      %309 = vector.multi_reduction <add>, %302, %cst_118 [1] : vector<34x128xf32> to vector<34xf32>
      %310 = vector.shape_cast %309 : vector<34xf32> to vector<34x1xf32>
      %cst_119 = arith.constant 1.280000e+02 : f32
      %311 = vector.broadcast %cst_119 : f32 to vector<34x1xf32>
      %312 = arith.divf %310, %311 : vector<34x1xf32>
      %313 = arith.mulf %302, %302 : vector<34x128xf32>
      %cst_120 = arith.constant dense<0.000000e+00> : vector<34xf32>
      %314 = vector.multi_reduction <add>, %313, %cst_120 [1] : vector<34x128xf32> to vector<34xf32>
      %315 = vector.shape_cast %314 : vector<34xf32> to vector<34x1xf32>
      %cst_121 = arith.constant 1.280000e+02 : f32
      %316 = vector.broadcast %cst_121 : f32 to vector<34x1xf32>
      %317 = arith.divf %315, %316 : vector<34x1xf32>
      %318 = arith.mulf %312, %312 : vector<34x1xf32>
      %319 = arith.subf %317, %318 : vector<34x1xf32>
      %320 = vector.broadcast %312 : vector<34x1xf32> to vector<34x128xf32>
      %321 = arith.subf %302, %320 : vector<34x128xf32>
      %cst_122 = arith.constant 9.99999974E-6 : f32
      %322 = vector.broadcast %cst_122 : f32 to vector<34x1xf32>
      %323 = arith.addf %319, %322 : vector<34x1xf32>
      %324 = math.rsqrt %323 : vector<34x1xf32>
      %325 = vector.broadcast %324 : vector<34x1xf32> to vector<34x128xf32>
      %326 = arith.mulf %321, %325 : vector<34x128xf32>
      %327 = vector.broadcast %307 : vector<1x128xf32> to vector<34x128xf32>
      %328 = arith.mulf %326, %327 : vector<34x128xf32>
      %329 = vector.broadcast %308 : vector<1x128xf32> to vector<34x128xf32>
      %330 = arith.addf %328, %329 : vector<34x128xf32>
      %c0_123 = arith.constant 0 : index
      %c0_124 = arith.constant 0 : index
      %331 = vector.load %arg37[%c0_123, %c0_124] : memref<34x128xf32, #tpu.memory_space<vmem>>, vector<34x128xf32>
      %332 = arith.addf %330, %331 : vector<34x128xf32>
      %c0_125 = arith.constant 0 : index
      %c0_126 = arith.constant 0 : index
      %333 = vector.load %arg26[%c0_125, %c0_126] : memref<1x128xf32, #tpu.memory_space<vmem>>, vector<1x128xf32>
      %c0_127 = arith.constant 0 : index
      %c0_128 = arith.constant 0 : index
      %334 = vector.load %arg27[%c0_127, %c0_128] : memref<1x128xf32, #tpu.memory_space<vmem>>, vector<1x128xf32>
      %cst_129 = arith.constant dense<0.000000e+00> : vector<34xf32>
      %335 = vector.multi_reduction <add>, %332, %cst_129 [1] : vector<34x128xf32> to vector<34xf32>
      %336 = vector.shape_cast %335 : vector<34xf32> to vector<34x1xf32>
      %cst_130 = arith.constant 1.280000e+02 : f32
      %337 = vector.broadcast %cst_130 : f32 to vector<34x1xf32>
      %338 = arith.divf %336, %337 : vector<34x1xf32>
      %339 = arith.mulf %332, %332 : vector<34x128xf32>
      %cst_131 = arith.constant dense<0.000000e+00> : vector<34xf32>
      %340 = vector.multi_reduction <add>, %339, %cst_131 [1] : vector<34x128xf32> to vector<34xf32>
      %341 = vector.shape_cast %340 : vector<34xf32> to vector<34x1xf32>
      %cst_132 = arith.constant 1.280000e+02 : f32
      %342 = vector.broadcast %cst_132 : f32 to vector<34x1xf32>
      %343 = arith.divf %341, %342 : vector<34x1xf32>
      %344 = arith.mulf %338, %338 : vector<34x1xf32>
      %345 = arith.subf %343, %344 : vector<34x1xf32>
      %346 = vector.broadcast %338 : vector<34x1xf32> to vector<34x128xf32>
      %347 = arith.subf %332, %346 : vector<34x128xf32>
      %cst_133 = arith.constant 9.99999974E-6 : f32
      %348 = vector.broadcast %cst_133 : f32 to vector<34x1xf32>
      %349 = arith.addf %345, %348 : vector<34x1xf32>
      %350 = math.rsqrt %349 : vector<34x1xf32>
      %351 = vector.broadcast %350 : vector<34x1xf32> to vector<34x128xf32>
      %352 = arith.mulf %347, %351 : vector<34x128xf32>
      %353 = vector.broadcast %333 : vector<1x128xf32> to vector<34x128xf32>
      %354 = arith.mulf %352, %353 : vector<34x128xf32>
      %355 = vector.broadcast %334 : vector<1x128xf32> to vector<34x128xf32>
      %356 = arith.addf %354, %355 : vector<34x128xf32>
      %c0_134 = arith.constant 0 : index
      %c0_135 = arith.constant 0 : index
      %c0_136 = arith.constant 0 : index
      %357 = vector.load %arg3[%c0_134, %c0_135, %c0_136] : memref<1x34x128xf32, #tpu.memory_space<vmem>>, vector<1x34x128xf32>
      %358 = vector.shape_cast %357 : vector<1x34x128xf32> to vector<34x128xf32>
      %359 = arith.mulf %356, %358 : vector<34x128xf32>
      %c0_137 = arith.constant 0 : index
      %c0_138 = arith.constant 0 : index
      %c0_139 = arith.constant 0 : index
      %360 = vector.load %arg4[%c0_137, %c0_138, %c0_139] : memref<1x34x128xf32, #tpu.memory_space<vmem>>, vector<1x34x128xf32>
      %361 = vector.shape_cast %360 : vector<1x34x128xf32> to vector<34x128xf32>
      %362 = arith.addf %359, %361 : vector<34x128xf32>
      %c0_140 = arith.constant 0 : index
      %c0_141 = arith.constant 0 : index
      %363 = vector.load %arg28[%c0_140, %c0_141] : memref<1x128xf32, #tpu.memory_space<vmem>>, vector<1x128xf32>
      %c0_142 = arith.constant 0 : index
      %c0_143 = arith.constant 0 : index
      %364 = vector.load %arg29[%c0_142, %c0_143] : memref<1x128xf32, #tpu.memory_space<vmem>>, vector<1x128xf32>
      %cst_144 = arith.constant dense<0.000000e+00> : vector<34xf32>
      %365 = vector.multi_reduction <add>, %362, %cst_144 [1] : vector<34x128xf32> to vector<34xf32>
      %366 = vector.shape_cast %365 : vector<34xf32> to vector<34x1xf32>
      %cst_145 = arith.constant 1.280000e+02 : f32
      %367 = vector.broadcast %cst_145 : f32 to vector<34x1xf32>
      %368 = arith.divf %366, %367 : vector<34x1xf32>
      %369 = arith.mulf %362, %362 : vector<34x128xf32>
      %cst_146 = arith.constant dense<0.000000e+00> : vector<34xf32>
      %370 = vector.multi_reduction <add>, %369, %cst_146 [1] : vector<34x128xf32> to vector<34xf32>
      %371 = vector.shape_cast %370 : vector<34xf32> to vector<34x1xf32>
      %cst_147 = arith.constant 1.280000e+02 : f32
      %372 = vector.broadcast %cst_147 : f32 to vector<34x1xf32>
      %373 = arith.divf %371, %372 : vector<34x1xf32>
      %374 = arith.mulf %368, %368 : vector<34x1xf32>
      %375 = arith.subf %373, %374 : vector<34x1xf32>
      %376 = vector.broadcast %368 : vector<34x1xf32> to vector<34x128xf32>
      %377 = arith.subf %362, %376 : vector<34x128xf32>
      %cst_148 = arith.constant 9.99999974E-6 : f32
      %378 = vector.broadcast %cst_148 : f32 to vector<34x1xf32>
      %379 = arith.addf %375, %378 : vector<34x1xf32>
      %380 = math.rsqrt %379 : vector<34x1xf32>
      %381 = vector.broadcast %380 : vector<34x1xf32> to vector<34x128xf32>
      %382 = arith.mulf %377, %381 : vector<34x128xf32>
      %383 = vector.broadcast %363 : vector<1x128xf32> to vector<34x128xf32>
      %384 = arith.mulf %382, %383 : vector<34x128xf32>
      %385 = vector.broadcast %364 : vector<1x128xf32> to vector<34x128xf32>
      %386 = arith.addf %384, %385 : vector<34x128xf32>
      %387 = arith.truncf %386 : vector<34x128xf32> to vector<34x128xbf16>
      %c0_149 = arith.constant 0 : index
      %c0_150 = arith.constant 0 : index
      %388 = vector.load %arg30[%c0_149, %c0_150] : memref<128x384xbf16, #tpu.memory_space<vmem>>, vector<128x384xbf16>
      %cst_151 = arith.constant dense<0.000000e+00> : vector<34x384xf32>
      %389 = tpu.matmul %387, %388, %cst_151 {dimension_numbers = #tpu.dot_dimension_numbers<[1], [0], [0], [1], [0, 0, 1, 1], [], []>} : vector<34x128xbf16>, vector<128x384xbf16>, vector<34x384xf32> -> vector<34x384xf32>
      %c0_152 = arith.constant 0 : index
      %c0_153 = arith.constant 0 : index
      %390 = vector.load %arg31[%c0_152, %c0_153] : memref<1x384xf32, #tpu.memory_space<vmem>>, vector<1x384xf32>
      %391 = vector.broadcast %390 : vector<1x384xf32> to vector<34x384xf32>
      %392 = arith.addf %389, %391 : vector<34x384xf32>
      %c0_154 = arith.constant 0 : index
      %c0_155 = arith.constant 0 : index
      %c0_156 = arith.constant 0 : index
      %393 = vector.load %arg34[%c0_154, %c0_155, %c0_156] : memref<1x34x384xf32, #tpu.memory_space<vmem>>, vector<1x34x384xf32>
      %394 = vector.shape_cast %393 : vector<1x34x384xf32> to vector<34x384xf32>
      %395 = vector.shape_cast %392 : vector<34x384xf32> to vector<1x34x384xf32>
      tpu.vector_store %arg34[%c0_154, %c0_155, %c0_156], %395 {strides = array<i32>} : memref<1x34x384xf32, #tpu.memory_space<vmem>>, vector<1x34x384xf32>,
      %c0_157 = arith.constant 0 : index
      %c0_158 = arith.constant 0 : index
      %396 = vector.load %arg32[%c0_157, %c0_158] : memref<1x128xf32, #tpu.memory_space<vmem>>, vector<1x128xf32>
      %397 = vector.broadcast %396 : vector<1x128xf32> to vector<34x128xf32>
      %398 = arith.mulf %386, %397 : vector<34x128xf32>
      %cst_159 = arith.constant dense<0.000000e+00> : vector<34xf32>
      %399 = vector.multi_reduction <add>, %398, %cst_159 [1] : vector<34x128xf32> to vector<34xf32>
      %400 = vector.shape_cast %399 : vector<34xf32> to vector<34x1xf32>
      %c0_160 = arith.constant 0 : index
      %c0_161 = arith.constant 0 : index
      %401 = vector.load %arg33[%c0_160, %c0_161] : memref<1x1xf32, #tpu.memory_space<vmem>>, vector<1x1xf32>
      %402 = vector.broadcast %401 : vector<1x1xf32> to vector<34x1xf32>
      %403 = arith.addf %400, %402 : vector<34x1xf32>
      %404 = vector.shape_cast %403 : vector<34x1xf32> to vector<34x1xf32>
      %405 = vector.broadcast %404 : vector<34x1xf32> to vector<34x128xf32>
      %c0_162 = arith.constant 0 : index
      %c0_163 = arith.constant 0 : index
      %c0_164 = arith.constant 0 : index
      %406 = vector.load %arg35[%c0_162, %c0_163, %c0_164] : memref<1x34x128xf32, #tpu.memory_space<vmem>>, vector<1x34x128xf32>
      %407 = vector.shape_cast %406 : vector<1x34x128xf32> to vector<34x128xf32>
      %408 = vector.shape_cast %405 : vector<34x128xf32> to vector<1x34x128xf32>
      tpu.vector_store %arg35[%c0_162, %c0_163, %c0_164], %408 {strides = array<i32>} : memref<1x34x128xf32, #tpu.memory_space<vmem>>, vector<1x34x128xf32>,
    } else {
    }
    return
  }
  func.func @transform_0(%arg0: i32, %arg1: i32) -> (i32, i32, i32) {
    %c0_i32 = arith.constant 0 : i32
    %c0_i32_0 = arith.constant 0 : i32
    %c0_i32_1 = arith.constant 0 : i32
    return %arg0, %c0_i32, %c0_i32_0 : i32, i32, i32
  }
  func.func @transform_1(%arg0: i32, %arg1: i32) -> (i32, i32, i32) {
    %c0_i32 = arith.constant 0 : i32
    %c0_i32_0 = arith.constant 0 : i32
    %c0_i32_1 = arith.constant 0 : i32
    return %arg0, %c0_i32, %c0_i32_0 : i32, i32, i32
  }
  func.func @transform_2(%arg0: i32, %arg1: i32) -> (i32, i32, i32) {
    %c0_i32 = arith.constant 0 : i32
    %c0_i32_0 = arith.constant 0 : i32
    %c0_i32_1 = arith.constant 0 : i32
    return %arg0, %c0_i32, %c0_i32_0 : i32, i32, i32
  }
  func.func @transform_3(%arg0: i32, %arg1: i32) -> (i32, i32) {
    %c0_i32 = arith.constant 0 : i32
    %c0_i32_0 = arith.constant 0 : i32
    %c0_i32_1 = arith.constant 0 : i32
    return %c0_i32, %c0_i32_0 : i32, i32
  }
  func.func @transform_4(%arg0: i32, %arg1: i32) -> (i32, i32) {
    %c0_i32 = arith.constant 0 : i32
    %c0_i32_0 = arith.constant 0 : i32
    %c0_i32_1 = arith.constant 0 : i32
    return %c0_i32, %c0_i32_0 : i32, i32
  }
  func.func @transform_5(%arg0: i32, %arg1: i32) -> (i32, i32) {
    %c0_i32 = arith.constant 0 : i32
    %c0_i32_0 = arith.constant 0 : i32
    %c0_i32_1 = arith.constant 0 : i32
    return %c0_i32, %c0_i32_0 : i32, i32
  }
  func.func @transform_6(%arg0: i32, %arg1: i32) -> (i32, i32) {
    %c0_i32 = arith.constant 0 : i32
    %c0_i32_0 = arith.constant 0 : i32
    %c0_i32_1 = arith.constant 0 : i32
    return %c0_i32, %c0_i32_0 : i32, i32
  }
  func.func @transform_7(%arg0: i32, %arg1: i32) -> (i32, i32) {
    %c0_i32 = arith.constant 0 : i32
    %c0_i32_0 = arith.constant 0 : i32
    %c0_i32_1 = arith.constant 0 : i32
    return %c0_i32, %c0_i32_0 : i32, i32
  }
  func.func @transform_8(%arg0: i32, %arg1: i32) -> (i32, i32) {
    %c0_i32 = arith.constant 0 : i32
    %c0_i32_0 = arith.constant 0 : i32
    %c0_i32_1 = arith.constant 0 : i32
    return %c0_i32, %c0_i32_0 : i32, i32
  }
  func.func @transform_9(%arg0: i32, %arg1: i32) -> (i32, i32, i32) {
    %c0_i32 = arith.constant 0 : i32
    %c0_i32_0 = arith.constant 0 : i32
    %c0_i32_1 = arith.constant 0 : i32
    %c0_i32_2 = arith.constant 0 : i32
    return %c0_i32, %c0_i32_0, %c0_i32_1 : i32, i32, i32
  }
  func.func @transform_10(%arg0: i32, %arg1: i32) -> (i32, i32, i32) {
    %c0_i32 = arith.constant 0 : i32
    %c0_i32_0 = arith.constant 0 : i32
    %c0_i32_1 = arith.constant 0 : i32
    return %arg1, %c0_i32, %c0_i32_0 : i32, i32, i32
  }
  func.func @transform_11(%arg0: i32, %arg1: i32) -> (i32, i32, i32) {
    %c0_i32 = arith.constant 0 : i32
    %c0_i32_0 = arith.constant 0 : i32
    %c0_i32_1 = arith.constant 0 : i32
    return %arg1, %c0_i32, %c0_i32_0 : i32, i32, i32
  }
  func.func @transform_12(%arg0: i32, %arg1: i32) -> (i32, i32, i32) {
    %c0_i32 = arith.constant 0 : i32
    %c0_i32_0 = arith.constant 0 : i32
    %c0_i32_1 = arith.constant 0 : i32
    return %arg1, %c0_i32, %c0_i32_0 : i32, i32, i32
  }
  func.func @transform_13(%arg0: i32, %arg1: i32) -> (i32, i32, i32) {
    %c0_i32 = arith.constant 0 : i32
    %c0_i32_0 = arith.constant 0 : i32
    %c0_i32_1 = arith.constant 0 : i32
    return %arg1, %c0_i32, %c0_i32_0 : i32, i32, i32
  }
  func.func @transform_14(%arg0: i32, %arg1: i32) -> (i32, i32, i32) {
    %c0_i32 = arith.constant 0 : i32
    %c0_i32_0 = arith.constant 0 : i32
    %c0_i32_1 = arith.constant 0 : i32
    return %arg1, %c0_i32, %c0_i32_0 : i32, i32, i32
  }
  func.func @transform_15(%arg0: i32, %arg1: i32) -> (i32, i32, i32) {
    %c0_i32 = arith.constant 0 : i32
    %c0_i32_0 = arith.constant 0 : i32
    %c0_i32_1 = arith.constant 0 : i32
    return %arg1, %c0_i32, %c0_i32_0 : i32, i32, i32
  }
  func.func @transform_16(%arg0: i32, %arg1: i32) -> (i32, i32, i32) {
    %c0_i32 = arith.constant 0 : i32
    %c0_i32_0 = arith.constant 0 : i32
    %c0_i32_1 = arith.constant 0 : i32
    return %arg1, %c0_i32, %c0_i32_0 : i32, i32, i32
  }
  func.func @transform_17(%arg0: i32, %arg1: i32) -> (i32, i32, i32) {
    %c0_i32 = arith.constant 0 : i32
    %c0_i32_0 = arith.constant 0 : i32
    %c0_i32_1 = arith.constant 0 : i32
    return %arg1, %c0_i32, %c0_i32_0 : i32, i32, i32
  }
  func.func @transform_18(%arg0: i32, %arg1: i32) -> (i32, i32, i32) {
    %c0_i32 = arith.constant 0 : i32
    %c0_i32_0 = arith.constant 0 : i32
    %c0_i32_1 = arith.constant 0 : i32
    return %arg1, %c0_i32, %c0_i32_0 : i32, i32, i32
  }
  func.func @transform_19(%arg0: i32, %arg1: i32) -> (i32, i32, i32) {
    %c0_i32 = arith.constant 0 : i32
    %c0_i32_0 = arith.constant 0 : i32
    %c0_i32_1 = arith.constant 0 : i32
    return %arg1, %c0_i32, %c0_i32_0 : i32, i32, i32
  }
  func.func @transform_20(%arg0: i32, %arg1: i32) -> (i32, i32, i32) {
    %c0_i32 = arith.constant 0 : i32
    %c0_i32_0 = arith.constant 0 : i32
    %c0_i32_1 = arith.constant 0 : i32
    return %arg1, %c0_i32, %c0_i32_0 : i32, i32, i32
  }
  func.func @transform_21(%arg0: i32, %arg1: i32) -> (i32, i32, i32) {
    %c0_i32 = arith.constant 0 : i32
    %c0_i32_0 = arith.constant 0 : i32
    %c0_i32_1 = arith.constant 0 : i32
    return %arg1, %c0_i32, %c0_i32_0 : i32, i32, i32
  }
  func.func @transform_22(%arg0: i32, %arg1: i32) -> (i32, i32) {
    %c0_i32 = arith.constant 0 : i32
    %c0_i32_0 = arith.constant 0 : i32
    %c0_i32_1 = arith.constant 0 : i32
    return %c0_i32, %c0_i32_0 : i32, i32
  }
  func.func @transform_23(%arg0: i32, %arg1: i32) -> (i32, i32) {
    %c0_i32 = arith.constant 0 : i32
    %c0_i32_0 = arith.constant 0 : i32
    %c0_i32_1 = arith.constant 0 : i32
    return %c0_i32, %c0_i32_0 : i32, i32
  }
  func.func @transform_24(%arg0: i32, %arg1: i32) -> (i32, i32) {
    %c0_i32 = arith.constant 0 : i32
    %c0_i32_0 = arith.constant 0 : i32
    %c0_i32_1 = arith.constant 0 : i32
    return %c0_i32, %c0_i32_0 : i32, i32
  }
  func.func @transform_25(%arg0: i32, %arg1: i32) -> (i32, i32) {
    %c0_i32 = arith.constant 0 : i32
    %c0_i32_0 = arith.constant 0 : i32
    %c0_i32_1 = arith.constant 0 : i32
    return %c0_i32, %c0_i32_0 : i32, i32
  }
  func.func @transform_26(%arg0: i32, %arg1: i32) -> (i32, i32) {
    %c0_i32 = arith.constant 0 : i32
    %c0_i32_0 = arith.constant 0 : i32
    %c0_i32_1 = arith.constant 0 : i32
    return %c0_i32, %c0_i32_0 : i32, i32
  }
  func.func @transform_27(%arg0: i32, %arg1: i32) -> (i32, i32) {
    %c0_i32 = arith.constant 0 : i32
    %c0_i32_0 = arith.constant 0 : i32
    %c0_i32_1 = arith.constant 0 : i32
    return %c0_i32, %c0_i32_0 : i32, i32
  }
  func.func @transform_28(%arg0: i32, %arg1: i32) -> (i32, i32) {
    %c0_i32 = arith.constant 0 : i32
    %c0_i32_0 = arith.constant 0 : i32
    %c0_i32_1 = arith.constant 0 : i32
    return %c0_i32, %c0_i32_0 : i32, i32
  }
  func.func @transform_29(%arg0: i32, %arg1: i32) -> (i32, i32) {
    %c0_i32 = arith.constant 0 : i32
    %c0_i32_0 = arith.constant 0 : i32
    %c0_i32_1 = arith.constant 0 : i32
    return %c0_i32, %c0_i32_0 : i32, i32
  }
  func.func @transform_30(%arg0: i32, %arg1: i32) -> (i32, i32) {
    %c0_i32 = arith.constant 0 : i32
    %c0_i32_0 = arith.constant 0 : i32
    %c0_i32_1 = arith.constant 0 : i32
    return %c0_i32, %c0_i32_0 : i32, i32
  }
  func.func @transform_31(%arg0: i32, %arg1: i32) -> (i32, i32) {
    %c0_i32 = arith.constant 0 : i32
    %c0_i32_0 = arith.constant 0 : i32
    %c0_i32_1 = arith.constant 0 : i32
    return %c0_i32, %c0_i32_0 : i32, i32
  }
  func.func @transform_32(%arg0: i32, %arg1: i32) -> (i32, i32, i32) {
    %c0_i32 = arith.constant 0 : i32
    %c0_i32_0 = arith.constant 0 : i32
    %c0_i32_1 = arith.constant 0 : i32
    return %arg0, %c0_i32, %c0_i32_0 : i32, i32, i32
  }
  func.func @transform_33(%arg0: i32, %arg1: i32) -> (i32, i32, i32) {
    %c0_i32 = arith.constant 0 : i32
    %c0_i32_0 = arith.constant 0 : i32
    %c0_i32_1 = arith.constant 0 : i32
    return %arg0, %c0_i32, %c0_i32_0 : i32, i32, i32
  }
}

</mosaic_0001>

<bundles_post_ra>
// kernel: tile.15
= control target key start
LH: loop header
LB: loop body
LE: loop exit
PB: predicated region body
PF: predicated region fallthrough
CT: control target
= control target key end

     0   :  { %s9_s6 = smov 3  ;;  %s69_s0 = inlined_call_operand.vmem [shape: f32[2,17,128], index: 0, kind: input, shape index: {}]   ;;  %s70_s1 = inlined_call_operand.vmem [shape: f32[34,128], index: 1, kind: output, shape index: {}]  }
   0x1   :  { %v2_v0 = vld [vmem:[%s69_s0] sm:$0xff]   ;;  %v21_v1 = vld [vmem:[%s69_s0 + $0x8] sm:$0xff]  }
   0x2   :  { %v23_v2 = vld [vmem:[%s69_s0 + $0x10] ss:$8 sm:%s9_s6]   ;;  %3 = vst [vmem:[%s70_s1] sm:$0xff] %v2_v0   ;;  %22 = vst [vmem:[%s70_s1 + $0x8] sm:$0xff] %v21_v1  }
   0x3   :  { %24 = vst [vmem:[%s70_s1 + $0x10] sm:$0x3] %v23_v2   ;;  %v25_v3 = vld [vmem:[%s69_s0 + $0x19] sm:$0xff]   ;;  %v27_v4 = vld [vmem:[%s69_s0 + $0x21] sm:$0xff]  }
   0x4   :  { %26 = vst [vmem:[%s70_s1 + $0x12] sm:$0xff] %v25_v3   ;;  %28 = vst [vmem:[%s70_s1 + $0x1a] sm:$0xff] %v27_v4  }

// kernel: _lambda_.1
= control target key start
LH: loop header
LB: loop body
LE: loop exit
PB: predicated region body
PF: predicated region fallthrough
CT: control target
= control target key end

     0   :  { %s7790_s6 = smov 1   ;;  %s7791_s10 = smov 2   ;;  %s10165_s0 = inlined_call_operand.smem [shape: u32[34], index: -1, kind: input, shape index: {}] }
   0x1   :  { %s7846_s5 = sld [smem:[%s10165_s0]]   ;;  %s7792_s14 = smov 3  }
   0x2   :  { %s7851_s9 = sld [smem:[%s10165_s0 + %s7790_s6]]   ;;  %s7793_s18 = smov 4  }
   0x3   :  { %s7856_s13 = sld [smem:[%s10165_s0 + %s7791_s10]]   ;;  %s7794_s22 = smov 5  }
   0x4   :  { %s7861_s17 = sld [smem:[%s10165_s0 + %s7792_s14]]   ;;  %s7795_s26 = smov 6  }
   0x5   :  { %s7866_s21 = sld [smem:[%s10165_s0 + %s7793_s18]]   ;;  %s7796_s30 = smov 7  }
   0x6   :  { %s7871_s25 = sld [smem:[%s10165_s0 + %s7794_s22]]   ;;  %s7797_s4 = smov 8  }
   0x7   :  { %s7876_s29 = sld [smem:[%s10165_s0 + %s7795_s26]]   ;;  %s7798_s10 = smov 9  }
   0x8   :  { %10244 = sst [smem:[#allocation12_spill]] %s7851_s9  ;;  %s7799_s15 = smov 10  }
   0x9   :  { %10245 = sst [smem:[#allocation13_spill]] %s7856_s13  ;;  %s7800_s20 = smov 11  }
   0xa   :  { %10246 = sst [smem:[#allocation14_spill]] %s7861_s17  ;;  %s7801_s26 = smov 12  }
   0xb   :  { %10247 = sst [smem:[#allocation15_spill]] %s7866_s21  ;;  %s7802_s1 = smov 13  }
   0xc   :  { %10248 = sst [smem:[#allocation16_spill]] %s7871_s25  ;;  %s7803_s7 = smov 14  }
   0xd   :  { %10249 = sst [smem:[#allocation17_spill]] %s7876_s29  ;;  %s7805_s22 = smov 16  }
   0xe   :  { %s7881_s3 = sld [smem:[%s10165_s0 + %s7796_s30]]   ;;  %s7806_s28 = smov 17  }
   0xf   :  { %s7886_s8 = sld [smem:[%s10165_s0 + %s7797_s4]]   ;;  %s7821_s23 = smov 32  }
  0x10   :  { %s7891_s14 = sld [smem:[%s10165_s0 + %s7798_s10]]  }
  0x11   :  { %s7896_s19 = sld [smem:[%s10165_s0 + %s7799_s15]]   ;;  %s7804_s15 = smov 15  }
  0x12   :  { %s7901_s24 = sld [smem:[%s10165_s0 + %s7800_s20]]  }
  0x13   :  { %s7906_s30 = sld [smem:[%s10165_s0 + %s7801_s26]]  }
  0x14   :  { %10250 = sst [smem:[#allocation18_spill]] %s7881_s3 }
  0x15   :  { %10251 = sst [smem:[#allocation19_spill]] %s7886_s8 }
  0x16   :  { %10252 = sst [smem:[#allocation20_spill]] %s7891_s14 }
  0x17   :  { %s7911_s6 = sld [smem:[%s10165_s0 + %s7802_s1]]   ;;  %s7822_s1 = smov 33  }
  0x18   :  { %s7916_s12 = sld [smem:[%s10165_s0 + %s7803_s7]]   ;;  %s7807_s7 = smov 18  }
  0x19   :  { %s7921_s20 = sld [smem:[%s10165_s0 + %s7804_s15]]   ;;  %s7808_s15 = smov 19  }
  0x1a   :  { %s7926_s27 = sld [smem:[%s10165_s0 + %s7805_s22]]   ;;  %s7809_s22 = smov 20  }
  0x1b   :  { %s7931_s4 = sld [smem:[%s10165_s0 + %s7806_s28]]   ;;  %s7810_s28 = smov 21  }
  0x1c   :  { %s7936_s17 = sld [smem:[%s10165_s0 + %s7807_s7]]   ;;  %s7811_s7 = smov 22  }
  0x1d   :  { %s7941_s8 = sld [smem:[%s10165_s0 + %s7808_s15]]   ;;  %s7812_s15 = smov 23  }
  0x1e   :  { %s7946_s3 = sld [smem:[%s10165_s0 + %s7809_s22]]   ;;  %s7813_s22 = smov 24  }
  0x1f   :  { %s7951_s14 = sld [smem:[%s10165_s0 + %s7810_s28]]   ;;  %s7814_s28 = smov 25  }
  0x20   :  { %s7956_s13 = sld [smem:[%s10165_s0 + %s7811_s7]]   ;;  %s7815_s7 = smov 26  }
  0x21   :  { %s7961_s9 = sld [smem:[%s10165_s0 + %s7812_s15]]   ;;  %s7816_s15 = smov 27  }
  0x22   :  { %10253 = sst [smem:[#allocation21_spill]] %s7936_s17 }
  0x23   :  { %s7966_s29 = sld [smem:[%s10165_s0 + %s7813_s22]]   ;;  %s7817_s22 = smov 28  }
  0x24   :  { %10254 = sst [smem:[#allocation22_spill]] %s7946_s3 }
  0x25   :  { %s7971_s25 = sld [smem:[%s10165_s0 + %s7814_s28]]   ;;  %s7818_s28 = smov 29  }
  0x26   :  { %10255 = sst [smem:[#allocation23_spill]] %s7956_s13 }
  0x27   :  { %10256 = sst [smem:[#allocation24_spill]] %s7961_s9 }
  0x28   :  { %s7976_s13 = sld [smem:[%s10165_s0 + %s7815_s7]]   ;;  %s7819_s7 = smov 30  }
  0x29   :  { %10257 = sst [smem:[#allocation25_spill]] %s7966_s29 }
  0x2a   :  { %s7981_s9 = sld [smem:[%s10165_s0 + %s7816_s15]]   ;;  %s7820_s15 = smov 31  }
  0x2b   :  { %10258 = sst [smem:[#allocation26_spill]] %s7971_s25 }
  0x2c   :  { %s7986_s29 = sld [smem:[%s10165_s0 + %s7817_s22]]  }
  0x2d   :  { %s7991_s25 = sld [smem:[%s10165_s0 + %s7818_s28]]  }
  0x2e   :  { %10259 = sst [smem:[#allocation27_spill]] %s7976_s13 }
  0x2f   :  { %s7996_s13 = sld [smem:[%s10165_s0 + %s7819_s7]]  }
  0x30   :  { %10260 = sst [smem:[#allocation28_spill]] %s7981_s9 }
  0x31   :  { %s6168_s9 = sld [smem:[%s10165_s0 + %s7820_s15]]  }
  0x32   :  { %10261 = sst [smem:[#allocation29_spill]] %s7986_s29 }
  0x33   :  { %10262 = sst [smem:[#allocation30_spill]] %s7991_s25 }
  0x34   :  { %s8004_s29 = sld [smem:[%s10165_s0 + %s7821_s23]]  }
  0x35   :  { %10263 = sst [smem:[#allocation31_spill]] %s7996_s13 }
  0x36   :  { %s8009_s25 = sld [smem:[%s10165_s0 + %s7822_s1]]  }
  0x37   :  { %v73_v0 = vstv %s6168_s9 }
  0x38   :  { %74 = vst [vmem:[#allocation4] sm:$0x1] %v73_v0 }
  0x3a   :  { %10264 = sst [smem:[#allocation32_spill]] %s8004_s29 }
  0x3c   :  { %10265 = sst [smem:[#allocation33_spill]] %s8009_s25 }
  0x3d   :  { %75 = vsyncpa [#allocation6], 0 }
  0x3e   :  { %76 = vsyncpa [#allocation8], 0 }
  0x3f   :  { %78 = vsyncpa [#allocation8 + $0x1], 0  ;;  %s8011_s7 = smov 0   ;;  %s8013_s10 = smov 0  }
  0x40   :  { %s8015_s11 = smov 0   ;;  %s8017_s15 = smov 0  }
  0x41   :  { %s8019_s16 = smov 0   ;;  %s8021_s18 = smov 0  }
  0x42 LB: > { %s10266_s3 = sld [smem:[#allocation22_spill]]  ;;  %s93_s0 = sadd.s32 1, %s7784_s16  ;;  %s7772_s10 = sphi %s8013_s10, %s10457_s10   ;;  %s7768_s7 = sphi %s8011_s7, %s10456_s7   ;;  %s7788_s18 = sphi %s8021_s18, %s84_s18   ;;  %s7784_s16 = sphi %s8019_s16, %s10460_s16   ;;  %s7780_s15 = sphi %s8017_s15, %s10459_s15   ;;  %s7776_s11 = sphi %s8015_s11, %s10458_s11  }
  0x43   : > { %s10267_s17 = sld [smem:[#allocation21_spill]]  ;;  %s536_s9 = sadd.s32 1, %s7776_s11 }
  0x44   : > { %10268 = sst [smem:[#allocation34_spill]] %s7772_s10  ;;  %p94_p0 = scmp.ge.s32.totalorder %s93_s0, 6 }
  0x45   : > { %10269 = sst [smem:[#allocation35_spill]] %s7776_s11  ;;  %p543_p1 = scmp.ne.s32.totalorder %s7776_s11, %s7772_s10 }
  0x46   : > { %10270 = sst [smem:[#allocation36_spill]] %s7784_s16  ;;  %p544_p2 = scmp.eq.s32.totalorder %s7788_s18, 0 }
  0x47   : > { %s10462_s0 = smov (%p94_p0, %s93_s0), 0  ;;  %p7088_p4 = scmp.lt.s32.totalorder %s7788_s18, 6 }
  0x48   : > { %10271 = sst [smem:[#allocation37_spill]] %s10462_s0  ;;  %p545_p3 = por %p544_p2, %p543_p1 }
  0x49   : > { %s533_s23 = ssub.s32 %s7784_s16, %s10462_s0  ;;  %s1051_s22 = sand.u32 1, %s7788_s18  }
  0x4a   : > { %p534_p5 = scmp.eq.s32.totalorder %s533_s23, 0  ;;  %s1053_s26 = sand.u32 1, %s7776_s11  }
  0x4b   : > { %s10179_s1 = sshll.u32 %s7784_s16, 12  ;;  %s8057_s2 = sshll.u32 %s1053_s26, 8 }
  0x4c   : > { %s8055_s28 = scalar_select %p534_p5, %s7776_s11, %s536_s9  }
  0x4d   : > { %s8062_s25 = scalar_lea.hbm %s10267_s17, %s10179_s1  ;;  %p8064_p6 = pnand %p7088_p4, %p545_p3 }
  0x4e   : > { %10272 = sst [smem:[#allocation38_spill]] %s8055_s28  ;;  %s1055_s23 = scalar_lea.vmem [#allocation7], %s8057_s2 }
  0x4f   : > { %s1062_s0 = sshll.u32 %s1055_s23, 4  ;;  %s8071_s9 = scalar_lea.sflag [#allocation8], %s1051_s22  ;;  %s8069_s0 = int_to_ptr.vmem [resolvable:$true] %s1062_s0 }
  0x50   : > { %s7652_s26 = scalar_lea.hbm %s8062_s25, 4096  ;;  %p7654_p8 = pneg %p8064_p6 }
  0x51   : > { %p7653_p7 = scmp.ne.s32.totalorder %s8062_s25, %s7652_s26  ;;  %s7657_s1 = scalar_lea.hbm %s10267_s17, 24576 }
  0x52   : > { %p7658_p11 = scmp.lt.s32.totalorder %s8062_s25, %s10267_s17  ;;  %p7659_p12 = scmp.lt.s32.totalorder %s7657_s1, %s7652_s26 }
  0x53   : > { %p7655_p9 = pnand %p7654_p8, %p7653_p7 }
  0x54   : > { %p7660_p13 = por %p7659_p12, %p7658_p11 }
  0x55   : > { %p7656_p10 = pneg %p7655_p9 }
  0x57   : > { %p7661_p0 = pnand %p7660_p13, %p7656_p10 }
  0x59   : > { %7664 = shalt.err (!%p7661_p0)
}
  0x5a   : > { %s7665_s22 = scalar_lea.vmem %s8069_s0, 4096  ;;  %s7823_s23 = smov [#allocation7]  }
  0x5b   : > { %p7666_p1 = scmp.ne.s32.totalorder %s8069_s0, %s7665_s22  ;;  %s7670_s28 = sshll.u32 %s7823_s23, 4  ;;  %s7671_s28 = int_to_ptr.vmem [resolvable:$false] %s7670_s28 }
  0x5c   : > { %s7672_s11 = scalar_lea.vmem %s7671_s28, 8192  ;;  %p7673_p4 = scmp.lt.s32.totalorder %s8069_s0, %s7671_s28 }
  0x5d   : > { %p7668_p2 = pnand %p7666_p1, %p7654_p8  ;;  %p7674_p5 = scmp.lt.s32.totalorder %s7672_s11, %s7665_s22 }
  0x5f   : > { %p7669_p3 = pneg %p7668_p2  ;;  %p7675_p7 = por %p7674_p5, %p7673_p4 }
  0x61   : > { %p7676_p9 = pnand %p7675_p7, %p7669_p3 }
  0x63   : > { %7679 = shalt.err (!%p7676_p9)
}
  0x64   : > { %s7824_s1 = smov 256   ;;  %s7825_s26 = smov 16  }
  0x65   : > { %7083 = dma.hbm_to_vmem [thread:$0]  (!%p8064_p6), %s8062_s25, 4096, %s8069_s0, %s8071_s9, %s7824_s1, %s7824_s1, %s7825_s26  }
  0x66   : > { %s10274_s11 = sshll.u32 %s7784_s16, 12  ;;  %s1083_s22 = scalar_lea.vmem [#allocation9], %s8057_s2 }
  0x67   : > { %s8097_s28 = scalar_lea.hbm %s10266_s3, %s10274_s11  ;;  %s1090_s23 = sshll.u32 %s1083_s22, 4  ;;  %s8121_s23 = int_to_ptr.vmem [resolvable:$true] %s1090_s23 }
  0x68   : > { %s10185_s17 = sadd.s32 4294967295, %s7788_s18   ;;  %p549_p10 = scmp.ne.s32.totalorder %s7772_s10, %s7768_s7 }
  0x69   : > { %p8105_p11 = scmp.eq.s32.totalorder %s10185_s17, 0  ;;  %p6172_p12 = scmp.ge.s32.totalorder %s7788_s18, 1 }
  0x6a   : > { %p900_p13 = scmp.lt.s32.totalorder %s7788_s18, 7  ;;  %s7826_s7 = smov [#allocation5]  }
  0x6b   : > { %s10275_s13 = scalar_select %p8105_p11, 1, 0 }
  0x6c   : > { %p8113_p0 = por %p8105_p11, %p549_p10  ;;  %p8117_p1 = pnand %p6172_p12, %p900_p13 }
  0x6d   : > { %s939_s2 = sshll.u32 %s7826_s7, 4  ;;  %s7680_s26 = scalar_lea.hbm %s8097_s28, 4096  ;;  %s8125_s2 = int_to_ptr.vmem [resolvable:$true] %s939_s2 }
  0x6e   : > { %s10276_s25 = scalar_select %p8113_p0, 1, 0 }
  0x6f   : > { %s10277_s0 = scalar_select %p8117_p1, 1, 0 }
  0x70   : > { %p7076_p2 = pneg %p8117_p1  ;;  %p7681_p4 = scmp.ne.s32.totalorder %s8097_s28, %s7680_s26 }
  0x71   : > { %s7685_s11 = scalar_lea.hbm %s10266_s3, 24576  ;;  %p7686_p9 = scmp.lt.s32.totalorder %s8097_s28, %s10266_s3 }
  0x72   : > { %p8129_p3 = pnand %p7076_p2, %p8105_p11  ;;  %p7683_p5 = pnand %p7681_p4, %p7654_p8 }
  0x73   : > { %p7687_p10 = scmp.lt.s32.totalorder %s7685_s11, %s7680_s26 }
  0x74   : > { %p7684_p7 = pneg %p7683_p5 }
  0x75   : > { %p7688_p12 = por %p7687_p10, %p7686_p9 }
  0x77   : > { %p7689_p13 = pnand %p7688_p12, %p7684_p7 }
  0x79   : > { %7692 = shalt.err (!%p7689_p13)
}
  0x7a   : > { %s7693_s22 = scalar_lea.vmem %s8121_s23, 4096  ;;  %s7827_s7 = smov [#allocation9]  }
  0x7b   : > { %p7694_p2 = scmp.ne.s32.totalorder %s8121_s23, %s7693_s22  ;;  %s7698_s17 = sshll.u32 %s7827_s7, 4  ;;  %s7699_s17 = int_to_ptr.vmem [resolvable:$false] %s7698_s17 }
  0x7c   : > { %s7700_s16 = scalar_lea.vmem %s7699_s17, 8192  ;;  %p7701_p4 = scmp.lt.s32.totalorder %s8121_s23, %s7699_s17 }
  0x7d   : > { %p7696_p0 = pnand %p7694_p2, %p7654_p8  ;;  %p7702_p5 = scmp.lt.s32.totalorder %s7700_s16, %s7693_s22 }
  0x7f   : > { %p7697_p11 = pneg %p7696_p0  ;;  %p7703_p1 = por %p7702_p5, %p7701_p4 }
  0x81   : > { %p7704_p9 = pnand %p7703_p1, %p7697_p11 }
  0x83   : > { %7707 = shalt.err (!%p7704_p9)
}
  0x84   : > { %s7828_s26 = smov 64   ;;  %s7829_s11 = smov 4  }
  0x85   : > { %7086 = dma.hbm_to_vmem [thread:$0]  (!%p8064_p6), %s8097_s28, 4096, %s8121_s23, %s8071_s9, %s7828_s26, %s7828_s26, %s7829_s11  }
  0x86   : > { %p7710_p8 = pneg %p8129_p3  ;;  %s7719_s7 = scalar_lea.vmem %s8125_s2, 3072 }
  0x87   : > { %p7720_p0 = scmp.ne.s32.totalorder %s8125_s2, %s7719_s7  ;;  %p7727_p11 = scmp.lt.s32.totalorder %s8125_s2, %s8125_s2 }
  0x88   : > { %p7728_p1 = scmp.lt.s32.totalorder %s7719_s7, %s7719_s7 }
  0x89   : > { %p7722_p7 = pnand %p7720_p0, %p7710_p8 }
  0x8a   : > { %p7729_p12 = por %p7728_p1, %p7727_p11 }
  0x8b   : > { %p7723_p10 = pneg %p7722_p7 }
  0x8d   : > { %p7730_p13 = pnand %p7729_p12, %p7723_p10 }
  0x8f   : > { %7733 = shalt.err (!%p7730_p13)
}
  0x90   : > { %s10279_s21 = sld [smem:[#allocation15_spill]]  ;;  %p10280_p2 = scmp.ne.s32.totalorder %s10277_s0, 0 }
  0x92   : > { %1108 = sbr.rel (%p10280_p2) target bundleno = 3966 (0xf7e), region = 148 }
  0x96   : > { %7079 = dma.hbm_to_vmem [thread:$0]  (!%p8129_p3), %s10279_s21, 3072, %s8125_s2, [#allocation6], %s7828_s26, %s7828_s26, %s7829_s11  }
  0x97   : > { %p10281_p6 = scmp.ne.s32.totalorder %s10275_s13, 0 }
  0x99   : > { %7759 = dma.done.wait (%p10281_p6), [#allocation6], 3072  }
  0x9a   : > { %7761 = vsyncadd (%p10281_p6), [#allocation6], 4294964224  ;;  %s10282_s17 = sadd.s32 4294967295, %s7788_s18   ;;  %s1116_s16 = sand.u32 1, %s7772_s10  }
  0x9b   : > { %s1114_s29 = sand.u32 1, %s10282_s17   ;;  %s6186_s9 = sshll.u32 %s1116_s16, 8 }
  0x9c   : > { %s1115_s28 = scalar_lea.sflag [#allocation8], %s1114_s29  ;;  %s8171_s23 = scalar_lea.vmem [#allocation7], %s6186_s9 }
  0x9d   : > { %p10283_p3 = scmp.ne.s32.totalorder %s10276_s25, 0 }
  0x9f   : > { %7763 = dma.done.wait (%p10283_p3), %s1115_s28, 8192  }
  0xa0   : > { %7765 = vsyncadd (%p10283_p3), %s1115_s28, 4294959104  ;;  %p1286_p4 = scmp.lt.s32.totalorder %s7780_s15, 5  ;;  %s8209_s10 = scalar_lea.vmem [#allocation9], %s6186_s9 }
  0xa1   : > { %p6192_p5 = scmp.ne.s32.totalorder %s7780_s15, 0 }
  0xa2   : > { %s8179_s13 = scalar_select %p1286_p4, %s7780_s15, 5 }
  0xa3   : > { %s10284_s9 = sld [smem:[#allocation16_spill]] (!%p6192_p5) }
  0xa4   : > { %s1288_s25 = scalar_lea.vmem %s7896_s19, %s8179_s13  ;;  %s1291_s0 = scalar_lea.vmem %s7901_s24, %s8179_s13 }
  0xa5   : > { %s7066_s2 = smul.u32 320, %s8179_s13  ;;  %s6423_s1 = sshll.u32 %s8179_s13, 6 }
  0xa6   : > { %s7067_s22 = smul.u32 5, %s8179_s13  ;;  %s8189_s26 = scalar_lea.vmem %s7916_s12, %s6423_s1 }
  0xa7   : > { %s8192_s11 = scalar_lea.vmem %s7906_s30, %s7066_s2  ;;  %s1308_s7 = scalar_lea.vmem %s7921_s20, %s8179_s13 }
  0xa8   : > { %s8197_s17 = scalar_lea.vmem %s7911_s6, %s7067_s22  ;;  %s1311_s29 = scalar_lea.vmem %s7926_s27, %s8179_s13 }
  0xa9   : > { %s1314_s16 = scalar_lea.vmem %s7931_s4, %s8179_s13  ;;  %s6191_s28 = sshll.u32 %s8179_s13, 2 }
  0xaa   : > { %s8205_s3 = scalar_lea.vmem %s7941_s8, %s6191_s28  ;;  %s1321_s21 = scalar_lea.vmem %s7951_s14, %s8179_s13 }
  0xab   : > { %1336 = sbr.rel (%p6192_p5) target bundleno = 433 (0x1b1), region = 164  ;;  %s10285_s2 = sld [smem:[#allocation17_spill]] (!%p6192_p5) }
  0xac   : > { %s10286_s1 = sld [smem:[#allocation12_spill]] (!%p6192_p5) }
  0xad   : > { %s10287_s22 = sld [smem:[#allocation13_spill]] (!%p6192_p5) }
  0xb0   : > { %v7184_v1 = vld [vmem:[#allocation5 + $0x78] sm:$0xff]   ;;  %v7830_v2 = vmov 0.0   ;;  %vm7831_vm0 = vmmov 0   ;;  %v7187_v5 = vld [vmem:[#allocation5 + $0x70] sm:$0xff]   ;;  %v7190_v8 = vld [vmem:[#allocation5 + $0x68] sm:$0xff]  }
  0xb1   : > { %6666 = vmatprep.subr.bf16.mxu1 %v7830_v2  ;;  %v7185_v3 = vld [vmem:[#allocation5 + $0x38] sm:$0xff]   ;;  %6424 = vmatprep.subr.bf16.mxu0 %v7184_v1  ;;  %v7188_v6 = vld [vmem:[#allocation5 + $0x30] sm:$0xff]   ;;  %v7191_v9 = vld [vmem:[#allocation5 + $0x28] sm:$0xff]  }
  0xb2   : > { %v7186_v4 = vld [vmem:[#allocation5 + $0xb8] sm:$0xff]   ;;  %6682 = vmatprep.mubr.msk.bf16.mxu1 %vm7831_vm0, %v7830_v2  ;;  %6425 = vmatpush3.bf16.msra.mxu0 %v7185_v3  ;;  %v7189_v7 = vld [vmem:[#allocation5 + $0xb0] sm:$0xff]   ;;  %v7192_v10 = vld [vmem:[#allocation5 + $0xa8] sm:$0xff]  }
  0xb3   : > { %6667 = vmatpush3.bf16.msra.mxu1 %v7186_v4  ;;  %6426 = vmatprep.subr.bf16.mxu0 %v7187_v5  ;;  %v7193_v11 = vld [vmem:[#allocation5 + $0x60] sm:$0xff]   ;;  %v7196_v14 = vld [vmem:[#allocation5 + $0x58] sm:$0xff]   ;;  %v7199_v17 = vld [vmem:[#allocation5 + $0x50] sm:$0xff]  }
  0xb4   : > { %6668 = vmatprep.subr.bf16.mxu1 %v7830_v2  ;;  %v7194_v12 = vld [vmem:[#allocation5 + $0x20] sm:$0xff]   ;;  %v7197_v15 = vld [vmem:[#allocation5 + $0x18] sm:$0xff]   ;;  %v7200_v18 = vld [vmem:[#allocation5 + $0x10] sm:$0xff]  }
  0xb5   : > { %v7195_v13 = vld [vmem:[#allocation5 + $0xa0] sm:$0xff]   ;;  %v7198_v16 = vld [vmem:[#allocation5 + $0x98] sm:$0xff]   ;;  %v7201_v19 = vld [vmem:[#allocation5 + $0x90] sm:$0xff]  }
  0xb6   : > { %6427 = vmatpush3.bf16.msra.mxu0 %v7188_v6  ;;  %v7202_v20 = vld [vmem:[#allocation5 + $0x48] sm:$0xff]   ;;  %v7205_v23 = vld [vmem:[#allocation5 + $0x40] sm:$0xff]   ;;  %v1702_v56 = vld [vmem:[%s10285_s2 + $0x8] sm:$0xff] }
  0xb7   : > { %6669 = vmatpush3.bf16.msra.mxu1 %v7189_v7  ;;  %6428 = vmatprep.subr.bf16.mxu0 %v7190_v8  ;;  %v7203_v21 = vld [vmem:[#allocation5 + $0x8] sm:$0xff]   ;;  %v7210_v24 = vld [vmem:[%s7846_s5 + $0x4] ss:$12 sps:$4 sm:$0xff]   ;;  %v7211_v28 = vld [vmem:[%s7846_s5 + $0x8] ss:$12 sps:$4 sm:$0xff]  }
  0xb8   : > { %6670 = vmatprep.subr.bf16.mxu1 %v7830_v2  ;;  %v7204_v22 = vld [vmem:[#allocation5 + $0x88] sm:$0xff]   ;;  %v7206_v25 = vld [vmem:[#allocation5] sm:$0xff]   ;;  %1621 = vmatprep.mubr.bf16.mxu0 %v7210_v24  ;;  %v1712_v62 = vld [vmem:[%s10286_s1 + $0x8] sm:$0xff] }
  0xb9   : > { %v7207_v26 = vld [vmem:[#allocation5 + $0x80] sm:$0xff]   ;;  %v7208_v27 = vld [vmem:[%s7846_s5] ss:$12 sps:$4 sm:$0xff]   ;;  %v7212_v29 = vld [vmem:[%s7846_s5 + $0x1c] ss:$12 sps:$4 sm:$0xff]  }
  0xba   : > { %6429 = vmatpush3.bf16.msra.mxu0 %v7191_v9  ;;  %v1345_v30 = vld [vmem:[%s7846_s5 + $0x30] sm:$0x11]  ;;  %v7214_v31 = vld [vmem:[%s7846_s5 + $0x18] ss:$12 sps:$4 sm:$0xff]   ;;  %v7215_v32 = vld [vmem:[%s7846_s5 + $0x20] ss:$12 sps:$4 sm:$0xff]  }
  0xbb   : > { %6671 = vmatpush3.bf16.msra.mxu1 %v7192_v10  ;;  %6430 = vmatprep.subr.bf16.mxu0 %v7193_v11  ;;  %v6201_v33 = vcombine.high %v1345_v30, %v1345_v30  ;;  %v6200_v34 = vcombine.low %v1345_v30, %v1345_v30  ;;  %v7218_v35 = vld [vmem:[%s7846_s5 + $0x38] ss:$0 sps:$4 sm:$0x11]   ;;  %v6193_v38 = vld [vmem:[%s10284_s9] ss:$0 sm:$0xff]  ;;  %v1722_v4 = vld [vmem:[%s10287_s22 + $0x8] sm:$0xff] }
  0xbc   : > { %6672 = vmatprep.subr.bf16.mxu1 %v7830_v2  ;;  %v1701_v45 = vld [vmem:[%s10285_s2] sm:$0xff]  ;;  %v1703_v5 = vld [vmem:[%s10285_s2 + $0x10] sm:$0xff]  ;;  %v1714_v24 = vld [vmem:[%s10286_s1 + $0x18] sm:$0xff] }
  0xbd   : > { %v1711_v50 = vld [vmem:[%s10286_s1] sm:$0xff]  ;;  %v1713_v11 = vld [vmem:[%s10286_s1 + $0x10] sm:$0xff]  ;;  %v1724_v30 = vld [vmem:[%s10287_s22 + $0x18] sm:$0xff] }
  0xbe   : > { %6431 = vmatpush3.bf16.msra.mxu0 %v7194_v12  ;;  %v1721_v55 = vld [vmem:[%s10287_s22] sm:$0xff] }
  0xbf   : > { %6673 = vmatpush3.bf16.msra.mxu1 %v7195_v13  ;;  %6432 = vmatprep.subr.bf16.mxu0 %v7196_v14 }
  0xc0   : > { %6674 = vmatprep.subr.bf16.mxu1 %v7830_v2 }
  0xc2   : > { %6433 = vmatpush3.bf16.msra.mxu0 %v7197_v15 }
  0xc3   : > { %6675 = vmatpush3.bf16.msra.mxu1 %v7198_v16  ;;  %6434 = vmatprep.subr.bf16.mxu0 %v7199_v17  ;;  %v1723_v17 = vld [vmem:[%s10287_s22 + $0x10] sm:$0xff] }
  0xc4   : > { %6676 = vmatprep.subr.bf16.mxu1 %v7830_v2 }
  0xc6   : > { %6435 = vmatpush3.bf16.msra.mxu0 %v7200_v18  ;;  %v1704_v18 = vld [vmem:[%s10285_s2 + $0x18] sm:$0xff] }
  0xc7   : > { %6677 = vmatpush3.bf16.msra.mxu1 %v7201_v19  ;;  %6436 = vmatprep.subr.bf16.mxu0 %v7202_v20 }
  0xc8   : > { %6678 = vmatprep.subr.bf16.mxu1 %v7830_v2 }
  0xca   : > { %6437 = vmatpush3.bf16.msra.mxu0 %v7203_v21 }
  0xcb   : > { %6679 = vmatpush3.bf16.msra.mxu1 %v7204_v22  ;;  %6438 = vmatprep.subr.bf16.mxu0 %v7205_v23 }
  0xcc   : > { %6680 = vmatprep.subr.bf16.mxu1 %v7830_v2 }
  0xce   : > { %6439 = vmatpush3.bf16.msra.mxu0 %v7206_v25 }
  0xcf   : > { %6681 = vmatpush3.bf16.msra.mxu1 %v7207_v26 }
  0xd1   : > { %1622 = vmatmul.mubr.bf16.vlgmr.msra.gmra.mxu0 %v7208_v27 }
  0xd2   : > { %6683 = vmatmul.mubr.bf16.vlgmr.msra.gmra.mxu1 %v7211_v28  ;;  %1629 = vmatprep.mubr.bf16.mxu0 %v7212_v29 }
  0xd3   : > { %6686 = vmatprep.mubr.msk.bf16.mxu1 %vm7831_vm0, %v7830_v2 }
  0xd9   : > { %1630 = vmatmul.mubr.bf16.gmra.mxu0 %v7214_v31  ;;  %v1705_v31 = vld [vmem:[%s10285_s2 + $0x20] sm:$0x3] }
  0xda   : > { %6687 = vmatmul.mubr.bf16.gmra.mxu1 %v7215_v32  ;;  %1637 = vmatprep.mubr.bf16.mxu0 %v6201_v33 }
  0xdb   : > { %6690 = vmatprep.mubr.msk.bf16.mxu1 %vm7831_vm0, %v7830_v2 }
  0xe1   : > { %1638 = vmatmul.mubr.bf16.gmra.mxu0 %v6200_v34 }
  0xe2   : > { %6691 = vmatmul.mubr.bf16.gmra.mxu1 %v7218_v35 }
 0x191   : > { %v6440_v36 = vpop.f32.mrf.mxu0 }
 0x192   : > { %v1679_v37 = vpop.f32.mrf.mxu1 }
 0x193   : > { %v6441_v39 = vpop.f32.mrf.mxu0 }
 0x194   : > { %v6442_v40 = vadd.f32 %v6441_v39, %v6440_v36  ;;  %v6684_v41 = vpop.f32.mrf.mxu1  ;;  %v1715_v36 = vld [vmem:[%s10286_s1 + $0x20] sm:$0x3] }
 0x195   : > { %v6443_v42 = vpop.f32.mrf.mxu0 }
 0x196   : > { %v1624_v43 = vadd.f32 %v6442_v40, %v6193_v38  ;;  %v1682_v44 = vpop.f32.mrf.mxu1  ;;  %v1725_v40 = vld [vmem:[%s10287_s22 + $0x20] sm:$0x3] }
 0x197   : > { %v6444_v46 = vpop.f32.mrf.mxu0 }
 0x198   : > { %v1680_v47 = vadd.f32 %v1679_v37, %v1624_v43  ;;  %v6445_v48 = vadd.f32 %v6444_v46, %v6443_v42  ;;  %v6685_v49 = vpop.f32.mrf.mxu1 }
 0x199   : > { %v6446_v51 = vpop.f32.mrf.mxu0 }
 0x19a   : > { %v1706_v52 = vadd.f32 %v1701_v45, %v1680_v47  ;;  %v1627_v53 = vadd.f32 %v6445_v48, %v6193_v38  ;;  %v1687_v54 = vpop.f32.mrf.mxu1 }
 0x19b   : > { %v6447_v57 = vpop.f32.mrf.mxu0 }
 0x19c   : > { %v1716_v58 = vmul.f32 %v1711_v50, %v1706_v52  ;;  %v1683_v59 = vadd.f32 %v1682_v44, %v1627_v53  ;;  %v6448_v60 = vadd.f32 %v6447_v57, %v6446_v51  ;;  %v6688_v61 = vpop.f32.mrf.mxu1 }
 0x19d   : > { %v6449_v63 = vpop.f32.mrf.mxu0 }
 0x19e   : > { %v1726_v0 = vadd.f32 %v1721_v55, %v1716_v58  ;;  %v1707_v1 = vadd.f32 %v1702_v56, %v1683_v59  ;;  %v1632_v2 = vadd.f32 %v6448_v60, %v6193_v38  ;;  %v1690_v3 = vpop.f32.mrf.mxu1 }
 0x19f   : > { %v6450_v6 = vpop.f32.mrf.mxu0 }
 0x1a0   : > { %1731 = vst [vmem:[#allocation2 + $0x8] sm:$0xff] %v1726_v0  ;;  %1736 = vst [vmem:[#allocation3] sm:$0xff] %v1726_v0  ;;  %v1717_v7 = vmul.f32 %v1712_v62, %v1707_v1  ;;  %v1688_v8 = vadd.f32 %v1687_v54, %v1632_v2  ;;  %v6451_v9 = vadd.f32 %v6450_v6, %v6449_v63  ;;  %v6689_v10 = vpop.f32.mrf.mxu1 }
 0x1a1   : > { %v6452_v12 = vpop.f32.mrf.mxu0 }
 0x1a2   : > { %v1727_v13 = vadd.f32 %v1722_v4, %v1717_v7  ;;  %v1708_v14 = vadd.f32 %v1703_v5, %v1688_v8  ;;  %v1635_v15 = vadd.f32 %v6451_v9, %v6193_v38  ;;  %v1695_v16 = vpop.f32.mrf.mxu1 }
 0x1a3   : > { %v6453_v19 = vpop.f32.mrf.mxu0 }
 0x1a4   : > { %1732 = vst [vmem:[#allocation2] sm:$0xff] %v1727_v13  ;;  %1737 = vst [vmem:[#allocation3 + $0x8] sm:$0xff] %v1727_v13  ;;  %v1718_v20 = vmul.f32 %v1713_v11, %v1708_v14  ;;  %v1691_v21 = vadd.f32 %v1690_v3, %v1635_v15  ;;  %v6454_v22 = vadd.f32 %v6453_v19, %v6452_v12  ;;  %v6692_v23 = vpop.f32.mrf.mxu1 }
 0x1a5   : > { %v6455_v25 = vpop.f32.mrf.mxu0 }
 0x1a6   : > { %v1728_v26 = vadd.f32 %v1723_v17, %v1718_v20  ;;  %v1709_v27 = vadd.f32 %v1704_v18, %v1691_v21  ;;  %v1640_v28 = vadd.f32 %v6454_v22, %v6193_v38  ;;  %v1698_v29 = vpop.f32.mrf.mxu1 }
 0x1a7   : > { %v6456_v32 = vpop.f32.mrf.mxu0 }
 0x1a8   : > { %1733 = vst [vmem:[#allocation2 + $0x20] sm:$0xff] %v1728_v26  ;;  %1738 = vst [vmem:[#allocation3 + $0x20] sm:$0xff] %v1728_v26  ;;  %v1719_v33 = vmul.f32 %v1714_v24, %v1709_v27  ;;  %v1696_v34 = vadd.f32 %v1695_v16, %v1640_v28  ;;  %v6693_v35 = vpop.f32.mrf.mxu1 }
 0x1aa   : > { %v1729_v37 = vadd.f32 %v1724_v30, %v1719_v33  ;;  %v1710_v39 = vadd.f32 %v1705_v31, %v1696_v34 }
 0x1ac   : > { %1734 = vst [vmem:[#allocation2 + $0x10] sm:$0xff] %v1729_v37  ;;  %1739 = vst [vmem:[#allocation3 + $0x18] sm:$0xff] %v1729_v37  ;;  %v1720_v41 = vmul.f32 %v1715_v36, %v1710_v39 }
 0x1ae   : > { %v1730_v42 = vadd.f32 %v1725_v40, %v1720_v41 }
 0x1b0   : > { %1735 = vst [vmem:[#allocation2 + $0x18] sm:$0x3] %v1730_v42  ;;  %1740 = vst [vmem:[#allocation3 + $0x10] sm:$0x3] %v1730_v42 }
 0x1b1 PF: > { %v8250_v38 = vld [vmem:[#allocation2 + $0x8] sm:$0xff]  ;;  %v8252_v43 = vld [vmem:[#allocation2] sm:$0xff]  ;;  %vm1771_vm1 = vcmask 1041408   ;;  %v7219_v51 = vld [vmem:[%s8192_s11 + $0x11c] ss:$20 sps:$4 sm:$0xff]   ;;  %v10191_v22 = vmov 0  }
 0x1b2   : > { %1763 = vadd.xlane.f32.xlu0 %v8250_v38  ;;  %v1781_v44 = vmul.f32 %v8250_v38, %v8250_v38  ;;  %v1782_v45 = vmul.f32 %v8252_v43, %v8252_v43  ;;  %v8259_v46 = vld [vmem:[#allocation2 + $0x20] sm:$0xff]  ;;  %v7221_v53 = vld [vmem:[%s8192_s11 + $0x118] ss:$20 sps:$4 sm:$0xff]   ;;  %2140 = vmatprep.subr.bf16.mxu0 %v7219_v51  ;;  %v7225_v58 = vld [vmem:[%s8192_s11 + $0xf4] ss:$20 sps:$4 sm:$0xff]   ;;  %v10193_v23 = vmov 0.0  }
 0x1b3   : > { %v8264_v48 = vld [vmem:[#allocation2 + $0x10] sm:$0xff]  ;;  %v1783_v49 = vmul.f32 %v8259_v46, %v8259_v46  ;;  %v7222_v54 = vld [vmem:[%s8192_s11 + $0x124] ss:$20 sps:$4 sm:$0xff]   ;;  %2141 = vmatpush1.bf16.msra.mxu0 %v7221_v53  ;;  %v7231_v62 = vld [vmem:[%s8192_s11 + $0xcc] ss:$20 sps:$4 sm:$0xff]   ;;  %2172 = vmatprep.mubr.bf16.mxu0 %v10191_v22  ;;  %vm7834_vm2 = vmmov 0  }
 0x1b4   : > { %1786 = vadd.xlane.f32.xlu1 %v1781_v44  ;;  %v1784_v52 = vmul.f32 %v8264_v48, %v8264_v48  ;;  %v7224_v55 = vld [vmem:[%s8192_s11 + $0x120] ss:$20 sps:$4 sm:$0xff]   ;;  %2201 = vmatprep.subr.bf16.mxu1 %v7222_v54  ;;  %v7227_v59 = vld [vmem:[%s8192_s11 + $0xf0] ss:$20 sps:$4 sm:$0xff]   ;;  %v7230_v61 = vld [vmem:[%s8192_s11 + $0xf8] ss:$20 sps:$4 sm:$0xff]  }
 0x1b5   : > { %2202 = vmatpush1.bf16.msra.mxu1 %v7224_v55  ;;  %v7228_v60 = vld [vmem:[%s8192_s11 + $0xfc] ss:$20 sps:$4 sm:$0xff]   ;;  %2142 = vmatprep.subr.bf16.mxu0 %v7225_v58  ;;  %v7234_v0 = vld [vmem:[%s8192_s11 + $0xd4] ss:$20 sps:$4 sm:$0xff]   ;;  %v7237_v2 = vld [vmem:[%s8192_s11 + $0xa4] ss:$20 sps:$4 sm:$0xff]  }
 0x1b6   : > { %1765 = vadd.xlane.f32.xlu0 %v8252_v43  ;;  %2203 = vmatprep.subr.bf16.mxu1 %v7228_v60  ;;  %v7233_v63 = vld [vmem:[%s8192_s11 + $0xc8] ss:$20 sps:$4 sm:$0xff]   ;;  %v7236_v1 = vld [vmem:[%s8192_s11 + $0xd0] ss:$20 sps:$4 sm:$0xff]   ;;  %v7239_v3 = vld [vmem:[%s8192_s11 + $0xa0] ss:$20 sps:$4 sm:$0xff]  }
 0x1b7   : > { %v8261_v47 = vld [vmem:[#allocation2 + $0x18] sm:$0x3]  ;;  %2143 = vmatpush1.bf16.msra.mxu0 %v7227_v59  ;;  %v7240_v4 = vld [vmem:[%s8192_s11 + $0xac] ss:$20 sps:$4 sm:$0xff]   ;;  %v7242_v5 = vld [vmem:[%s8192_s11 + $0xa8] ss:$20 sps:$4 sm:$0xff]   ;;  %2233 = vmatprep.mubr.bf16.mxu1 %v10191_v22 }
 0x1b8   : > { %1788 = vadd.xlane.f32.xlu1 %v1782_v45  ;;  %v1785_v50 = vmul.f32 %v8261_v47, %v8261_v47  ;;  %v1772_v56 = vsel %vm1771_vm1, %v8261_v47, 0.0  ;;  %2144 = vmatprep.subr.bf16.mxu0 %v7231_v62  ;;  %v7243_v6 = vld [vmem:[%s8192_s11 + $0x7c] ss:$20 sps:$4 sm:$0xff]   ;;  %v7245_v7 = vld [vmem:[%s8192_s11 + $0x78] ss:$20 sps:$4 sm:$0xff]   ;;  %vm2637_vm3 = vcmask 1040384  }
 0x1b9   : > { %2204 = vmatpush1.bf16.msra.mxu1 %v7230_v61  ;;  %v7246_v8 = vld [vmem:[%s8192_s11 + $0x84] ss:$20 sps:$4 sm:$0xff]   ;;  %v7248_v9 = vld [vmem:[%s8192_s11 + $0x80] ss:$20 sps:$4 sm:$0xff]   ;;  %v7252_v12 = vld [vmem:[%s8192_s11 + $0x5c] ss:$20 sps:$4 sm:$0xff]  }
 0x1ba   : > { %1767 = vadd.xlane.f32.xlu0 %v8259_v46  ;;  %v1794_v57 = vsel %vm1771_vm1, %v1785_v50, 0.0  ;;  %2205 = vmatprep.subr.bf16.mxu1 %v7234_v0  ;;  %v7249_v10 = vld [vmem:[%s8192_s11 + $0x54] ss:$20 sps:$4 sm:$0xff]   ;;  %v7251_v11 = vld [vmem:[%s8192_s11 + $0x50] ss:$20 sps:$4 sm:$0xff]   ;;  %vm2422_vm4 = vcmask 277504  }
 0x1bb   : > { %2145 = vmatpush1.bf16.msra.mxu0 %v7233_v63  ;;  %v7254_v13 = vld [vmem:[%s8192_s11 + $0x58] ss:$20 sps:$4 sm:$0xff]   ;;  %v7257_v15 = vld [vmem:[%s8192_s11 + $0x28] ss:$20 sps:$4 sm:$0xff]   ;;  %v7260_v17 = vld [vmem:[%s8192_s11 + $0x30] ss:$20 sps:$4 sm:$0xff]  }
 0x1bc   : > { %1769 = vadd.xlane.f32.xlu1 %v8264_v48  ;;  %2146 = vmatprep.subr.bf16.mxu0 %v7237_v2  ;;  %v7255_v14 = vld [vmem:[%s8192_s11 + $0x2c] ss:$20 sps:$4 sm:$0xff]   ;;  %v7258_v16 = vld [vmem:[%s8192_s11 + $0x34] ss:$20 sps:$4 sm:$0xff]   ;;  %v7261_v18 = vld [vmem:[%s8192_s11 + $0x4] ss:$20 sps:$4 sm:$0xff]  }
 0x1bd   : > { %2206 = vmatpush1.bf16.msra.mxu1 %v7236_v1  ;;  %v7264_v19 = vld [vmem:[%s8192_s11 + $0xc] ss:$20 sps:$4 sm:$0xff]   ;;  %v7266_v21 = vld [vmem:[%s8192_s11 + $0x8] ss:$20 sps:$4 sm:$0xff]   ;;  %vm2435_vm5 = vcmask 271360   ;;  %p6384_p9 = scmp.ne.s32.totalorder %s7780_s15, 5 }
 0x1be   : > { %1790 = vadd.xlane.f32.xlu0 %v1783_v49  ;;  %2207 = vmatprep.subr.bf16.mxu1 %v7240_v4  ;;  %v7263_v20 = vld [vmem:[%s8192_s11] ss:$20 sps:$4 sm:$0xff]   ;;  %s10443_s15 = sld [smem:[#allocation26_spill]] (!%p6384_p9) }
 0x1bf   : > { %2147 = vmatpush1.bf16.msra.mxu0 %v7239_v3  ;;  %v6227_v3 = vld [vmem:[%s1288_s25] ss:$0 sm:$0xff]  ;;  %s10288_s25 = sld [smem:[#allocation20_spill]] }
 0x1c0   : > { %1792 = vadd.xlane.f32.xlu1 %v1784_v52  ;;  %2148 = vmatprep.subr.bf16.mxu0 %v7243_v6  ;;  %s10445_s13 = sld [smem:[#allocation13_spill]] (!%p6384_p9) }
 0x1c1   : > { %2208 = vmatpush1.bf16.msra.mxu1 %v7242_v5  ;;  %s10450_s9 = sld [smem:[#allocation30_spill]] (!%p6384_p9) }
 0x1c2   : > { %1773 = vadd.xlane.f32.xlu0 %v1772_v56  ;;  %2209 = vmatprep.subr.bf16.mxu1 %v7246_v8  ;;  %v6228_v8 = vld [vmem:[%s1291_s0] ss:$0 sm:$0xff]  ;;  %s10289_s0 = sld [smem:[#allocation18_spill]] }
 0x1c3   : > { %2149 = vmatpush1.bf16.msra.mxu0 %v7245_v7  ;;  %s10451_s1 = sld [smem:[#allocation32_spill]] (!%p6384_p9) }
 0x1c4   : > { %1795 = vadd.xlane.f32.xlu1 %v1794_v57  ;;  %2150 = vmatprep.subr.bf16.mxu0 %v7249_v10  ;;  %s10455_s22 = sld [smem:[#allocation33_spill]] (!%p6384_p9) }
 0x1c5   : > { %2210 = vmatpush1.bf16.msra.mxu1 %v7248_v9 }
 0x1c6   : > { %2211 = vmatprep.subr.bf16.mxu1 %v7252_v12 }
 0x1c7   : > { %2151 = vmatpush1.bf16.msra.mxu0 %v7251_v11 }
 0x1c8   : > { %2152 = vmatprep.subr.bf16.mxu0 %v7255_v14 }
 0x1c9   : > { %2212 = vmatpush1.bf16.msra.mxu1 %v7254_v13  ;;  %v7267_v13 = vld [vmem:[%s8192_s11 + $0x128] ss:$20 sps:$4 sm:$0xff]  }
 0x1ca   : > { %2213 = vmatprep.subr.bf16.mxu1 %v7258_v16 }
 0x1cb   : > { %2153 = vmatpush1.bf16.msra.mxu0 %v7257_v15 }
 0x1cc   : > { %2154 = vmatprep.subr.bf16.mxu0 %v7261_v18 }
 0x1cd   : > { %2214 = vmatpush1.bf16.msra.mxu1 %v7260_v17 }
 0x1ce   : > { %2215 = vmatprep.subr.bf16.mxu1 %v7264_v19  ;;  %v7268_v19 = vld [vmem:[%s8192_s11 + $0x100] ss:$20 sps:$4 sm:$0xff]  }
 0x1cf   : > { %2155 = vmatpush1.bf16.msra.mxu0 %v7263_v20 }
 0x1d0   : > { %6694 = vmatprep.subr.bf16.mxu0 %v10193_v23 }
 0x1d1   : > { %2216 = vmatpush1.bf16.msra.mxu1 %v7266_v21 }
 0x1d2   : > { %6722 = vmatprep.subr.bf16.mxu1 %v10193_v23 }
 0x23b   : > { %v1764_v24 = vpop.xlane.xlu0 %1763 }
 0x23c   : > { %v1776_v25 = vmul.f32 0.0078125, %v1764_v24 }
 0x23d   : > { %v1787_v26 = vpop.xlane.xlu1 %1786 }
 0x23e   : > { %v1802_v27 = vmul.f32 %v1776_v25, %v1776_v25  ;;  %v1797_v28 = vmul.f32 0.0078125, %v1787_v26  ;;  %v1812_v62 = vsub.f32 %v8250_v38, %v1776_v25  ;;  %v7269_v25 = vld [vmem:[%s8192_s11 + $0xd8] ss:$20 sps:$4 sm:$0xff]  }
 0x23f   : > { %v1766_v29 = vpop.xlane.xlu0 %1765 }
 0x240   : > { %v1807_v30 = vsub.f32 %v1797_v28, %v1802_v27  ;;  %v1777_v31 = vmul.f32 0.0078125, %v1766_v29  ;;  %v7270_v29 = vld [vmem:[%s8192_s11 + $0xb0] ss:$20 sps:$4 sm:$0xff]  }
 0x241   : > { %v1789_v32 = vpop.xlane.xlu1 %1788 }
 0x242   : > { %v1817_v33 = vadd.f32 1e-05, %v1807_v30  ;;  %v1803_v34 = vmul.f32 %v1777_v31, %v1777_v31  ;;  %v1798_v35 = vmul.f32 0.0078125, %v1789_v32  ;;  %v1813_v4 = vsub.f32 %v8252_v43, %v1777_v31  ;;  %v7271_v30 = vld [vmem:[%s8192_s11 + $0x88] ss:$20 sps:$4 sm:$0xff]  }
 0x243   : > { %v1768_v36 = vpop.xlane.xlu0 %1767  ;;  %v7272_v32 = vld [vmem:[%s8192_s11 + $0x60] ss:$20 sps:$4 sm:$0xff]  }
 0x244   : > { %7363 = vrsqrt.f32 %v1817_v33  ;;  %v1808_v37 = vsub.f32 %v1798_v35, %v1803_v34  ;;  %v1778_v39 = vmul.f32 0.0078125, %v1768_v36  ;;  %v7273_v33 = vld [vmem:[%s8192_s11 + $0x38] ss:$20 sps:$4 sm:$0xff]   ;;  %v7274_v34 = vld [vmem:[%s8192_s11 + $0x10] ss:$20 sps:$4 sm:$0xff]   ;;  %v1907_v35 = vlaneseq  ;;  %s10292_s11 = sld [smem:[#allocation19_spill]] }
 0x245   : > { %v1770_v40 = vpop.xlane.xlu1 %1769 }
 0x246   : > { %v1818_v41 = vadd.f32 1e-05, %v1808_v37  ;;  %v1804_v42 = vmul.f32 %v1778_v39, %v1778_v39  ;;  %v1779_v44 = vmul.f32 0.0078125, %v1770_v40  ;;  %v1814_v38 = vsub.f32 %v8259_v46, %v1778_v39  ;;  %v8363_v40 = vld [vmem:[%s8197_s17] sm:$0x1f]  ;;  %s10359_s17 = sld [smem:[#allocation14_spill]] }
 0x247   : > { %v1791_v45 = vpop.xlane.xlu0 %1790  ;;  %v8354_v36 = vshrl.u32 %v1907_v35, 7 }
 0x248   : > { %7365 = vrsqrt.f32 %v1818_v41  ;;  %v1805_v49 = vmul.f32 %v1779_v44, %v1779_v44  ;;  %v1799_v50 = vmul.f32 0.0078125, %v1791_v45  ;;  %v1815_v14 = vsub.f32 %v8264_v48, %v1779_v44 }
 0x249   : > { %v1793_v51 = vpop.xlane.xlu1 %1792  ;;  %10290 = vst [vmem:[#allocation39_spill] sm:$0xff] %v8354_v36  ;;  %v8357_v37 = vsub.s32 0, %v8354_v36  ;;  %v8360_v39 = vsub.s32 2, %v8354_v36  ;;  %v10190_v41 = vsub.s32 3, %v8354_v36 }
 0x24a   : > { %v1809_v52 = vsub.f32 %v1799_v50, %v1804_v42  ;;  %v1800_v53 = vmul.f32 0.0078125, %v1793_v51  ;;  %s10293_s28 = smov %s10292_s11 }
 0x24b   : > { %v1774_v54 = vpop.xlane.xlu0 %1773  ;;  %10291 = vst [vmem:[#allocation40_spill] sm:$0xff] %v8357_v37  ;;  %10294 = vst [vmem:[#allocation41_spill] sm:$0xff] %v8360_v39  ;;  %v8368_v42 = vrot.slane %v8363_v40, %v8357_v37  ;;  %v8372_v44 = vrot.slane %v8363_v40, %v8360_v39  ;;  %v8377_v45 = vrot.slane %v8363_v40, %v10190_v41  ;;  %v8565_v39 = vld [vmem:[%s10293_s28 + $0x20] sm:$0x3] }
 0x24c   : > { %v1819_v55 = vadd.f32 1e-05, %v1809_v52  ;;  %v1810_v56 = vsub.f32 %v1800_v53, %v1805_v49  ;;  %v1780_v57 = vmul.f32 0.0078125, %v1774_v54  ;;  %v8384_v53 = vld [vmem:[%s10288_s25 + $0x2] ss:$0 sm:$0xff] }
 0x24d   : > { %v1796_v58 = vpop.xlane.xlu1 %1795  ;;  %v8387_v54 = vld [vmem:[%s10288_s25 + $0x3] ss:$0 sm:$0xff] }
 0x24e   : > { %7367 = vrsqrt.f32 %v1819_v55  ;;  %v1820_v59 = vadd.f32 1e-05, %v1810_v56  ;;  %v1806_v60 = vmul.f32 %v1780_v57, %v1780_v57  ;;  %v1801_v61 = vmul.f32 0.0078125, %v1796_v58  ;;  %v8390_v55 = vld [vmem:[%s10288_s25 + $0x4] ss:$0 sm:$0xff] }
 0x24f   : > { %v1816_v48 = vsub.f32 %v8261_v47, %v1780_v57  ;;  %v8393_v56 = vld [vmem:[%s10289_s0] sm:$0xff] }
 0x250   : > { %7369 = vrsqrt.f32 %v1820_v59  ;;  %v1811_v0 = vsub.f32 %v1801_v61, %v1806_v60  ;;  %v8398_v58 = vld [vmem:[%s10292_s11] sm:$0xff] }
 0x251   : > { %v7364_v63 = vpop.eup %7363  ;;  %v8402_v61 = vld [vmem:[%s10288_s25 + $0x5] ss:$0 sm:$0xff] }
 0x252   : > { %v1827_v1 = vmul.f32 %v7364_v63, %v1812_v62  ;;  %v1821_v2 = vadd.f32 1e-05, %v1811_v0  ;;  %v8405_v62 = vld [vmem:[%s10288_s25 + $0x6] ss:$0 sm:$0xff]  ;;  %v8408_v63 = vld [vmem:[%s10288_s25 + $0x7] ss:$0 sm:$0xff] }
 0x254   : > { %7371 = vrsqrt.f32 %v1821_v2  ;;  %v1838_v7 = vmul.f32 %v6227_v3, %v1827_v1 }
 0x255   : > { %v7366_v5 = vpop.eup %7365 }
 0x256   : > { %v1828_v6 = vmul.f32 %v7366_v5, %v1813_v4  ;;  %v1849_v10 = vadd.f32 %v6228_v8, %v1838_v7 }
 0x258   : > { %v1839_v9 = vmul.f32 %v6227_v3, %v1828_v6 }
 0x25a   : > { %v1850_v11 = vadd.f32 %v6228_v8, %v1839_v9 }
 0x25b   : > { %v7368_v12 = vpop.eup %7367 }
 0x25c   : > { %v1854_v15 = vpack.c.bf16 %v1850_v11, %v1849_v10  ;;  %v1829_v16 = vmul.f32 %v7368_v12, %v1814_v38  ;;  %v8434_v11 = vld [vmem:[%s10293_s28 + $0x8] sm:$0xff] }
 0x25d   : > { %v7370_v17 = vpop.eup %7369 }
 0x25e   : > { %2173 = vmatmul.mubr.bf16.vlgmr.msra.gmra.mxu0 %v1854_v15  ;;  %2234 = vmatmul.mubr.bf16.vlgmr.msra.gmra.mxu1 %v1854_v15  ;;  %v1830_v43 = vmul.f32 %v7370_v17, %v1815_v14  ;;  %v1840_v18 = vmul.f32 %v6227_v3, %v1829_v16  ;;  %v8451_v16 = vld [vmem:[%s10289_s0 + $0x8] sm:$0xff] }
 0x25f   : > { %6695 = vmatpush3.bf16.msra.mxu0 %v7267_v13  ;;  %2182 = vmatprep.mubr.bf16.mxu0 %v10191_v22 }
 0x260   : > { %6696 = vmatprep.subr.bf16.mxu0 %v10193_v23  ;;  %2243 = vmatprep.mubr.bf16.mxu1 %v10191_v22  ;;  %v1841_v46 = vmul.f32 %v6227_v3, %v1830_v43  ;;  %v1851_v21 = vadd.f32 %v6228_v8, %v1840_v18 }
 0x261   : > { %v7372_v20 = vpop.eup %7371 }
 0x262   : > { %v1852_v24 = vadd.f32 %v6228_v8, %v1841_v46  ;;  %v1831_v26 = vmul.f32 %v7372_v20, %v1816_v48 }
 0x263   : > { %6697 = vmatpush3.bf16.msra.mxu0 %v7268_v19 }
 0x264   : > { %6698 = vmatprep.subr.bf16.mxu0 %v10193_v23  ;;  %v1855_v27 = vpack.c.bf16 %v1852_v24, %v1851_v21  ;;  %v1842_v28 = vmul.f32 %v6227_v3, %v1831_v26  ;;  %v8472_v24 = vld [vmem:[%s10288_s25 + $0x1] ss:$0 sm:$0xff] }
 0x266   : > { %2183 = vmatmul.mubr.bf16.gmra.mxu0 %v1855_v27  ;;  %2244 = vmatmul.mubr.bf16.gmra.mxu1 %v1855_v27  ;;  %v1853_v47 = vadd.f32 %v6228_v8, %v1842_v28  ;;  %v8428_v8 = vld [vmem:[%s10288_s25] ss:$0 sm:$0xff] }
 0x267   : > { %6699 = vmatpush3.bf16.msra.mxu0 %v7269_v25  ;;  %2192 = vmatprep.mubr.bf16.mxu0 %v10191_v22 }
 0x268   : > { %6700 = vmatprep.subr.bf16.mxu0 %v10193_v23  ;;  %2253 = vmatprep.mubr.bf16.mxu1 %v10191_v22  ;;  %v1856_v31 = vpack.c.bf16 %v1853_v47, %v1853_v47  ;;  %v8485_v47 = vld [vmem:[%s10293_s28 + $0x10] sm:$0xff] }
 0x26b   : > { %6701 = vmatpush3.bf16.msra.mxu0 %v7270_v29 }
 0x26c   : > { %6702 = vmatprep.subr.bf16.mxu0 %v10193_v23 }
 0x26e   : > { %2193 = vmatmul.mubr.bf16.gmra.mxu0 %v1856_v31  ;;  %2254 = vmatmul.mubr.bf16.gmra.mxu1 %v1856_v31 }
 0x26f   : > { %6703 = vmatpush3.bf16.msra.mxu0 %v7271_v30  ;;  %6710 = vmatprep.mubr.msk.bf16.mxu0 %vm7834_vm2, %v10193_v23 }
 0x270   : > { %6704 = vmatprep.subr.bf16.mxu0 %v10193_v23  ;;  %6728 = vmatprep.mubr.msk.bf16.mxu1 %vm7834_vm2, %v10193_v23 }
 0x273   : > { %6705 = vmatpush3.bf16.msra.mxu0 %v7272_v32 }
 0x274   : > { %6706 = vmatprep.subr.bf16.mxu0 %v10193_v23 }
 0x277   : > { %6707 = vmatpush3.bf16.msra.mxu0 %v7273_v33 }
 0x278   : > { %6708 = vmatprep.subr.bf16.mxu0 %v10193_v23 }
 0x27b   : > { %6709 = vmatpush3.bf16.msra.mxu0 %v7274_v34 }
 0x27c   : > { %6758 = vmatprep.subr.bf16.mxu0 %v10193_v23 }
 0x27e   : > { %6711 = vmatmul.mubr.bf16.vlgmr.msra.gmra.mxu0 %v1854_v15 }
 0x27f   : > { %6714 = vmatprep.mubr.msk.bf16.mxu0 %vm7834_vm2, %v10193_v23 }
 0x286   : > { %6715 = vmatmul.mubr.bf16.gmra.mxu0 %v1855_v27  ;;  %v8477_v27 = vld [vmem:[%s10289_s0 + $0x10] sm:$0xff] }
 0x287   : > { %6718 = vmatprep.mubr.msk.bf16.mxu0 %vm7834_vm2, %v10193_v23 }
 0x28e   : > { %6719 = vmatmul.mubr.bf16.gmra.mxu0 %v1856_v31 }
 0x28f   : > { %6764 = vmatprep.mubr.msk.bf16.mxu0 %vm7834_vm2, %v10193_v23 }
 0x31e   : > { %v2174_v49 = vpop.f32.mrf.mxu0  ;;  %v2235_v50 = vpop.f32.mrf.mxu1 }
 0x31f   : > { %v2175_v51 = vadd.f32 %v2174_v49, %v8368_v42  ;;  %v8381_v52 = vadd.f32 %v2235_v50, %v8372_v44 }
 0x320   : > { %v8395_v57 = vpop.f32.mrf.mxu0  ;;  %v2237_v59 = vpop.f32.mrf.mxu1 }
 0x321   : > { %v2238_v60 = vadd.f32 %v2237_v59, %v8377_v45  ;;  %v8412_v2 = vmul.f32 %v8384_v53, %v8381_v52  ;;  %v8416_v3 = vmul.f32 %v8387_v54, %v8381_v52  ;;  %v8420_v4 = vmul.f32 %v8390_v55, %v8381_v52 }
 0x322   : > { %v2178_v0 = vpop.f32.mrf.mxu0  ;;  %v2239_v1 = vpop.f32.mrf.mxu1  ;;  %v2318_v5 = vmul.f32 %v2175_v51, %v8393_v56  ;;  %v8438_v12 = vmul.f32 %v8402_v61, %v8381_v52  ;;  %v8442_v13 = vmul.f32 %v8405_v62, %v8381_v52  ;;  %v8446_v14 = vmul.f32 %v8408_v63, %v8381_v52 }
 0x323   : > { %10295 = vst [vmem:[#allocation42_spill] sm:$0xff] %v8412_v2  ;;  %10296 = vst [vmem:[#allocation43_spill] sm:$0xff] %v8416_v3  ;;  %v2323_v6 = vmul.f32 %v2238_v60, %v8398_v58  ;;  %v8425_v7 = vadd.f32 %v2239_v1, %v8372_v44  ;;  %v2179_v9 = vadd.f32 %v2178_v0, %v8368_v42  ;;  %v1925_v3 = vsub.s32 4, %v8354_v36 }
 0x324   : > { %10297 = vst [vmem:[#allocation44_spill] sm:$0xff] %v8420_v4  ;;  %v8431_v38 = vpop.f32.mrf.mxu0  ;;  %v2241_v10 = vpop.f32.mrf.mxu1  ;;  %10298 = vst [vmem:[#allocation45_spill] sm:$0xff] %v8438_v12  ;;  %v8456_v19 = vmul.f32 %v8428_v8, %v8381_v52 }
 0x325   : > { %10299 = vst [vmem:[#allocation46_spill] sm:$0xff] %v8442_v13  ;;  %v8448_v15 = vadd.f32 %v2323_v6, %v2318_v5  ;;  %v2242_v17 = vadd.f32 %v2241_v10, %v8377_v45  ;;  %v8460_v46 = vmul.f32 %v8428_v8, %v8425_v7  ;;  %v8464_v48 = vmul.f32 %v8384_v53, %v8425_v7 }
 0x326   : > { %v2184_v43 = vpop.f32.mrf.mxu0  ;;  %v2245_v18 = vpop.f32.mrf.mxu1  ;;  %10300 = vst [vmem:[#allocation47_spill] sm:$0xff] %v8456_v19  ;;  %v8468_v20 = vmul.f32 %v8387_v54, %v8425_v7  ;;  %v2319_v26 = vmul.f32 %v2179_v9, %v8451_v16  ;;  %v8513_v9 = vld [vmem:[%s10293_s28 + $0x18] sm:$0xff] }
 0x327   : > { %10301 = vst [vmem:[#allocation48_spill] sm:$0xff] %v8460_v46  ;;  %10302 = vst [vmem:[#allocation49_spill] sm:$0xff] %v8464_v48  ;;  %v2185_v21 = vadd.f32 %v2184_v43, %v8368_v42  ;;  %v2324_v25 = vmul.f32 %v2242_v17, %v8434_v11  ;;  %v8480_v28 = vadd.f32 %v2245_v18, %v8372_v44  ;;  %v8526_v18 = vld [vmem:[%s10289_s0 + $0x18] sm:$0xff] }
 0x328   : > { %10303 = vst [vmem:[#allocation50_spill] sm:$0xff] %v8468_v20  ;;  %v8482_v29 = vpop.f32.mrf.mxu0  ;;  %v2247_v30 = vpop.f32.mrf.mxu1  ;;  %v8489_v31 = vmul.f32 %v8472_v24, %v8448_v15  ;;  %v8503_v60 = vmul.f32 %v8428_v8, %v8448_v15 }
 0x329   : > { %v2248_v33 = vadd.f32 %v2247_v30, %v8377_v45  ;;  %v8494_v49 = vadd.f32 %v2324_v25, %v2319_v26  ;;  %v2320_v50 = vmul.f32 %v2185_v21, %v8477_v27  ;;  %v8510_v6 = vmul.f32 %v8472_v24, %v8480_v28 }
 0x32a   : > { %10304 = vst [vmem:[#allocation51_spill] sm:$0xff] %v8489_v31  ;;  %v2188_v34 = vpop.f32.mrf.mxu0  ;;  %v2249_v35 = vpop.f32.mrf.mxu1  ;;  %10305 = vst [vmem:[#allocation52_spill] sm:$0xff] %v8503_v60  ;;  %v8531_v25 = vmul.f32 %v8428_v8, %v8480_v28  ;;  %v8535_v26 = vmul.f32 %v8384_v53, %v8448_v15 }
 0x32b   : > { %v2325_v51 = vmul.f32 %v2248_v33, %v8485_v47  ;;  %v8499_v59 = vadd.f32 %v2249_v35, %v8372_v44  ;;  %v2189_v0 = vadd.f32 %v2188_v34, %v8368_v42  ;;  %v8517_v10 = vmul.f32 %v8428_v8, %v8494_v49 }
 0x32c   : > { %v8506_v1 = vpop.f32.mrf.mxu0  ;;  %v2251_v5 = vpop.f32.mrf.mxu1  ;;  %v8521_v17 = vmul.f32 %v8472_v24, %v8494_v49  ;;  %10308 = vst [vmem:[#allocation55_spill] sm:$0xff] %v8531_v25  ;;  %10309 = vst [vmem:[#allocation56_spill] sm:$0xff] %v8535_v26  ;;  %v8559_v35 = vmul.f32 %v8387_v54, %v8494_v49 }
 0x32d   : > { %10306 = vst [vmem:[#allocation53_spill] sm:$0xff] %v8517_v10  ;;  %v8523_v43 = vadd.f32 %v2325_v51, %v2320_v50  ;;  %v2252_v21 = vadd.f32 %v2251_v5, %v8377_v45  ;;  %v8543_v50 = vmul.f32 %v8428_v8, %v8499_v59  ;;  %v8547_v51 = vmul.f32 %v8384_v53, %v8494_v49  ;;  %v8550_v5 = vld [vmem:[%s10289_s0 + $0x20] sm:$0x3] }
 0x32e   : > { %10307 = vst [vmem:[#allocation54_spill] sm:$0xff] %v8521_v17  ;;  %v2194_v30 = vpop.f32.mrf.mxu0  ;;  %v2255_v33 = vpop.f32.mrf.mxu1  ;;  %10311 = vst [vmem:[#allocation58_spill] sm:$0xff] %v8559_v35  ;;  %v2321_v34 = vmul.f32 %v2189_v0, %v8526_v18  ;;  %v8759_v48 = vmul.f32 %v8390_v55, %v8499_v59 }
 0x32f   : > { %10310 = vst [vmem:[#allocation57_spill] sm:$0xff] %v8543_v50  ;;  %v2195_v41 = vadd.f32 %v2194_v30, %v8368_v42  ;;  %v8554_v22 = vadd.f32 %v2255_v33, %v8372_v44  ;;  %v2326_v32 = vmul.f32 %v2252_v21, %v8513_v9  ;;  %v8571_v42 = vmul.f32 %v8472_v24, %v8523_v43 }
 0x330   : > { %v8562_v23 = vpop.f32.mrf.mxu0  ;;  %v2257_v37 = vpop.f32.mrf.mxu1  ;;  %v8575_v44 = vmul.f32 %v8387_v54, %v8448_v15  ;;  %v2623_v30 = vmul.f32 %v8472_v24, %v8499_v59  ;;  %v8584_v33 = vmul.f32 %v8428_v8, %v8523_v43  ;;  %v8594_v60 = vmul.f32 %v8384_v53, %v8523_v43  ;;  %10336 = vst [vmem:[#allocation82_spill] sm:$0xff] %v8759_v48 }
 0x331   : > { %v2258_v21 = vadd.f32 %v2257_v37, %v8377_v45  ;;  %v2624_v0 = vmul.f32 %v8472_v24, %v8554_v22  ;;  %v2322_v19 = vmul.f32 %v2195_v41, %v8550_v5  ;;  %v2331_v50 = vadd.f32 %v2326_v32, %v2321_v34 }
 0x332   : > { %10312 = vst [vmem:[#allocation59_spill] sm:$0xff] %v8575_v44  ;;  %v2198_v46 = vpop.f32.mrf.mxu0  ;;  %v2259_v25 = vpop.f32.mrf.mxu1  ;;  %v2486_v31 = vmul.f32 %v8428_v8, %v8554_v22  ;;  %v8612_v26 = vmul.f32 %v8387_v54, %v8523_v43  ;;  %v8646_v44 = vmul.f32 %v8390_v55, %v8523_v43  ;;  %v8815_v48 = vmul.f32 %v8405_v62, %v8425_v7 }
 0x333   : > { %v2327_v45 = vmul.f32 %v2258_v21, %v8565_v39  ;;  %v2627_v17 = vpack.c.bf16 %v2624_v0, %v2624_v0  ;;  %v8599_v32 = vmul.f32 %v8428_v8, %v2331_v50  ;;  %v8602_v34 = vmul.f32 %v8472_v24, %v2331_v50 }
 0x334   : > { %v2199_v41 = vpop.f32.mrf.mxu0  ;;  %v2260_v46 = vpop.f32.mrf.mxu1  ;;  %v2489_v25 = vpack.c.bf16 %v2486_v31, %v2486_v31  ;;  %v8605_v37 = vmul.f32 %v8384_v53, %v2331_v50  ;;  %10313 = vst [vmem:[#allocation60_spill] sm:$0xff] %v8612_v26  ;;  %v2626_v31 = vpack.c.bf16 %v2623_v30, %v8510_v6  ;;  %10318 = vst [vmem:[#allocation64_spill] sm:$0xff] %v8646_v44 }
 0x335   : > { %v8607_v21 = vadd.f32 %v2327_v45, %v2322_v19  ;;  %v2639_v0 = vsel %vm2637_vm3, %v2627_v17, 0  ;;  %v8615_v41 = vmul.f32 %v8387_v54, %v2331_v50  ;;  %v10315_v45 = vmov 0.0   ;;  %10342 = vst [vmem:[#allocation88_spill] sm:$0xff] %v8815_v48 }
 0x336   : > { %6759 = vmatpush3.bf16.msra.mxu0 %v2639_v0  ;;  %v8620_v46 = vsel %vm2637_vm3, %v2489_v25, 0  ;;  %v2621_v25 = vmul.f32 %v8472_v24, %v8425_v7  ;;  %v8638_v19 = vmul.f32 %v8390_v55, %v8448_v15  ;;  %v8642_v17 = vmul.f32 %v8390_v55, %v8494_v49 }
 0x337   : > { %10314 = vst [vmem:[#allocation61_spill] sm:$0xff] %v8615_v41  ;;  %6760 = vmatprep.subr.bf16.mxu0 %v10315_v45  ;;  %v8629_v10 = vmul.f32 %v8472_v24, %v8607_v21  ;;  %v8649_v35 = vmul.f32 %v8390_v55, %v2331_v50  ;;  %v2620_v6 = vmul.f32 %v8472_v24, %v8381_v52 }
 0x338   : > { %10316 = vst [vmem:[#allocation62_spill] sm:$0xff] %v8638_v19  ;;  %10317 = vst [vmem:[#allocation63_spill] sm:$0xff] %v8642_v17  ;;  %v8657_v0 = vmul.f32 %v8402_v61, %v8448_v15  ;;  %v8664_v41 = vmul.f32 %v8402_v61, %v8494_v49  ;;  %v8671_v52 = vmul.f32 %v8402_v61, %v2331_v50 }
 0x339   : > { %10319 = vst [vmem:[#allocation65_spill] sm:$0xff] %v8649_v35  ;;  %v2625_v24 = vpack.c.bf16 %v2621_v25, %v2620_v6  ;;  %v8675_v30 = vmul.f32 %v8405_v62, %v8448_v15  ;;  %v8679_v19 = vmul.f32 %v8405_v62, %v8494_v49  ;;  %v8687_v35 = vmul.f32 %v8405_v62, %v8523_v43 }
 0x33a   : > { %6761 = vmatpush3.bf16.msra.mxu0 %v2626_v31  ;;  %v8668_v31 = vmul.f32 %v8402_v61, %v8523_v43  ;;  %10321 = vst [vmem:[#allocation67_spill] sm:$0xff] %v8671_v52  ;;  %v8690_v25 = vmul.f32 %v8405_v62, %v2331_v50  ;;  %v8701_v44 = vmul.f32 %v8408_v63, %v8448_v15 }
 0x33b   : > { %6762 = vmatprep.subr.bf16.mxu0 %v10315_v45  ;;  %10322 = vst [vmem:[#allocation68_spill] sm:$0xff] %v8675_v30  ;;  %10323 = vst [vmem:[#allocation69_spill] sm:$0xff] %v8679_v19  ;;  %v8712_v17 = vmul.f32 %v8408_v63, %v2331_v50  ;;  %v2899_v30 = vmul.f32 %v8384_v53, %v8554_v22  ;;  %v8720_v15 = vmul.f32 %v8384_v53, %v8480_v28 }
 0x33c   : > { %10320 = vst [vmem:[#allocation66_spill] sm:$0xff] %v8668_v31  ;;  %10324 = vst [vmem:[#allocation70_spill] sm:$0xff] %v8687_v35  ;;  %v8705_v31 = vmul.f32 %v8408_v63, %v8494_v49  ;;  %v8724_v49 = vmul.f32 %v8384_v53, %v8499_v59  ;;  %v8741_v19 = vmul.f32 %v8387_v54, %v8480_v28  ;;  %v8768_v35 = vsub.s32 1, %v8354_v36 }
 0x33d   : > { %10325 = vst [vmem:[#allocation71_spill] sm:$0xff] %v8690_v25  ;;  %10326 = vst [vmem:[#allocation72_spill] sm:$0xff] %v8701_v44  ;;  %v2902_v50 = vpack.c.bf16 %v2899_v30, %v2899_v30  ;;  %v3110_v44 = vmul.f32 %v8387_v54, %v8554_v22  ;;  %v8745_v30 = vmul.f32 %v8387_v54, %v8499_v59 }
 0x33e   : > { %v8692_v6 = vpop.f32.mrf.mxu0  ;;  %6763 = vmatpush3.bf16.msra.mxu0 %v2625_v24  ;;  %10327 = vst [vmem:[#allocation73_spill] sm:$0xff] %v8705_v31  ;;  %v8709_v24 = vmul.f32 %v8408_v63, %v8523_v43  ;;  %10329 = vst [vmem:[#allocation75_spill] sm:$0xff] %v8712_v17  ;;  %v3321_v26 = vmul.f32 %v8390_v55, %v8554_v22  ;;  %v1926_v36 = vrot.slane %v8363_v40, %v1925_v3 }
 0x33f   : > { %6794 = vmatprep.subr.bf16.mxu0 %v10315_v45  ;;  %10330 = vst [vmem:[#allocation76_spill] sm:$0xff] %v8720_v15  ;;  %10331 = vst [vmem:[#allocation77_spill] sm:$0xff] %v8724_v49  ;;  %v8737_v25 = vsel %vm2637_vm3, %v2902_v50, 0  ;;  %v3113_v43 = vpack.c.bf16 %v3110_v44, %v3110_v44  ;;  %v8763_v15 = vmul.f32 %v8390_v55, %v8425_v7 }
 0x340   : > { %v6712_v52 = vpop.f32.mrf.mxu0  ;;  %10328 = vst [vmem:[#allocation74_spill] sm:$0xff] %v8709_v24  ;;  %10332 = vst [vmem:[#allocation78_spill] sm:$0xff] %v8737_v25  ;;  %v3532_v44 = vmul.f32 %v8402_v61, %v8554_v22  ;;  %v3324_v2 = vpack.c.bf16 %v3321_v26, %v3321_v26  ;;  %v8780_v24 = vmul.f32 %v8402_v61, %v8480_v28 }
 0x341   : > { %10333 = vst [vmem:[#allocation79_spill] sm:$0xff] %v8741_v19  ;;  %10334 = vst [vmem:[#allocation80_spill] sm:$0xff] %v8745_v30  ;;  %v8772_v20 = vsel %vm2637_vm3, %v3113_v43, 0  ;;  %v8787_v43 = vmul.f32 %v8402_v61, %v8499_v59  ;;  %v8794_v30 = vmul.f32 %v8402_v61, %v8425_v7  ;;  %v8800_v49 = vmul.f32 %v8405_v62, %v8480_v28 }
 0x342   : > { %v8726_v52 = vpop.f32.mrf.mxu0  ;;  %10337 = vst [vmem:[#allocation83_spill] sm:$0xff] %v8763_v15  ;;  %10338 = vst [vmem:[#allocation84_spill] sm:$0xff] %v8768_v35  ;;  %v3535_v25 = vpack.c.bf16 %v3532_v44, %v3532_v44  ;;  %v8783_v17 = vsel %vm2637_vm3, %v3324_v2, 0  ;;  %v3743_v44 = vmul.f32 %v8405_v62, %v8554_v22  ;;  %v1914_v2 = vrot.slane %v8363_v40, %v8768_v35 }
 0x343   : > { %10340 = vst [vmem:[#allocation86_spill] sm:$0xff] %v8800_v49  ;;  %v3954_v35 = vmul.f32 %v8408_v63, %v8554_v22 }
 0x344   : > { %v6713_v31 = vpop.f32.mrf.mxu0  ;;  %v2197_v40 = vadd.f32 %v8562_v23, %v1914_v2  ;;  %v8837_v23 = vmul.f32 %v8408_v63, %v8425_v7  ;;  %v2191_v7 = vadd.f32 %v8506_v1, %v1914_v2  ;;  %v2300_v1 = vadd.f32 %v8726_v52, %v1926_v36 }
 0x345   : > { %v8753_v31 = vmul.f32 %v8390_v55, %v8480_v28  ;;  %v3957_v12 = vpack.c.bf16 %v3954_v35, %v3954_v35 }
 0x346   : > { %v2304_v50 = vpop.f32.mrf.mxu0 }
 0x347   : > { %10335 = vst [vmem:[#allocation81_spill] sm:$0xff] %v8753_v31  ;;  %v3746_v31 = vpack.c.bf16 %v3743_v44, %v3743_v44  ;;  %v2305_v13 = vadd.f32 %v2304_v50, %v1926_v36 }
 0x348   : > { %v6716_v19 = vpop.f32.mrf.mxu0 }
 0x349   : > { %v8790_v19 = vsel %vm2637_vm3, %v3535_v25, 0  ;;  %v8824_v25 = vmul.f32 %v8408_v63, %v8480_v28  ;;  %v8831_v15 = vsel %vm2637_vm3, %v3746_v31, 0  ;;  %v2187_v28 = vadd.f32 %v8482_v29, %v1914_v2 }
 0x34a   : > { %v2307_v26 = vpop.f32.mrf.mxu0  ;;  %10339 = vst [vmem:[#allocation85_spill] sm:$0xff] %v8790_v19  ;;  %v8809_v19 = vmul.f32 %v8405_v62, %v8499_v59  ;;  %10344 = vst [vmem:[#allocation90_spill] sm:$0xff] %v8831_v15  ;;  %v2340_v31 = vmul.f32 %v2305_v13, %v8485_v47  ;;  %v2297_v29 = vadd.f32 %v8692_v6, %v1926_v36 }
 0x34b   : > { %10343 = vst [vmem:[#allocation89_spill] sm:$0xff] %v8824_v25  ;;  %v2308_v15 = vadd.f32 %v2307_v26, %v1926_v36  ;;  %v2336_v25 = vmul.f32 %v2191_v7, %v8526_v18  ;;  %v2339_v18 = vmul.f32 %v2300_v1, %v8434_v11  ;;  %v10346_v11 = vld [vmem:[#allocation52_spill] sm:$0xff] }
 0x34c   : > { %10341 = vst [vmem:[#allocation87_spill] sm:$0xff] %v8809_v19  ;;  %v6717_v4 = vpop.f32.mrf.mxu0  ;;  %v2337_v19 = vmul.f32 %v2197_v40, %v8550_v5  ;;  %v2338_v47 = vmul.f32 %v2297_v29, %v8398_v58  ;;  %v2362_v58 = vmul.f32 %v8428_v8, %v8607_v21  ;;  %v10352_v8 = vld [vmem:[#allocation57_spill] sm:$0xff]  ;;  %v10356_v40 = vld [vmem:[#allocation48_spill] sm:$0xff] }
 0x34d   : > { %v8828_v4 = vmul.f32 %v8408_v63, %v8499_v59  ;;  %v8842_v59 = vsel %vm2637_vm3, %v3957_v12, 0 }
 0x34e   : > { %v2312_v44 = vpop.f32.mrf.mxu0 }
 0x34f   : > { %v2313_v3 = vadd.f32 %v2312_v44, %v1926_v36 }
 0x350   : > { %v6720_v49 = vpop.f32.mrf.mxu0 }
 0x351   : > { %v2342_v35 = vmul.f32 %v2313_v3, %v8565_v39  ;;  %v2341_v49 = vmul.f32 %v2308_v15, %v8513_v9  ;;  %v2335_v39 = vmul.f32 %v2187_v28, %v8477_v27  ;;  %v2177_v15 = vadd.f32 %v8395_v57, %v1914_v2  ;;  %v10345_v57 = vld [vmem:[#allocation53_spill] sm:$0xff]  ;;  %v10357_v3 = vld [vmem:[#allocation47_spill] sm:$0xff] }
 0x352   : > { %v2315_v22 = vpop.f32.mrf.mxu0  ;;  %v10347_v6 = vpack.c.bf16 %v10345_v57, %v10346_v11  ;;  %v8939_v57 = vld [vmem:[%s10359_s17 + $0x10] sm:$0xff] }
 0x353   : > { %v2347_v44 = vadd.f32 %v2342_v35, %v2337_v19  ;;  %v2346_v5 = vadd.f32 %v2341_v49, %v2336_v25  ;;  %v2345_v9 = vadd.f32 %v2340_v31, %v2335_v39  ;;  %v2333_v27 = vmul.f32 %v2177_v15, %v8393_v56  ;;  %v10353_v19 = vld [vmem:[#allocation55_spill] sm:$0xff] }
 0x354   : > { %v6721_v48 = vpop.f32.mrf.mxu0  ;;  %v10348_v56 = vpack.c.bf16 %v8599_v32, %v8584_v33  ;;  %v10349_v33 = vld [vmem:[#allocation54_spill] sm:$0xff]  ;;  %v10350_v32 = vld [vmem:[#allocation51_spill] sm:$0xff]  ;;  %v10355_v25 = vpack.c.bf16 %v8602_v34, %v8571_v42  ;;  %v10358_v22 = vpack.c.bf16 %v10356_v40, %v10357_v3 }
 0x355   : > { %v8851_v12 = vpack.c.bf16 %v2347_v44, %v2347_v44  ;;  %v2181_v48 = vadd.f32 %v8431_v38, %v1914_v2  ;;  %v8863_v50 = vpack.c.bf16 %v2346_v5, %v2345_v9  ;;  %v2343_v52 = vadd.f32 %v2338_v47, %v2333_v27 }
 0x356   : > { %v10351_v26 = vpack.c.bf16 %v10349_v33, %v10350_v32  ;;  %v10354_v2 = vpack.c.bf16 %v10352_v8, %v10353_v19  ;;  %v8949_v19 = vld [vmem:[%s10359_s17 + $0x20] sm:$0x3] }
 0x357   : > { %6723 = vmatpush3.bf16.xpose.msra.mxu1 %v8851_v12  ;;  %v2334_v13 = vmul.f32 %v2181_v48, %v8451_v16  ;;  %v2365_v16 = vpack.c.bf16 %v2362_v58, %v2362_v58  ;;  %v8929_v48 = vld [vmem:[%s10359_s17] sm:$0xff] }
 0x358   : > { %6724 = vmatprep.subr.bf16.mxu1 %v10315_v45 }
 0x359   : > { %v2344_v38 = vadd.f32 %v2339_v18, %v2334_v13  ;;  %v8934_v13 = vld [vmem:[%s10359_s17 + $0x8] sm:$0xff] }
 0x35b   : > { %v8870_v36 = vpack.c.bf16 %v2344_v38, %v2343_v52 }
 0x35f   : > { %6725 = vmatpush3.bf16.xpose.msra.mxu1 %v8863_v50 }
 0x360   : > { %6726 = vmatprep.subr.bf16.mxu1 %v10315_v45 }
 0x367   : > { %6727 = vmatpush3.bf16.xpose.msra.mxu1 %v8870_v36 }
 0x368   : > { %6740 = vmatprep.subr.bf16.mxu1 %v10315_v45 }
 0x36e   : > { %6729 = vmatmul.mubr.bf16.vlgmr.msra.gmra.mxu1 %v10347_v6 }
 0x36f   : > { %6741 = vmatpush3.bf16.xpose.msra.mxu1 %v8851_v12  ;;  %6732 = vmatprep.mubr.msk.bf16.mxu1 %vm7834_vm2, %v10315_v45 }
 0x370   : > { %6742 = vmatprep.subr.bf16.mxu1 %v10315_v45 }
 0x376   : > { %6733 = vmatmul.mubr.bf16.gmra.mxu1 %v10348_v56 }
 0x377   : > { %6743 = vmatpush3.bf16.xpose.msra.mxu1 %v8863_v50  ;;  %6736 = vmatprep.mubr.msk.bf16.mxu1 %vm7834_vm2, %v10315_v45 }
 0x378   : > { %6744 = vmatprep.subr.bf16.mxu1 %v10315_v45 }
 0x37e   : > { %6737 = vmatmul.mubr.bf16.gmra.mxu1 %v2365_v16  ;;  %v8944_v16 = vld [vmem:[%s10359_s17 + $0x18] sm:$0xff] }
 0x37f   : > { %6745 = vmatpush3.bf16.xpose.msra.mxu1 %v8870_v36  ;;  %6746 = vmatprep.mubr.msk.bf16.mxu1 %vm7834_vm2, %v10315_v45 }
 0x380   : > { %6776 = vmatprep.subr.bf16.mxu1 %v10315_v45 }
 0x386   : > { %6747 = vmatmul.mubr.bf16.vlgmr.msra.gmra.mxu1 %v10351_v26 }
 0x387   : > { %6777 = vmatpush3.bf16.msra.mxu1 %v8620_v46  ;;  %6750 = vmatprep.mubr.msk.bf16.mxu1 %vm7834_vm2, %v10315_v45  ;;  %v2505_v46 = vpack.c.bf16 %v8629_v10, %v8629_v10 }
 0x388   : > { %6778 = vmatprep.subr.bf16.mxu1 %v10315_v45 }
 0x38b   : > { %6779 = vmatpush3.bf16.msra.mxu1 %v10354_v2 }
 0x38c   : > { %6780 = vmatprep.subr.bf16.mxu1 %v10315_v45 }
 0x38e   : > { %6751 = vmatmul.mubr.bf16.gmra.mxu1 %v10355_v25 }
 0x38f   : > { %6781 = vmatpush3.bf16.msra.mxu1 %v10358_v22  ;;  %6754 = vmatprep.mubr.msk.bf16.mxu1 %vm7834_vm2, %v10315_v45 }
 0x390   : > { %6812 = vmatprep.subr.bf16.mxu1 %v10315_v45 }
 0x396   : > { %6755 = vmatmul.mubr.bf16.gmra.mxu1 %v2505_v46 }
 0x397   : > { %6782 = vmatprep.mubr.msk.bf16.mxu1 %vm7834_vm2, %v10315_v45 }
 0x42e   : > { %v8918_v28 = vpop.f32.mrf.mxu1 }
 0x430   : > { %v6730_v42 = vpop.f32.mrf.mxu1 }
 0x432   : > { %v8920_v34 = vpop.f32.mrf.mxu1 }
 0x434   : > { %v6731_v31 = vpop.f32.mrf.mxu1 }
 0x436   : > { %v8922_v35 = vpop.f32.mrf.mxu1 }
 0x438   : > { %v6734_v7 = vpop.f32.mrf.mxu1 }
 0x43a   : > { %v8924_v44 = vpop.f32.mrf.mxu1 }
 0x43c   : > { %v6735_v49 = vpop.f32.mrf.mxu1 }
 0x43e   : > { %v8926_v39 = vpop.f32.mrf.mxu1 }
 0x440   : > { %v6738_v10 = vpop.f32.mrf.mxu1 }
 0x442   : > { %v2419_v1 = vpop.f32.mrf.mxu1 }
 0x444   : > { %v6739_v5 = vpop.f32.mrf.mxu1 }
 0x446   : > { %v2540_v29 = vpop.f32.mrf.mxu1 }
 0x447   : > { %v2541_v9 = vadd.f32 %v2540_v29, %v8929_v48 }
 0x448   : > { %v6748_v15 = vpop.f32.mrf.mxu1 }
 0x449   : > { %v2562_v18 = vsel %vm2422_vm4, %v2541_v9, -inf }
 0x44a   : > { %2563 = vmax.xlane.f32.xlu0 %v2562_v18  ;;  %v2543_v47 = vpop.f32.mrf.mxu1 }
 0x44b   : > { %v2544_v27 = vadd.f32 %v2543_v47, %v8934_v13 }
 0x44c   : > { %v6749_v38 = vpop.f32.mrf.mxu1 }
 0x44d   : > { %v2565_v52 = vsel %vm2422_vm4, %v2544_v27, -inf }
 0x44e   : > { %2566 = vmax.xlane.f32.xlu1 %v2565_v52  ;;  %v2548_v11 = vpop.f32.mrf.mxu1 }
 0x44f   : > { %v2549_v6 = vadd.f32 %v2548_v11, %v8939_v57 }
 0x450   : > { %v6752_v56 = vpop.f32.mrf.mxu1 }
 0x451   : > { %v2568_v58 = vsel %vm2422_vm4, %v2549_v6, -inf }
 0x452   : > { %2569 = vmax.xlane.f32.xlu0 %v2568_v58  ;;  %v2551_v33 = vpop.f32.mrf.mxu1 }
 0x453   : > { %v2552_v32 = vadd.f32 %v2551_v33, %v8944_v16 }
 0x454   : > { %v6753_v26 = vpop.f32.mrf.mxu1 }
 0x455   : > { %v2571_v8 = vsel %vm2422_vm4, %v2552_v32, -inf }
 0x456   : > { %2572 = vmax.xlane.f32.xlu1 %v2571_v8  ;;  %v2556_v2 = vpop.f32.mrf.mxu1 }
 0x457   : > { %v2557_v25 = vadd.f32 %v2556_v2, %v8949_v19 }
 0x458   : > { %v6756_v40 = vpop.f32.mrf.mxu1 }
 0x459   : > { %v2574_v3 = vsel %vm2435_vm5, %v2557_v25, -inf  ;;  %v8963_v40 = vadd.f32 %v8920_v34, %v8934_v13 }
 0x45a   : > { %2575 = vmax.xlane.f32.xlu0 %v2574_v3  ;;  %v2559_v22 = vpop.f32.mrf.mxu1  ;;  %v8967_v3 = vadd.f32 %v8922_v35, %v8939_v57 }
 0x45b   : > { %v2426_v35 = vsel %vm2422_vm4, %v8963_v40, -inf }
 0x45c   : > { %v6757_v46 = vpop.f32.mrf.mxu1  ;;  %v2429_v34 = vsel %vm2422_vm4, %v8967_v3, -inf }
 0x4d3   : > { %v2564_v42 = vpop.xlane.xlu0 %2563 }
 0x4d4   : > { %v2577_v31 = vsub.f32 %v2541_v9, %v2564_v42  ;;  %v8978_v42 = vadd.f32 %v8926_v39, %v8949_v19 }
 0x4d6   : > { %v2582_v7 = vmul.f32 1.442695, %v2577_v31  ;;  %v2436_v31 = vsel %vm2435_vm5, %v8978_v42, -inf }
 0x4d7   : > { %v2567_v49 = vpop.xlane.xlu1 %2566 }
 0x4d8   : > { %7373 = vpow2.f32 %v2582_v7  ;;  %v2578_v10 = vsub.f32 %v2544_v27, %v2567_v49 }
 0x4da   : > { %v2584_v1 = vmul.f32 1.442695, %v2578_v10 }
 0x4db   : > { %v2570_v5 = vpop.xlane.xlu0 %2569 }
 0x4dc   : > { %7375 = vpow2.f32 %v2584_v1  ;;  %v2579_v29 = vsub.f32 %v2549_v6, %v2570_v5 }
 0x4de   : > { %v2586_v15 = vmul.f32 1.442695, %v2579_v29 }
 0x4df   : > { %v2573_v18 = vpop.xlane.xlu1 %2572 }
 0x4e0   : > { %7377 = vpow2.f32 %v2586_v15  ;;  %v2580_v47 = vsub.f32 %v2552_v32, %v2573_v18  ;;  %v8958_v32 = vadd.f32 %v8918_v28, %v8929_v48  ;;  %v8974_v28 = vadd.f32 %v8924_v44, %v8944_v16 }
 0x4e2   : > { %v2588_v38 = vmul.f32 1.442695, %v2580_v47  ;;  %v2423_v22 = vsel %vm2422_vm4, %v8958_v32, -inf  ;;  %v2432_v7 = vsel %vm2422_vm4, %v8974_v28, -inf }
 0x4e3   : > { %v2576_v52 = vpop.xlane.xlu0 %2575 }
 0x4e4   : > { %7379 = vpow2.f32 %v2588_v38  ;;  %v2581_v11 = vsub.f32 %v2557_v25, %v2576_v52 }
 0x4e5   : > { %v7374_v56 = vpop.eup %7373 }
 0x4e6   : > { %v2590_v58 = vmul.f32 1.442695, %v2581_v11  ;;  %v2592_v9 = vsel %vm2422_vm4, %v7374_v56, 0.0 }
 0x4e7   : > { %2593 = vadd.xlane.f32.xlu1 %v2592_v9 }
 0x4e8   : > { %7381 = vpow2.f32 %v2590_v58 }
 0x4e9   : > { %v7376_v33 = vpop.eup %7375 }
 0x4ea   : > { %v2595_v27 = vsel %vm2422_vm4, %v7376_v33, 0.0 }
 0x4eb   : > { %2596 = vadd.xlane.f32.xlu0 %v2595_v27 }
 0x4ed   : > { %v7378_v26 = vpop.eup %7377 }
 0x4ee   : > { %v2598_v6 = vsel %vm2422_vm4, %v7378_v26, 0.0 }
 0x4ef   : > { %2599 = vadd.xlane.f32.xlu1 %v2598_v6 }
 0x4f1   : > { %v7380_v8 = vpop.eup %7379 }
 0x4f2   : > { %v2601_v2 = vsel %vm2422_vm4, %v7380_v8, 0.0 }
 0x4f3   : > { %2602 = vadd.xlane.f32.xlu0 %v2601_v2 }
 0x4f5   : > { %v7382_v25 = vpop.eup %7381 }
 0x4f6   : > { %v2604_v46 = vsel %vm2435_vm5, %v7382_v25, 0.0 }
 0x4f7   : > { %2424 = vmax.xlane.f32.xlu0 %v2423_v22  ;;  %2605 = vadd.xlane.f32.xlu1 %v2604_v46  ;;  %v10367_v22 = vld [vmem:[#allocation60_spill] sm:$0xff] }
 0x4fb   : > { %2430 = vmax.xlane.f32.xlu0 %v2429_v34  ;;  %2427 = vmax.xlane.f32.xlu1 %v2426_v35  ;;  %v2988_v34 = vmul.f32 %v8387_v54, %v8607_v21  ;;  %v10372_v54 = vld [vmem:[#allocation65_spill] sm:$0xff] }
 0x4fd   : > { %v2991_v35 = vpack.c.bf16 %v2988_v34, %v2988_v34 }
 0x4ff   : > { %2437 = vmax.xlane.f32.xlu0 %v2436_v31  ;;  %2433 = vmax.xlane.f32.xlu1 %v2432_v7  ;;  %v10369_v31 = vld [vmem:[#allocation63_spill] sm:$0xff]  ;;  %v10370_v7 = vld [vmem:[#allocation62_spill] sm:$0xff] }
 0x570   : > { %v2594_v44 = vpop.xlane.xlu1 %2593 }
 0x571   : > { %7383 = vrcp.f32 %v2594_v44  ;;  %v10371_v44 = vpack.c.bf16 %v10369_v31, %v10370_v7 }
 0x574   : > { %v2597_v39 = vpop.xlane.xlu0 %2596 }
 0x575   : > { %7385 = vrcp.f32 %v2597_v39  ;;  %v10373_v39 = vld [vmem:[#allocation64_spill] sm:$0xff] }
 0x578   : > { %v2600_v49 = vpop.xlane.xlu1 %2599 }
 0x579   : > { %7387 = vrcp.f32 %v2600_v49  ;;  %v10374_v49 = vpack.c.bf16 %v10372_v54, %v10373_v39 }
 0x57c   : > { %v2603_v10 = vpop.xlane.xlu0 %2602 }
 0x57d   : > { %7389 = vrcp.f32 %v2603_v10  ;;  %v3199_v10 = vmul.f32 %v8390_v55, %v8607_v21  ;;  %v10376_v55 = vld [vmem:[#allocation67_spill] sm:$0xff] }
 0x57e   : > { %v7384_v1 = vpop.eup %7383 }
 0x57f   : > { %v2612_v15 = vmul.f32 %v7384_v1, %v7374_v56  ;;  %v3202_v1 = vpack.c.bf16 %v3199_v10, %v3199_v10 }
 0x580   : > { %v2606_v5 = vpop.xlane.xlu1 %2605 }
 0x581   : > { %7391 = vrcp.f32 %v2606_v5  ;;  %v10375_v5 = vpack.c.bf16 %v8664_v41, %v8657_v0  ;;  %v3410_v41 = vmul.f32 %v8402_v61, %v8607_v21  ;;  %v10382_v61 = vld [vmem:[#allocation71_spill] sm:$0xff] }
 0x582   : > { %v7386_v29 = vpop.eup %7385 }
 0x583   : > { %v2613_v18 = vmul.f32 %v7386_v29, %v7376_v33  ;;  %v10377_v29 = vld [vmem:[#allocation66_spill] sm:$0xff]  ;;  %v3413_v0 = vpack.c.bf16 %v3410_v41, %v3410_v41 }
 0x585   : > { %v2617_v47 = vpack.c.bf16 %v2613_v18, %v2612_v15  ;;  %v10378_v15 = vpack.c.bf16 %v10376_v55, %v10377_v29  ;;  %v10379_v18 = vld [vmem:[#allocation69_spill] sm:$0xff] }
 0x586   : > { %v7388_v38 = vpop.eup %7387 }
 0x587   : > { %6765 = vmatmul.mubr.msk.bf16.vlgmr.msra.gmra.mxu0 %vm2422_vm4, %v2617_v47  ;;  %v2614_v11 = vmul.f32 %v7388_v38, %v7378_v26  ;;  %v10360_v26 = vld [vmem:[#allocation56_spill] sm:$0xff] }
 0x588   : > { %6795 = vmatpush3.bf16.xpose.msra.mxu0 %v8851_v12  ;;  %6768 = vmatprep.mubr.msk.bf16.mxu0 %vm7834_vm2, %v10315_v45  ;;  %v10361_v6 = vpack.c.bf16 %v8547_v51, %v10360_v26  ;;  %v2777_v51 = vmul.f32 %v8384_v53, %v8607_v21  ;;  %v10366_v53 = vld [vmem:[#allocation61_spill] sm:$0xff]  ;;  %v10380_v47 = vld [vmem:[#allocation68_spill] sm:$0xff] }
 0x589   : > { %6796 = vmatprep.subr.bf16.mxu0 %v10315_v45  ;;  %v10368_v46 = vpack.c.bf16 %v10366_v53, %v10367_v22  ;;  %v10381_v38 = vpack.c.bf16 %v10379_v18, %v10380_v47 }
 0x58a   : > { %v7390_v52 = vpop.eup %7389  ;;  %v2780_v2 = vpack.c.bf16 %v2777_v51, %v2777_v51 }
 0x58b   : > { %v2615_v58 = vmul.f32 %v7390_v52, %v7380_v8  ;;  %v10362_v8 = vpack.c.bf16 %v8605_v37, %v8594_v60  ;;  %v10363_v60 = vld [vmem:[#allocation58_spill] sm:$0xff]  ;;  %v10364_v37 = vld [vmem:[#allocation59_spill] sm:$0xff] }
 0x58c   : > { %v10383_v52 = vld [vmem:[#allocation70_spill] sm:$0xff] }
 0x58d   : > { %v2618_v9 = vpack.c.bf16 %v2615_v58, %v2614_v11  ;;  %v10384_v11 = vpack.c.bf16 %v10382_v61, %v10383_v52  ;;  %v3621_v58 = vmul.f32 %v8405_v62, %v8607_v21  ;;  %v3832_v62 = vmul.f32 %v8408_v63, %v8607_v21 }
 0x58e   : > { %v7392_v27 = vpop.eup %7391 }
 0x58f   : > { %6769 = vmatmul.mubr.msk.bf16.gmra.mxu0 %vm2422_vm4, %v2618_v9  ;;  %v2616_v56 = vmul.f32 %v7392_v27, %v7382_v25  ;;  %v10365_v25 = vpack.c.bf16 %v10363_v60, %v10364_v37  ;;  %v10385_v9 = vld [vmem:[#allocation73_spill] sm:$0xff]  ;;  %v10386_v27 = vld [vmem:[#allocation72_spill] sm:$0xff] }
 0x590   : > { %6797 = vmatpush3.bf16.xpose.msra.mxu0 %v8863_v50  ;;  %6772 = vmatprep.mubr.msk.bf16.mxu0 %vm7834_vm2, %v10315_v45 }
 0x591   : > { %6798 = vmatprep.subr.bf16.mxu0 %v10315_v45  ;;  %v2619_v33 = vpack.c.bf16 %v2616_v56, %v2616_v56  ;;  %v10388_v56 = vld [vmem:[#allocation75_spill] sm:$0xff] }
 0x597   : > { %6773 = vmatmul.mubr.msk.bf16.gmra.mxu0 %vm2422_vm4, %v2619_v33  ;;  %v10389_v33 = vld [vmem:[#allocation74_spill] sm:$0xff] }
 0x598   : > { %6799 = vmatpush3.bf16.xpose.msra.mxu0 %v8870_v36  ;;  %6800 = vmatprep.mubr.msk.bf16.mxu0 %vm7834_vm2, %v10315_v45  ;;  %v10390_v26 = vpack.c.bf16 %v10388_v56, %v10389_v33 }
 0x599   : > { %6830 = vmatprep.subr.bf16.mxu0 %v10315_v45 }
 0x59f   : > { %6801 = vmatmul.mubr.bf16.vlgmr.msra.gmra.mxu0 %v10361_v6 }
 0x5a0   : > { %6831 = vmatpush3.bf16.xpose.msra.mxu0 %v8851_v12  ;;  %6804 = vmatprep.mubr.msk.bf16.mxu0 %vm7834_vm2, %v10315_v45 }
 0x5a1   : > { %6832 = vmatprep.subr.bf16.mxu0 %v10315_v45 }
 0x5a7   : > { %6805 = vmatmul.mubr.bf16.gmra.mxu0 %v10362_v8 }
 0x5a8   : > { %6833 = vmatpush3.bf16.xpose.msra.mxu0 %v8863_v50  ;;  %6808 = vmatprep.mubr.msk.bf16.mxu0 %vm7834_vm2, %v10315_v45 }
 0x5a9   : > { %6834 = vmatprep.subr.bf16.mxu0 %v10315_v45 }
 0x5af   : > { %6809 = vmatmul.mubr.bf16.gmra.mxu0 %v2780_v2 }
 0x5b0   : > { %6835 = vmatpush3.bf16.xpose.msra.mxu0 %v8870_v36  ;;  %6836 = vmatprep.mubr.msk.bf16.mxu0 %vm7834_vm2, %v10315_v45 }
 0x5b1   : > { %6866 = vmatprep.subr.bf16.mxu0 %v10315_v45 }
 0x5b7   : > { %6837 = vmatmul.mubr.bf16.vlgmr.msra.gmra.mxu0 %v10365_v25 }
 0x5b8   : > { %6867 = vmatpush3.bf16.xpose.msra.mxu0 %v8851_v12  ;;  %6840 = vmatprep.mubr.msk.bf16.mxu0 %vm7834_vm2, %v10315_v45 }
 0x5b9   : > { %6868 = vmatprep.subr.bf16.mxu0 %v10315_v45 }
 0x5bf   : > { %6841 = vmatmul.mubr.bf16.gmra.mxu0 %v10368_v46 }
 0x5c0   : > { %6869 = vmatpush3.bf16.xpose.msra.mxu0 %v8863_v50  ;;  %6844 = vmatprep.mubr.msk.bf16.mxu0 %vm7834_vm2, %v10315_v45 }
 0x5c1   : > { %6870 = vmatprep.subr.bf16.mxu0 %v10315_v45 }
 0x5c7   : > { %6845 = vmatmul.mubr.bf16.gmra.mxu0 %v2991_v35 }
 0x5c8   : > { %6871 = vmatpush3.bf16.xpose.msra.mxu0 %v8870_v36  ;;  %6872 = vmatprep.mubr.msk.bf16.mxu0 %vm7834_vm2, %v10315_v45 }
 0x5c9   : > { %6902 = vmatprep.subr.bf16.mxu0 %v10315_v45 }
 0x5cf   : > { %6873 = vmatmul.mubr.bf16.vlgmr.msra.gmra.mxu0 %v10371_v44 }
 0x5d0   : > { %6903 = vmatpush3.bf16.xpose.msra.mxu0 %v8851_v12  ;;  %6876 = vmatprep.mubr.msk.bf16.mxu0 %vm7834_vm2, %v10315_v45 }
 0x5d1   : > { %6904 = vmatprep.subr.bf16.mxu0 %v10315_v45 }
 0x5d7   : > { %6877 = vmatmul.mubr.bf16.gmra.mxu0 %v10374_v49 }
 0x5d8   : > { %6905 = vmatpush3.bf16.xpose.msra.mxu0 %v8863_v50  ;;  %6880 = vmatprep.mubr.msk.bf16.mxu0 %vm7834_vm2, %v10315_v45 }
 0x5d9   : > { %6906 = vmatprep.subr.bf16.mxu0 %v10315_v45 }
 0x5df   : > { %6881 = vmatmul.mubr.bf16.gmra.mxu0 %v3202_v1 }
 0x5e0   : > { %6907 = vmatpush3.bf16.xpose.msra.mxu0 %v8870_v36  ;;  %6908 = vmatprep.mubr.msk.bf16.mxu0 %vm7834_vm2, %v10315_v45 }
 0x5e1   : > { %6938 = vmatprep.subr.bf16.mxu0 %v10315_v45 }
 0x5e7   : > { %6909 = vmatmul.mubr.bf16.vlgmr.msra.gmra.mxu0 %v10375_v5 }
 0x5e8   : > { %6939 = vmatpush3.bf16.xpose.msra.mxu0 %v8851_v12  ;;  %6912 = vmatprep.mubr.msk.bf16.mxu0 %vm7834_vm2, %v10315_v45 }
 0x5e9   : > { %6940 = vmatprep.subr.bf16.mxu0 %v10315_v45 }
 0x5ef   : > { %6913 = vmatmul.mubr.bf16.gmra.mxu0 %v10378_v15 }
 0x5f0   : > { %6941 = vmatpush3.bf16.xpose.msra.mxu0 %v8863_v50  ;;  %6916 = vmatprep.mubr.msk.bf16.mxu0 %vm7834_vm2, %v10315_v45 }
 0x5f1   : > { %6942 = vmatprep.subr.bf16.mxu0 %v10315_v45 }
 0x5f7   : > { %6917 = vmatmul.mubr.bf16.gmra.mxu0 %v3413_v0 }
 0x5f8   : > { %6943 = vmatpush3.bf16.xpose.msra.mxu0 %v8870_v36  ;;  %6944 = vmatprep.mubr.msk.bf16.mxu0 %vm7834_vm2, %v10315_v45 }
 0x5f9   : > { %6974 = vmatprep.subr.bf16.mxu0 %v10315_v45 }
 0x5ff   : > { %6945 = vmatmul.mubr.bf16.vlgmr.msra.gmra.mxu0 %v10381_v38 }
 0x600   : > { %6975 = vmatpush3.bf16.xpose.msra.mxu0 %v8851_v12  ;;  %6948 = vmatprep.mubr.msk.bf16.mxu0 %vm7834_vm2, %v10315_v45  ;;  %v3624_v12 = vpack.c.bf16 %v3621_v58, %v3621_v58 }
 0x601   : > { %6976 = vmatprep.subr.bf16.mxu0 %v10315_v45 }
 0x607   : > { %6949 = vmatmul.mubr.bf16.gmra.mxu0 %v10384_v11 }
 0x608   : > { %6977 = vmatpush3.bf16.xpose.msra.mxu0 %v8863_v50  ;;  %6952 = vmatprep.mubr.msk.bf16.mxu0 %vm7834_vm2, %v10315_v45  ;;  %v10387_v50 = vpack.c.bf16 %v10385_v9, %v10386_v27 }
 0x609   : > { %6978 = vmatprep.subr.bf16.mxu0 %v10315_v45 }
 0x60f   : > { %6953 = vmatmul.mubr.bf16.gmra.mxu0 %v3624_v12 }
 0x610   : > { %6979 = vmatpush3.bf16.xpose.msra.mxu0 %v8870_v36  ;;  %6980 = vmatprep.mubr.msk.bf16.mxu0 %vm7834_vm2, %v10315_v45  ;;  %v3835_v36 = vpack.c.bf16 %v3832_v62, %v3832_v62 }
 0x611   : > { %7010 = vmatprep.subr.bf16.mxu0 %v10315_v45 }
 0x617   : > { %6981 = vmatmul.mubr.bf16.vlgmr.msra.gmra.mxu0 %v10387_v50 }
 0x618   : > { %6984 = vmatprep.mubr.msk.bf16.mxu0 %vm7834_vm2, %v10315_v45 }
 0x61f   : > { %6985 = vmatmul.mubr.bf16.gmra.mxu0 %v10390_v26 }
 0x620   : > { %6988 = vmatprep.mubr.msk.bf16.mxu0 %vm7834_vm2, %v10315_v45 }
 0x627   : > { %6989 = vmatmul.mubr.bf16.gmra.mxu0 %v3835_v36 }
 0x628   : > { %7026 = vmatprep.mubr.msk.bf16.mxu0 %vm7834_vm2, %v10315_v45 }
 0x647   : > { %v9117_v6 = vpop.f32.mrf.mxu0 }
 0x648   : > { %10391 = vst [vmem:[#allocation53_spill] sm:$0xff] %v9117_v6 }
 0x649   : > { %v6766_v8 = vpop.f32.mrf.mxu0 }
 0x64b   : > { %v9119_v51 = vpop.f32.mrf.mxu0 }
 0x64c   : > { %10392 = vst [vmem:[#allocation52_spill] sm:$0xff] %v9119_v51 }
 0x64d   : > { %v6767_v2 = vpop.f32.mrf.mxu0 }
 0x64f   : > { %v9121_v60 = vpop.f32.mrf.mxu0 }
 0x650   : > { %10393 = vst [vmem:[#allocation54_spill] sm:$0xff] %v9121_v60 }
 0x651   : > { %v6770_v37 = vpop.f32.mrf.mxu0 }
 0x653   : > { %v9123_v25 = vpop.f32.mrf.mxu0 }
 0x654   : > { %10394 = vst [vmem:[#allocation51_spill] sm:$0xff] %v9123_v25 }
 0x655   : > { %v6771_v53 = vpop.f32.mrf.mxu0 }
 0x657   : > { %v9125_v22 = vpop.f32.mrf.mxu0 }
 0x658   : > { %10395 = vst [vmem:[#allocation57_spill] sm:$0xff] %v9125_v22 }
 0x659   : > { %v6774_v63 = vpop.f32.mrf.mxu0 }
 0x65b   : > { %v2694_v21 = vpop.f32.mrf.mxu0 }
 0x65d   : > { %v6775_v46 = vpop.f32.mrf.mxu0 }
 0x65e   : > { %v2425_v46 = vpop.xlane.xlu0 %2424 }
 0x65f   : > { %v2815_v34 = vpop.f32.mrf.mxu0 }
 0x660   : > { %v9128_v35 = vadd.f32 %v2815_v34, %v8929_v48 }
 0x661   : > { %v6802_v31 = vpop.f32.mrf.mxu0 }
 0x662   : > { %v2837_v7 = vsel %vm2422_vm4, %v9128_v35, -inf }
 0x663   : > { %2838 = vmax.xlane.f32.xlu1 %v2837_v7  ;;  %v2818_v44 = vpop.f32.mrf.mxu0 }
 0x664   : > { %v9133_v54 = vadd.f32 %v2818_v44, %v8934_v13  ;;  %v2439_v44 = vsub.f32 %v8958_v32, %v2425_v46 }
 0x665   : > { %v6803_v39 = vpop.f32.mrf.mxu0 }
 0x666   : > { %v2840_v49 = vsel %vm2422_vm4, %v9133_v54, -inf }
 0x667   : > { %2841 = vmax.xlane.f32.xlu0 %v2840_v49  ;;  %v2823_v10 = vpop.f32.mrf.mxu0  ;;  %v2428_v49 = vpop.xlane.xlu1 %2427 }
 0x668   : > { %v9138_v1 = vadd.f32 %v2823_v10, %v8939_v57 }
 0x669   : > { %v6806_v5 = vpop.f32.mrf.mxu0 }
 0x66a   : > { %v2843_v55 = vsel %vm2422_vm4, %v9138_v1, -inf }
 0x66b   : > { %2844 = vmax.xlane.f32.xlu1 %v2843_v55  ;;  %v2826_v29 = vpop.f32.mrf.mxu0  ;;  %v2444_v55 = vmul.f32 1.442695, %v2439_v44 }
 0x66c   : > { %v9143_v15 = vadd.f32 %v2826_v29, %v8944_v16  ;;  %v2440_v29 = vsub.f32 %v8963_v40, %v2428_v49 }
 0x66d   : > { %v6807_v41 = vpop.f32.mrf.mxu0  ;;  %7393 = vpow2.f32 %v2444_v55 }
 0x66e   : > { %v2846_v0 = vsel %vm2422_vm4, %v9143_v15, -inf }
 0x66f   : > { %2847 = vmax.xlane.f32.xlu0 %v2846_v0  ;;  %v2831_v18 = vpop.f32.mrf.mxu0 }
 0x670   : > { %v9148_v47 = vadd.f32 %v2831_v18, %v8949_v19 }
 0x671   : > { %v6810_v38 = vpop.f32.mrf.mxu0 }
 0x672   : > { %v2849_v61 = vsel %vm2435_vm5, %v9148_v47, -inf  ;;  %v2446_v38 = vmul.f32 1.442695, %v2440_v29 }
 0x673   : > { %2850 = vmax.xlane.f32.xlu1 %v2849_v61  ;;  %v2834_v52 = vpop.f32.mrf.mxu0  ;;  %v2431_v61 = vpop.xlane.xlu0 %2430 }
 0x674   : > { %7395 = vpow2.f32 %v2446_v38  ;;  %v2441_v40 = vsub.f32 %v8967_v3, %v2431_v61 }
 0x675   : > { %v6811_v11 = vpop.f32.mrf.mxu0 }
 0x677   : > { %v3026_v58 = vpop.f32.mrf.mxu0 }
 0x678   : > { %v9153_v12 = vadd.f32 %v3026_v58, %v8929_v48 }
 0x679   : > { %v6838_v9 = vpop.f32.mrf.mxu0 }
 0x67a   : > { %v3048_v27 = vsel %vm2422_vm4, %v9153_v12, -inf  ;;  %v9202_v44 = vpop.eup %7393 }
 0x67b   : > { %3049 = vmax.xlane.f32.xlu0 %v3048_v27  ;;  %v3029_v50 = vpop.f32.mrf.mxu0  ;;  %v2434_v27 = vpop.xlane.xlu1 %2433  ;;  %v2454_v55 = vsel %vm2422_vm4, %v9202_v44, 0.0 }
 0x67c   : > { %v9158_v56 = vadd.f32 %v3029_v50, %v8934_v13 }
 0x67d   : > { %v6839_v33 = vpop.f32.mrf.mxu0 }
 0x67e   : > { %v3051_v26 = vsel %vm2422_vm4, %v9158_v56, -inf }
 0x67f   : > { %3052 = vmax.xlane.f32.xlu1 %v3051_v26  ;;  %v3034_v62 = vpop.f32.mrf.mxu0 }
 0x680   : > { %v9163_v36 = vadd.f32 %v3034_v62, %v8939_v57  ;;  %v2448_v62 = vmul.f32 1.442695, %v2441_v40 }
 0x681   : > { %v6842_v8 = vpop.f32.mrf.mxu0 }
 0x682   : > { %v3054_v2 = vsel %vm2422_vm4, %v9163_v36, -inf  ;;  %v2442_v8 = vsub.f32 %v8974_v28, %v2434_v27  ;;  %7397 = vpow2.f32 %v2448_v62 }
 0x683   : > { %3055 = vmax.xlane.f32.xlu0 %v3054_v2  ;;  %v3037_v37 = vpop.f32.mrf.mxu0 }
 0x684   : > { %v9168_v53 = vadd.f32 %v3037_v37, %v8944_v16  ;;  %v2438_v37 = vpop.xlane.xlu0 %2437  ;;  %v2450_v46 = vmul.f32 1.442695, %v2442_v8 }
 0x685   : > { %v6843_v63 = vpop.f32.mrf.mxu0 }
 0x686   : > { %v3057_v21 = vsel %vm2422_vm4, %v9168_v53, -inf  ;;  %7399 = vpow2.f32 %v2450_v46 }
 0x687   : > { %3058 = vmax.xlane.f32.xlu1 %v3057_v21  ;;  %v3042_v34 = vpop.f32.mrf.mxu0 }
 0x688   : > { %v9173_v31 = vadd.f32 %v3042_v34, %v8949_v19  ;;  %v2443_v34 = vsub.f32 %v8978_v42, %v2438_v37  ;;  %v9211_v42 = vpop.eup %7395 }
 0x689   : > { %v6846_v7 = vpop.f32.mrf.mxu0 }
 0x68a   : > { %v3060_v39 = vsel %vm2435_vm5, %v9173_v31, -inf }
 0x68b   : > { %3061 = vmax.xlane.f32.xlu0 %v3060_v39  ;;  %v3045_v10 = vpop.f32.mrf.mxu0 }
 0x68c   : > { %v2452_v10 = vmul.f32 1.442695, %v2443_v34 }
 0x68d   : > { %v6847_v5 = vpop.f32.mrf.mxu0 }
 0x68e   : > { %7401 = vpow2.f32 %v2452_v10 }
 0x68f   : > { %v3237_v41 = vpop.f32.mrf.mxu0 }
 0x690   : > { %v9180_v0 = vadd.f32 %v3237_v41, %v8929_v48 }
 0x691   : > { %v6874_v18 = vpop.f32.mrf.mxu0 }
 0x692   : > { %v3259_v32 = vsel %vm2422_vm4, %v9180_v0, -inf  ;;  %v2457_v18 = vsel %vm2422_vm4, %v9211_v42, 0.0 }
 0x693   : > { %3260 = vmax.xlane.f32.xlu1 %v3259_v32  ;;  %v3240_v52 = vpop.f32.mrf.mxu0 }
 0x694   : > { %v9185_v11 = vadd.f32 %v3240_v52, %v8934_v13 }
 0x695   : > { %v6875_v58 = vpop.f32.mrf.mxu0 }
 0x696   : > { %v3262_v9 = vsel %vm2422_vm4, %v9185_v11, -inf  ;;  %v9220_v58 = vpop.eup %7397 }
 0x697   : > { %3263 = vmax.xlane.f32.xlu0 %v3262_v9  ;;  %v3245_v50 = vpop.f32.mrf.mxu0  ;;  %v9229_v62 = vpop.eup %7399 }
 0x698   : > { %v9191_v33 = vadd.f32 %v3245_v50, %v8939_v57 }
 0x699   : > { %v6878_v26 = vpop.f32.mrf.mxu0 }
 0x69a   : > { %v3265_v2 = vsel %vm2422_vm4, %v9191_v33, -inf  ;;  %v2460_v26 = vsel %vm2422_vm4, %v9220_v58, 0.0 }
 0x69b   : > { %3266 = vmax.xlane.f32.xlu1 %v3265_v2  ;;  %v3248_v63 = vpop.f32.mrf.mxu0  ;;  %v9238_v46 = vpop.eup %7401 }
 0x69c   : > { %v9197_v3 = vadd.f32 %v3248_v63, %v8944_v16  ;;  %v2463_v63 = vsel %vm2422_vm4, %v9229_v62, 0.0  ;;  %v2466_v10 = vsel %vm2435_vm5, %v9238_v46, 0.0 }
 0x69d   : > { %v6879_v21 = vpop.f32.mrf.mxu0 }
 0x69e   : > { %v3268_v7 = vsel %vm2422_vm4, %v9197_v3, -inf }
 0x69f   : > { %3269 = vmax.xlane.f32.xlu0 %v3268_v7  ;;  %v3253_v28 = vpop.f32.mrf.mxu0 }
 0x6a0   : > { %v9205_v39 = vadd.f32 %v3253_v28, %v8949_v19 }
 0x6a1   : > { %v6882_v49 = vpop.f32.mrf.mxu0 }
 0x6a2   : > { %v3271_v5 = vsel %vm2435_vm5, %v9205_v39, -inf }
 0x6a3   : > { %3272 = vmax.xlane.f32.xlu1 %v3271_v5  ;;  %v3256_v29 = vpop.f32.mrf.mxu0  ;;  %2455 = vadd.xlane.f32.xlu0 %v2454_v55 }
 0x6a5   : > { %v6883_v41 = vpop.f32.mrf.mxu0 }
 0x6a7   : > { %2458 = vadd.xlane.f32.xlu1 %v2457_v18  ;;  %v3448_v38 = vpop.f32.mrf.mxu0 }
 0x6a8   : > { %v9216_v32 = vadd.f32 %v3448_v38, %v8929_v48 }
 0x6a9   : > { %v6910_v61 = vpop.f32.mrf.mxu0 }
 0x6aa   : > { %v3470_v52 = vsel %vm2422_vm4, %v9216_v32, -inf }
 0x6ab   : > { %v3451_v40 = vpop.f32.mrf.mxu0  ;;  %3471 = vmax.xlane.f32.xlu0 %v3470_v52 }
 0x6ac   : > { %v9223_v9 = vadd.f32 %v3451_v40, %v8934_v13 }
 0x6ad   : > { %v6911_v27 = vpop.f32.mrf.mxu0 }
 0x6ae   : > { %v3473_v50 = vsel %vm2422_vm4, %v9223_v9, -inf }
 0x6af   : > { %3474 = vmax.xlane.f32.xlu1 %v3473_v50  ;;  %v3456_v8 = vpop.f32.mrf.mxu0  ;;  %2461 = vadd.xlane.f32.xlu0 %v2460_v26 }
 0x6b0   : > { %v9232_v2 = vadd.f32 %v3456_v8, %v8939_v57 }
 0x6b1   : > { %v6914_v37 = vpop.f32.mrf.mxu0 }
 0x6b2   : > { %v3476_v21 = vsel %vm2422_vm4, %v9232_v2, -inf }
 0x6b3   : > { %2464 = vadd.xlane.f32.xlu1 %v2463_v63  ;;  %v3459_v34 = vpop.f32.mrf.mxu0  ;;  %3477 = vmax.xlane.f32.xlu0 %v3476_v21 }
 0x6b4   : > { %v9241_v7 = vadd.f32 %v3459_v34, %v8944_v16 }
 0x6b5   : > { %v6915_v28 = vpop.f32.mrf.mxu0 }
 0x6b6   : > { %v3479_v49 = vsel %vm2422_vm4, %v9241_v7, -inf }
 0x6b7   : > { %3480 = vmax.xlane.f32.xlu1 %v3479_v49  ;;  %v3464_v5 = vpop.f32.mrf.mxu0  ;;  %2467 = vadd.xlane.f32.xlu0 %v2466_v10 }
 0x6b8   : > { %v9248_v55 = vadd.f32 %v3464_v5, %v8949_v19 }
 0x6b9   : > { %v6918_v29 = vpop.f32.mrf.mxu0 }
 0x6ba   : > { %v3482_v41 = vsel %vm2435_vm5, %v9248_v55, -inf }
 0x6bb   : > { %3483 = vmax.xlane.f32.xlu1 %v3482_v41  ;;  %v3467_v18 = vpop.f32.mrf.mxu0 }
 0x6bd   : > { %v6919_v38 = vpop.f32.mrf.mxu0 }
 0x6bf   : > { %v3659_v61 = vpop.f32.mrf.mxu0 }
 0x6c1   : > { %v6946_v52 = vpop.f32.mrf.mxu0 }
 0x6c3   : > { %v3662_v40 = vpop.f32.mrf.mxu0 }
 0x6c5   : > { %v6947_v27 = vpop.f32.mrf.mxu0 }
 0x6c7   : > { %v3667_v50 = vpop.f32.mrf.mxu0 }
 0x6c9   : > { %v6950_v26 = vpop.f32.mrf.mxu0 }
 0x6cb   : > { %v3670_v8 = vpop.f32.mrf.mxu0 }
 0x6cd   : > { %v6951_v37 = vpop.f32.mrf.mxu0 }
 0x6cf   : > { %v9252_v63 = vpop.f32.mrf.mxu0 }
 0x6d1   : > { %v6954_v21 = vpop.f32.mrf.mxu0 }
 0x6d3   : > { %v3678_v34 = vpop.f32.mrf.mxu0 }
 0x6d5   : > { %v6955_v28 = vpop.f32.mrf.mxu0 }
 0x6d7   : > { %v9254_v49 = vpop.f32.mrf.mxu0 }
 0x6d9   : > { %v6982_v10 = vpop.f32.mrf.mxu0 }
 0x6db   : > { %v9256_v5 = vpop.f32.mrf.mxu0 }
 0x6dd   : > { %v6983_v29 = vpop.f32.mrf.mxu0 }
 0x6df   : > { %v9258_v41 = vpop.f32.mrf.mxu0 }
 0x6e1   : > { %v6986_v18 = vpop.f32.mrf.mxu0 }
 0x6e3   : > { %v9260_v38 = vpop.f32.mrf.mxu0 }
 0x6e5   : > { %v6987_v52 = vpop.f32.mrf.mxu0 }
 0x6e7   : > { %v9262_v27 = vpop.f32.mrf.mxu0 }
 0x6e9   : > { %v6990_v26 = vpop.f32.mrf.mxu0 }
 0x6eb   : > { %v3889_v37 = vpop.f32.mrf.mxu0 }
 0x6ec   : > { %v2839_v22 = vpop.xlane.xlu1 %2838 }
 0x6ed   : > { %v2852_v21 = vsub.f32 %v9128_v35, %v2839_v22  ;;  %v6991_v34 = vpop.f32.mrf.mxu0 }
 0x6ee   : > { %v9289_v34 = vadd.f32 %v3667_v50, %v8939_v57 }
 0x6ef   : > { %v2857_v28 = vmul.f32 1.442695, %v2852_v21  ;;  %v9272_v21 = vadd.f32 %v3659_v61, %v8929_v48 }
 0x6f0   : > { %v2842_v25 = vpop.xlane.xlu0 %2841 }
 0x6f1   : > { %7403 = vpow2.f32 %v2857_v28  ;;  %v2853_v10 = vsub.f32 %v9133_v54, %v2842_v25 }
 0x6f3   : > { %v2859_v29 = vmul.f32 1.442695, %v2853_v10 }
 0x6f4   : > { %v2845_v60 = vpop.xlane.xlu1 %2844 }
 0x6f5   : > { %7405 = vpow2.f32 %v2859_v29  ;;  %v2854_v18 = vsub.f32 %v9138_v1, %v2845_v60  ;;  %v3681_v1 = vsel %vm2422_vm4, %v9272_v21, -inf }
 0x6f7   : > { %v2861_v51 = vmul.f32 1.442695, %v2854_v18 }
 0x6f8   : > { %v2848_v52 = vpop.xlane.xlu0 %2847 }
 0x6f9   : > { %7407 = vpow2.f32 %v2861_v51  ;;  %v2855_v26 = vsub.f32 %v9143_v15, %v2848_v52  ;;  %v9279_v51 = vadd.f32 %v3662_v40, %v8934_v13 }
 0x6fb   : > { %v2863_v37 = vmul.f32 1.442695, %v2855_v26  ;;  %v3684_v10 = vsel %vm2422_vm4, %v9279_v51, -inf  ;;  %v3687_v26 = vsel %vm2422_vm4, %v9289_v34, -inf }
 0x6fc   : > { %v2851_v6 = vpop.xlane.xlu1 %2850 }
 0x6fd   : > { %7409 = vpow2.f32 %v2863_v37  ;;  %v2856_v22 = vsub.f32 %v9148_v47, %v2851_v6 }
 0x6fe   : > { %v9269_v35 = vpop.eup %7403 }
 0x6ff   : > { %v2865_v25 = vmul.f32 1.442695, %v2856_v22  ;;  %v2867_v54 = vsel %vm2422_vm4, %v9269_v35, 0.0 }
 0x700   : > { %2868 = vadd.xlane.f32.xlu0 %v2867_v54 }
 0x701   : > { %7411 = vpow2.f32 %v2865_v25 }
 0x702   : > { %v9276_v60 = vpop.eup %7405 }
 0x703   : > { %v2870_v6 = vsel %vm2422_vm4, %v9276_v60, 0.0 }
 0x704   : > { %3682 = vmax.xlane.f32.xlu0 %v3681_v1  ;;  %2871 = vadd.xlane.f32.xlu1 %v2870_v6  ;;  %v3050_v15 = vpop.xlane.xlu0 %3049 }
 0x705   : > { %v3063_v47 = vsub.f32 %v9153_v12, %v3050_v15  ;;  %v9299_v12 = vadd.f32 %v3670_v8, %v8944_v16 }
 0x706   : > { %v9286_v61 = vpop.eup %7407 }
 0x707   : > { %v3068_v28 = vmul.f32 1.442695, %v3063_v47  ;;  %v2873_v40 = vsel %vm2422_vm4, %v9286_v61, 0.0  ;;  %v3690_v6 = vsel %vm2422_vm4, %v9299_v12, -inf }
 0x708   : > { %v3053_v29 = vpop.xlane.xlu1 %3052  ;;  %2874 = vadd.xlane.f32.xlu0 %v2873_v40  ;;  %3685 = vmax.xlane.f32.xlu1 %v3684_v10 }
 0x709   : > { %7413 = vpow2.f32 %v3068_v28  ;;  %v3064_v18 = vsub.f32 %v9158_v56, %v3053_v29  ;;  %v9310_v56 = vadd.f32 %v9252_v63, %v8949_v19  ;;  %v9324_v29 = vadd.f32 %v9254_v49, %v8929_v48 }
 0x70a   : > { %v9296_v52 = vpop.eup %7409 }
 0x70b   : > { %v3070_v50 = vmul.f32 1.442695, %v3064_v18  ;;  %v2876_v37 = vsel %vm2422_vm4, %v9296_v52, 0.0  ;;  %v3693_v28 = vsel %vm2435_vm5, %v9310_v56, -inf }
 0x70c   : > { %3688 = vmax.xlane.f32.xlu0 %v3687_v26  ;;  %2877 = vadd.xlane.f32.xlu1 %v2876_v37  ;;  %v3056_v22 = vpop.xlane.xlu0 %3055  ;;  %v9332_v26 = vadd.f32 %v9256_v5, %v8934_v13  ;;  %v3892_v37 = vsel %vm2422_vm4, %v9324_v29, -inf }
 0x70d   : > { %7415 = vpow2.f32 %v3070_v50  ;;  %v3065_v25 = vsub.f32 %v9163_v36, %v3056_v22 }
 0x70e   : > { %v9306_v54 = vpop.eup %7411  ;;  %v3895_v13 = vsel %vm2422_vm4, %v9332_v26, -inf }
 0x70f   : > { %v3072_v8 = vmul.f32 1.442695, %v3065_v25  ;;  %v2879_v1 = vsel %vm2435_vm5, %v9306_v54, 0.0  ;;  %v9343_v25 = vadd.f32 %v9258_v41, %v8939_v57 }
 0x710   : > { %v3059_v15 = vpop.xlane.xlu1 %3058  ;;  %2880 = vadd.xlane.f32.xlu0 %v2879_v1  ;;  %3691 = vmax.xlane.f32.xlu1 %v3690_v6 }
 0x711   : > { %7417 = vpow2.f32 %v3072_v8  ;;  %v3066_v47 = vsub.f32 %v9168_v53, %v3059_v15  ;;  %v9354_v15 = vadd.f32 %v9260_v38, %v8944_v16 }
 0x713   : > { %v3074_v36 = vmul.f32 1.442695, %v3066_v47  ;;  %v3898_v47 = vsel %vm2422_vm4, %v9343_v25, -inf  ;;  %v3901_v16 = vsel %vm2422_vm4, %v9354_v15, -inf }
 0x714   : > { %3694 = vmax.xlane.f32.xlu1 %v3693_v28  ;;  %v3062_v63 = vpop.xlane.xlu0 %3061 }
 0x715   : > { %7419 = vpow2.f32 %v3074_v36  ;;  %v3067_v40 = vsub.f32 %v9173_v31, %v3062_v63 }
 0x716   : > { %v9320_v10 = vpop.eup %7413 }
 0x717   : > { %v3076_v18 = vmul.f32 1.442695, %v3067_v40  ;;  %v3078_v50 = vsel %vm2422_vm4, %v9320_v10, 0.0 }
 0x718   : > { %3079 = vadd.xlane.f32.xlu0 %v3078_v50 }
 0x719   : > { %7421 = vpow2.f32 %v3076_v18 }
 0x71a   : > { %v9328_v53 = vpop.eup %7415 }
 0x71b   : > { %v3081_v31 = vsel %vm2422_vm4, %v9328_v53, 0.0 }
 0x71c   : > { %v3261_v48 = vpop.xlane.xlu1 %3260  ;;  %3082 = vadd.xlane.f32.xlu1 %v3081_v31  ;;  %3893 = vmax.xlane.f32.xlu0 %v3892_v37 }
 0x71d   : > { %v3274_v49 = vsub.f32 %v9180_v0, %v3261_v48 }
 0x71e   : > { %v9339_v22 = vpop.eup %7417 }
 0x71f   : > { %v3279_v8 = vmul.f32 1.442695, %v3274_v49  ;;  %v3084_v5 = vsel %vm2422_vm4, %v9339_v22, 0.0 }
 0x720   : > { %3896 = vmax.xlane.f32.xlu1 %v3895_v13  ;;  %3085 = vadd.xlane.f32.xlu0 %v3084_v5  ;;  %v3264_v1 = vpop.xlane.xlu0 %3263 }
 0x721   : > { %7423 = vpow2.f32 %v3279_v8  ;;  %v3275_v6 = vsub.f32 %v9185_v11, %v3264_v1 }
 0x722   : > { %v9350_v0 = vpop.eup %7419 }
 0x723   : > { %v3281_v57 = vmul.f32 1.442695, %v3275_v6  ;;  %v3087_v41 = vsel %vm2422_vm4, %v9350_v0, 0.0 }
 0x724   : > { %v3267_v36 = vpop.xlane.xlu1 %3266  ;;  %3088 = vadd.xlane.f32.xlu1 %v3087_v41  ;;  %3899 = vmax.xlane.f32.xlu0 %v3898_v47 }
 0x725   : > { %7425 = vpow2.f32 %v3281_v57  ;;  %v3276_v28 = vsub.f32 %v9191_v33, %v3267_v36  ;;  %v9382_v57 = vadd.f32 %v9262_v27, %v8949_v19 }
 0x726   : > { %v9361_v11 = vpop.eup %7421 }
 0x727   : > { %v3283_v63 = vmul.f32 1.442695, %v3276_v28  ;;  %v3090_v38 = vsel %vm2435_vm5, %v9361_v11, 0.0 }
 0x728   : > { %3902 = vmax.xlane.f32.xlu1 %v3901_v16  ;;  %3091 = vadd.xlane.f32.xlu0 %v3090_v38  ;;  %v3270_v40 = vpop.xlane.xlu0 %3269 }
 0x729   : > { %7427 = vpow2.f32 %v3283_v63  ;;  %v3277_v18 = vsub.f32 %v9197_v3, %v3270_v40 }
 0x72b   : > { %v3285_v50 = vmul.f32 1.442695, %v3277_v18 }
 0x72c   : > { %v3273_v31 = vpop.xlane.xlu1 %3272  ;;  %v2456_v37 = vpop.xlane.xlu0 %2455 }
 0x72d   : > { %7429 = vpow2.f32 %v3285_v50  ;;  %v3278_v33 = vsub.f32 %v9205_v39, %v3273_v31 }
 0x72e   : > { %v9369_v48 = vpop.eup %7423  ;;  %7431 = vrcp.f32 %v2456_v37 }
 0x72f   : > { %v3287_v49 = vmul.f32 1.442695, %v3278_v33  ;;  %v3289_v8 = vsel %vm2422_vm4, %v9369_v48, 0.0 }
 0x730   : > { %v2459_v13 = vpop.xlane.xlu1 %2458  ;;  %3290 = vadd.xlane.f32.xlu1 %v3289_v8 }
 0x731   : > { %7433 = vpow2.f32 %v3287_v49 }
 0x732   : > { %v9373_v5 = vpop.eup %7425  ;;  %7435 = vrcp.f32 %v2459_v13 }
 0x733   : > { %v3292_v3 = vsel %vm2422_vm4, %v9373_v5, 0.0 }
 0x734   : > { %3293 = vadd.xlane.f32.xlu0 %v3292_v3  ;;  %v3472_v1 = vpop.xlane.xlu0 %3471 }
 0x735   : > { %v3485_v39 = vsub.f32 %v9216_v32, %v3472_v1  ;;  %v3904_v32 = vsel %vm2435_vm5, %v9382_v57, -inf }
 0x736   : > { %v9378_v6 = vpop.eup %7427 }
 0x737   : > { %v3490_v41 = vmul.f32 1.442695, %v3485_v39  ;;  %v3295_v47 = vsel %vm2422_vm4, %v9378_v6, 0.0 }
 0x738   : > { %v3475_v36 = vpop.xlane.xlu1 %3474  ;;  %3296 = vadd.xlane.f32.xlu1 %v3295_v47  ;;  %v2462_v28 = vpop.xlane.xlu0 %2461  ;;  %v10396_v47 = vld [vmem:[#allocation78_spill] sm:$0xff] }
 0x739   : > { %7437 = vpow2.f32 %v3490_v41  ;;  %v3486_v63 = vsub.f32 %v9223_v9, %v3475_v36 }
 0x73a   : > { %v9387_v16 = vpop.eup %7429  ;;  %7439 = vrcp.f32 %v2462_v28 }
 0x73b   : > { %v3492_v38 = vmul.f32 1.442695, %v3486_v63  ;;  %v3298_v19 = vsel %vm2422_vm4, %v9387_v16, 0.0  ;;  %v7432_v18 = vpop.eup %7431  ;;  %v10397_v63 = vld [vmem:[#allocation77_spill] sm:$0xff] }
 0x73c   : > { %v2465_v27 = vpop.xlane.xlu1 %2464  ;;  %3905 = vmax.xlane.f32.xlu1 %v3904_v32  ;;  %3299 = vadd.xlane.f32.xlu0 %v3298_v19  ;;  %v3478_v40 = vpop.xlane.xlu0 %3477  ;;  %v2474_v49 = vmul.f32 %v7432_v18, %v9202_v44 }
 0x73d   : > { %7441 = vpow2.f32 %v3492_v38  ;;  %v3487_v50 = vsub.f32 %v9232_v2, %v3478_v40  ;;  %v10398_v38 = vld [vmem:[#allocation76_spill] sm:$0xff] }
 0x73e   : > { %v9394_v31 = vpop.eup %7433  ;;  %7443 = vrcp.f32 %v2465_v27  ;;  %v10399_v32 = vpack.c.bf16 %v10397_v63, %v10398_v38 }
 0x73f   : > { %v7436_v9 = vpop.eup %7435  ;;  %v3494_v33 = vmul.f32 1.442695, %v3487_v50  ;;  %v3301_v37 = vsel %vm2435_vm5, %v9394_v31, 0.0  ;;  %v10400_v50 = vld [vmem:[#allocation49_spill] sm:$0xff] }
 0x740   : > { %v2475_v8 = vmul.f32 %v7436_v9, %v9211_v42  ;;  %v3481_v13 = vpop.xlane.xlu1 %3480  ;;  %3302 = vadd.xlane.f32.xlu0 %v3301_v37  ;;  %v2468_v3 = vpop.xlane.xlu0 %2467  ;;  %v10401_v9 = vld [vmem:[#allocation42_spill] sm:$0xff] }
 0x741   : > { %7445 = vpow2.f32 %v3494_v33  ;;  %v3488_v1 = vsub.f32 %v9241_v7, %v3481_v13  ;;  %v10402_v33 = vpack.c.bf16 %v10400_v50, %v10401_v9 }
 0x742   : > { %v2479_v39 = vpack.c.bf16 %v2475_v8, %v2474_v49  ;;  %7447 = vrcp.f32 %v2468_v3 }
 0x743   : > { %v3496_v2 = vmul.f32 1.442695, %v3488_v1 }
 0x744   : > { %6783 = vmatmul.mubr.msk.bf16.vlgmr.msra.gmra.mxu1 %vm2422_vm4, %v2479_v39  ;;  %v3484_v41 = vpop.xlane.xlu1 %3483 }
 0x745   : > { %7449 = vpow2.f32 %v3496_v2  ;;  %6813 = vmatpush3.bf16.msra.mxu1 %v10396_v47  ;;  %v3489_v36 = vsub.f32 %v9248_v55, %v3484_v41  ;;  %6786 = vmatprep.mubr.msk.bf16.mxu1 %vm7834_vm2, %v10315_v45 }
 0x746   : > { %v9406_v44 = vpop.eup %7437  ;;  %6814 = vmatprep.subr.bf16.mxu1 %v10315_v45 }
 0x747   : > { %v3498_v42 = vmul.f32 1.442695, %v3489_v36  ;;  %v3500_v7 = vsel %vm2422_vm4, %v9406_v44, 0.0  ;;  %v7440_v28 = vpop.eup %7439 }
 0x748   : > { %3501 = vadd.xlane.f32.xlu1 %v3500_v7  ;;  %v2476_v40 = vmul.f32 %v7440_v28, %v9220_v58 }
 0x749   : > { %7451 = vpow2.f32 %v3498_v42  ;;  %6815 = vmatpush3.bf16.msra.mxu1 %v10399_v32 }
 0x74a   : > { %v9414_v19 = vpop.eup %7441  ;;  %6816 = vmatprep.subr.bf16.mxu1 %v10315_v45 }
 0x74b   : > { %v7444_v55 = vpop.eup %7443  ;;  %v3503_v27 = vsel %vm2422_vm4, %v9414_v19, 0.0 }
 0x74c   : > { %3504 = vadd.xlane.f32.xlu0 %v3503_v27  ;;  %v2477_v18 = vmul.f32 %v7444_v55, %v9229_v62 }
 0x74d   : > { %6817 = vmatpush3.bf16.msra.mxu1 %v10402_v33 }
 0x74e   : > { %v9424_v37 = vpop.eup %7445  ;;  %v2480_v49 = vpack.c.bf16 %v2477_v18, %v2476_v40  ;;  %6848 = vmatprep.subr.bf16.mxu1 %v10315_v45 }
 0x74f   : > { %v7448_v8 = vpop.eup %7447  ;;  %v3506_v13 = vsel %vm2422_vm4, %v9424_v37, 0.0 }
 0x750   : > { %6787 = vmatmul.mubr.msk.bf16.gmra.mxu1 %vm2422_vm4, %v2480_v49  ;;  %3507 = vadd.xlane.f32.xlu1 %v3506_v13  ;;  %v2478_v62 = vmul.f32 %v7448_v8, %v9238_v46 }
 0x751   : > { %6790 = vmatprep.mubr.msk.bf16.mxu1 %vm7834_vm2, %v10315_v45 }
 0x752   : > { %v9432_v58 = vpop.eup %7449  ;;  %v2481_v39 = vpack.c.bf16 %v2478_v62, %v2478_v62 }
 0x753   : > { %v3509_v3 = vsel %vm2422_vm4, %v9432_v58, 0.0 }
 0x754   : > { %3510 = vadd.xlane.f32.xlu0 %v3509_v3 }
 0x756   : > { %v9437_v1 = vpop.eup %7451 }
 0x757   : > { %v3512_v2 = vsel %vm2435_vm5, %v9437_v1, 0.0 }
 0x758   : > { %6791 = vmatmul.mubr.msk.bf16.gmra.mxu1 %vm2422_vm4, %v2481_v39  ;;  %3513 = vadd.xlane.f32.xlu1 %v3512_v2 }
 0x759   : > { %6818 = vmatprep.mubr.msk.bf16.mxu1 %vm7834_vm2, %v10315_v45 }
 0x789   : > { %v2869_v41 = vpop.xlane.xlu0 %2868 }
 0x78a   : > { %7453 = vrcp.f32 %v2869_v41 }
 0x78d   : > { %v2872_v47 = vpop.xlane.xlu1 %2871  ;;  %v3683_v46 = vpop.xlane.xlu0 %3682 }
 0x78e   : > { %7455 = vrcp.f32 %v2872_v47  ;;  %v3696_v36 = vsub.f32 %v9272_v21, %v3683_v46  ;;  %v10403_v47 = vld [vmem:[#allocation80_spill] sm:$0xff]  ;;  %v10404_v46 = vld [vmem:[#allocation79_spill] sm:$0xff] }
 0x790   : > { %v3701_v42 = vmul.f32 1.442695, %v3696_v36  ;;  %v10405_v36 = vpack.c.bf16 %v10403_v47, %v10404_v46 }
 0x791   : > { %v3686_v7 = vpop.xlane.xlu1 %3685  ;;  %v2875_v28 = vpop.xlane.xlu0 %2874 }
 0x792   : > { %7457 = vpow2.f32 %v3701_v42  ;;  %v3697_v63 = vsub.f32 %v9279_v51, %v3686_v7 }
 0x793   : > { %7459 = vrcp.f32 %v2875_v28 }
 0x794   : > { %v3703_v38 = vmul.f32 1.442695, %v3697_v63 }
 0x795   : > { %v2878_v32 = vpop.xlane.xlu1 %2877  ;;  %v3689_v55 = vpop.xlane.xlu0 %3688 }
 0x796   : > { %7461 = vpow2.f32 %v3703_v38  ;;  %v3698_v27 = vsub.f32 %v9289_v34, %v3689_v55 }
 0x797   : > { %7463 = vrcp.f32 %v2878_v32  ;;  %v7454_v18 = vpop.eup %7453 }
 0x798   : > { %v3705_v40 = vmul.f32 1.442695, %v3698_v27  ;;  %v2887_v49 = vmul.f32 %v7454_v18, %v9269_v35 }
 0x799   : > { %v3692_v50 = vpop.xlane.xlu1 %3691  ;;  %v2881_v9 = vpop.xlane.xlu0 %2880 }
 0x79a   : > { %7465 = vpow2.f32 %v3705_v40  ;;  %v3699_v21 = vsub.f32 %v9299_v12, %v3692_v50  ;;  %v10407_v50 = vld [vmem:[#allocation43_spill] sm:$0xff] }
 0x79b   : > { %v7456_v33 = vpop.eup %7455  ;;  %7467 = vrcp.f32 %v2881_v9 }
 0x79c   : > { %v2888_v51 = vmul.f32 %v7456_v33, %v9276_v60  ;;  %v3707_v8 = vmul.f32 1.442695, %v3699_v21 }
 0x79d   : > { %v3695_v13 = vpop.xlane.xlu1 %3694 }
 0x79e   : > { %v2892_v62 = vpack.c.bf16 %v2888_v51, %v2887_v49  ;;  %7469 = vpow2.f32 %v3707_v8  ;;  %v3700_v34 = vsub.f32 %v9310_v56, %v3695_v13 }
 0x79f   : > { %v9451_v3 = vpop.eup %7457 }
 0x7a0   : > { %v3709_v39 = vmul.f32 1.442695, %v3700_v34  ;;  %6819 = vmatmul.mubr.msk.bf16.vlgmr.msra.gmra.mxu1 %vm2422_vm4, %v2892_v62  ;;  %v3711_v12 = vsel %vm2422_vm4, %v9451_v3, 0.0  ;;  %v7460_v2 = vpop.eup %7459 }
 0x7a1   : > { %6849 = vmatpush3.bf16.msra.mxu1 %v8772_v20  ;;  %3712 = vadd.xlane.f32.xlu0 %v3711_v12  ;;  %v3080_v35 = vpop.xlane.xlu0 %3079  ;;  %v2889_v7 = vmul.f32 %v7460_v2, %v9286_v61 }
 0x7a2   : > { %7471 = vpow2.f32 %v3709_v39  ;;  %6850 = vmatprep.subr.bf16.mxu1 %v10315_v45  ;;  %6822 = vmatprep.mubr.msk.bf16.mxu1 %vm7834_vm2, %v10315_v45 }
 0x7a3   : > { %v9460_v60 = vpop.eup %7461  ;;  %7473 = vrcp.f32 %v3080_v35 }
 0x7a4   : > { %v7464_v56 = vpop.eup %7463  ;;  %v3714_v41 = vsel %vm2422_vm4, %v9460_v60, 0.0 }
 0x7a5   : > { %6851 = vmatpush3.bf16.msra.mxu1 %v10405_v36  ;;  %v3083_v20 = vpop.xlane.xlu1 %3082  ;;  %3715 = vadd.xlane.f32.xlu1 %v3714_v41  ;;  %v3894_v42 = vpop.xlane.xlu0 %3893  ;;  %v2890_v28 = vmul.f32 %v7464_v56, %v9296_v52  ;;  %v10406_v52 = vld [vmem:[#allocation50_spill] sm:$0xff] }
 0x7a6   : > { %7475 = vrcp.f32 %v3083_v20  ;;  %v3907_v63 = vsub.f32 %v9324_v29, %v3894_v42  ;;  %6852 = vmatprep.subr.bf16.mxu1 %v10315_v45  ;;  %v10408_v9 = vpack.c.bf16 %v10406_v52, %v10407_v50 }
 0x7a7   : > { %v9471_v38 = vpop.eup %7465  ;;  %v2893_v32 = vpack.c.bf16 %v2890_v28, %v2889_v7 }
 0x7a8   : > { %v7468_v55 = vpop.eup %7467  ;;  %v3912_v27 = vmul.f32 1.442695, %v3907_v63  ;;  %v3717_v40 = vsel %vm2422_vm4, %v9471_v38, 0.0 }
 0x7a9   : > { %6823 = vmatmul.mubr.msk.bf16.gmra.mxu1 %vm2422_vm4, %v2893_v32  ;;  %v3897_v18 = vpop.xlane.xlu1 %3896  ;;  %3718 = vadd.xlane.f32.xlu0 %v3717_v40  ;;  %v3086_v61 = vpop.xlane.xlu0 %3085  ;;  %v2891_v33 = vmul.f32 %v7468_v55, %v9306_v54 }
 0x7aa   : > { %7477 = vpow2.f32 %v3912_v27  ;;  %6853 = vmatpush3.bf16.msra.mxu1 %v10408_v9  ;;  %v3908_v29 = vsub.f32 %v9332_v26, %v3897_v18  ;;  %6826 = vmatprep.mubr.msk.bf16.mxu1 %vm7834_vm2, %v10315_v45  ;;  %v10409_v27 = vld [vmem:[#allocation82_spill] sm:$0xff] }
 0x7ab   : > { %v9482_v21 = vpop.eup %7469  ;;  %6884 = vmatprep.subr.bf16.mxu1 %v10315_v45  ;;  %7479 = vrcp.f32 %v3086_v61  ;;  %v2894_v34 = vpack.c.bf16 %v2891_v33, %v2891_v33 }
 0x7ac   : > { %v3914_v49 = vmul.f32 1.442695, %v3908_v29  ;;  %v3720_v51 = vsel %vm2422_vm4, %v9482_v21, 0.0 }
 0x7ad   : > { %v3089_v8 = vpop.xlane.xlu1 %3088  ;;  %3721 = vadd.xlane.f32.xlu1 %v3720_v51  ;;  %v3900_v13 = vpop.xlane.xlu0 %3899 }
 0x7ae   : > { %7481 = vpow2.f32 %v3914_v49  ;;  %v3909_v26 = vsub.f32 %v9343_v25, %v3900_v13 }
 0x7af   : > { %v9489_v62 = vpop.eup %7471  ;;  %7483 = vrcp.f32 %v3089_v8 }
 0x7b0   : > { %v3916_v39 = vmul.f32 1.442695, %v3909_v26  ;;  %v3723_v54 = vsel %vm2435_vm5, %v9489_v62, 0.0  ;;  %v7474_v12 = vpop.eup %7473 }
 0x7b1   : > { %6827 = vmatmul.mubr.msk.bf16.gmra.mxu1 %vm2422_vm4, %v2894_v34  ;;  %v3903_v35 = vpop.xlane.xlu1 %3902  ;;  %3724 = vadd.xlane.f32.xlu0 %v3723_v54  ;;  %v3092_v2 = vpop.xlane.xlu0 %3091  ;;  %v3098_v41 = vmul.f32 %v7474_v12, %v9320_v10 }
 0x7b2   : > { %7485 = vpow2.f32 %v3916_v39  ;;  %v3910_v56 = vsub.f32 %v9354_v15, %v3903_v35  ;;  %6854 = vmatprep.mubr.msk.bf16.mxu1 %vm7834_vm2, %v10315_v45 }
 0x7b3   : > { %v7476_v25 = vpop.eup %7475  ;;  %7487 = vrcp.f32 %v3092_v2 }
 0x7b4   : > { %v3099_v47 = vmul.f32 %v7476_v25, %v9328_v53  ;;  %v3918_v46 = vmul.f32 1.442695, %v3910_v56 }
 0x7b6   : > { %v3103_v36 = vpack.c.bf16 %v3099_v47, %v3098_v41  ;;  %7489 = vpow2.f32 %v3918_v46  ;;  %v10415_v41 = vld [vmem:[#allocation85_spill] sm:$0xff] }
 0x7b7   : > { %v9499_v20 = vpop.eup %7477 }
 0x7b8   : > { %v3922_v42 = vsel %vm2422_vm4, %v9499_v20, 0.0  ;;  %v7480_v7 = vpop.eup %7479 }
 0x7b9   : > { %6855 = vmatmul.mubr.msk.bf16.vlgmr.msra.gmra.mxu1 %vm2422_vm4, %v3103_v36  ;;  %v3291_v15 = vpop.xlane.xlu1 %3290  ;;  %3923 = vadd.xlane.f32.xlu1 %v3922_v42  ;;  %v3100_v32 = vmul.f32 %v7480_v7, %v9339_v22  ;;  %v10412_v22 = vld [vmem:[#allocation83_spill] sm:$0xff] }
 0x7ba   : > { %6885 = vmatpush3.bf16.msra.mxu1 %v8783_v17  ;;  %6858 = vmatprep.mubr.msk.bf16.mxu1 %vm7834_vm2, %v10315_v45  ;;  %7491 = vrcp.f32 %v3291_v15  ;;  %v10410_v17 = vld [vmem:[#allocation81_spill] sm:$0xff] }
 0x7bb   : > { %v9507_v10 = vpop.eup %7481  ;;  %6886 = vmatprep.subr.bf16.mxu1 %v10315_v45  ;;  %v10411_v40 = vpack.c.bf16 %v10409_v27, %v10410_v17 }
 0x7bc   : > { %v7484_v53 = vpop.eup %7483  ;;  %v3925_v28 = vsel %vm2422_vm4, %v9507_v10, 0.0 }
 0x7bd   : > { %3926 = vadd.xlane.f32.xlu0 %v3925_v28  ;;  %v3294_v63 = vpop.xlane.xlu0 %3293  ;;  %v3101_v55 = vmul.f32 %v7484_v53, %v9350_v0  ;;  %v10413_v0 = vld [vmem:[#allocation44_spill] sm:$0xff] }
 0x7be   : > { %6887 = vmatpush3.bf16.msra.mxu1 %v10411_v40  ;;  %7493 = vrcp.f32 %v3294_v63  ;;  %v10414_v29 = vpack.c.bf16 %v10412_v22, %v10413_v0  ;;  %v10420_v22 = vld [vmem:[#allocation87_spill] sm:$0xff] }
 0x7bf   : > { %v9517_v18 = vpop.eup %7485  ;;  %6888 = vmatprep.subr.bf16.mxu1 %v10315_v45  ;;  %v3104_v61 = vpack.c.bf16 %v3101_v55, %v3100_v32 }
 0x7c0   : > { %v7488_v52 = vpop.eup %7487  ;;  %v3928_v50 = vsel %vm2422_vm4, %v9517_v18, 0.0 }
 0x7c1   : > { %6859 = vmatmul.mubr.msk.bf16.gmra.mxu1 %vm2422_vm4, %v3104_v61  ;;  %v3297_v9 = vpop.xlane.xlu1 %3296  ;;  %3929 = vadd.xlane.f32.xlu1 %v3928_v50  ;;  %v3102_v49 = vmul.f32 %v7488_v52, %v9361_v11  ;;  %v10419_v61 = vld [vmem:[#allocation90_spill] sm:$0xff] }
 0x7c2   : > { %6889 = vmatpush3.bf16.msra.mxu1 %v10414_v29  ;;  %6862 = vmatprep.mubr.msk.bf16.mxu1 %vm7834_vm2, %v10315_v45  ;;  %7495 = vrcp.f32 %v3297_v9 }
 0x7c3   : > { %v9528_v33 = vpop.eup %7489  ;;  %6920 = vmatprep.subr.bf16.mxu1 %v10315_v45  ;;  %v3105_v34 = vpack.c.bf16 %v3102_v49, %v3102_v49  ;;  %v10423_v49 = vld [vmem:[#allocation88_spill] sm:$0xff] }
 0x7c4   : > { %v3931_v51 = vsel %vm2422_vm4, %v9528_v33, 0.0 }
 0x7c5   : > { %v3906_v8 = vpop.xlane.xlu1 %3905  ;;  %3932 = vadd.xlane.f32.xlu0 %v3931_v51  ;;  %v3300_v13 = vpop.xlane.xlu0 %3299  ;;  %v10424_v51 = vld [vmem:[#allocation46_spill] sm:$0xff] }
 0x7c6   : > { %v3911_v26 = vsub.f32 %v9382_v57, %v3906_v8  ;;  %7497 = vrcp.f32 %v3300_v13  ;;  %v10425_v8 = vpack.c.bf16 %v10423_v49, %v10424_v51  ;;  %v10431_v51 = vld [vmem:[#allocation54_spill] sm:$0xff] }
 0x7c7   : > { %v7492_v54 = vpop.eup %7491 }
 0x7c8   : > { %v3920_v39 = vmul.f32 1.442695, %v3911_v26  ;;  %v3309_v35 = vmul.f32 %v7492_v54, %v9369_v48 }
 0x7c9   : > { %6863 = vmatmul.mubr.msk.bf16.gmra.mxu1 %vm2422_vm4, %v3105_v34  ;;  %v3303_v12 = vpop.xlane.xlu0 %3302 }
 0x7ca   : > { %7499 = vpow2.f32 %v3920_v39  ;;  %6890 = vmatprep.mubr.msk.bf16.mxu1 %vm7834_vm2, %v10315_v45 }
 0x7cb   : > { %v7494_v11 = vpop.eup %7493  ;;  %7501 = vrcp.f32 %v3303_v12 }
 0x7cc   : > { %v3310_v2 = vmul.f32 %v7494_v11, %v9373_v5  ;;  %v10416_v5 = vpack.c.bf16 %v8787_v43, %v8780_v24 }
 0x7ce   : > { %v3314_v56 = vpack.c.bf16 %v3310_v2, %v3309_v35 }
 0x7cf   : > { %v7496_v25 = vpop.eup %7495 }
 0x7d0   : > { %v3311_v46 = vmul.f32 %v7496_v25, %v9378_v6 }
 0x7d1   : > { %6891 = vmatmul.mubr.msk.bf16.vlgmr.msra.gmra.mxu1 %vm2422_vm4, %v3314_v56  ;;  %v3502_v57 = vpop.xlane.xlu1 %3501 }
 0x7d2   : > { %6921 = vmatpush3.bf16.msra.mxu1 %v10415_v41  ;;  %6894 = vmatprep.mubr.msk.bf16.mxu1 %vm7834_vm2, %v10315_v45  ;;  %7503 = vrcp.f32 %v3502_v57 }
 0x7d3   : > { %v7498_v47 = vpop.eup %7497  ;;  %6922 = vmatprep.subr.bf16.mxu1 %v10315_v45 }
 0x7d4   : > { %v3312_v48 = vmul.f32 %v7498_v47, %v9387_v16  ;;  %v10417_v16 = vld [vmem:[#allocation45_spill] sm:$0xff] }
 0x7d5   : > { %v3505_v36 = vpop.xlane.xlu0 %3504  ;;  %v10418_v28 = vpack.c.bf16 %v8794_v30, %v10417_v16 }
 0x7d6   : > { %6923 = vmatpush3.bf16.msra.mxu1 %v10416_v5  ;;  %7505 = vrcp.f32 %v3505_v36  ;;  %v3315_v42 = vpack.c.bf16 %v3312_v48, %v3311_v46 }
 0x7d7   : > { %v9550_v15 = vpop.eup %7499  ;;  %6924 = vmatprep.subr.bf16.mxu1 %v10315_v45 }
 0x7d8   : > { %v7502_v7 = vpop.eup %7501  ;;  %v3934_v53 = vsel %vm2435_vm5, %v9550_v15, 0.0 }
 0x7d9   : > { %6895 = vmatmul.mubr.msk.bf16.gmra.mxu1 %vm2422_vm4, %v3315_v42  ;;  %v3508_v6 = vpop.xlane.xlu1 %3507  ;;  %3935 = vadd.xlane.f32.xlu1 %v3934_v53  ;;  %v3313_v24 = vmul.f32 %v7502_v7, %v9394_v31 }
 0x7da   : > { %6925 = vmatpush3.bf16.msra.mxu1 %v10418_v28  ;;  %6898 = vmatprep.mubr.msk.bf16.mxu1 %vm7834_vm2, %v10315_v45  ;;  %7507 = vrcp.f32 %v3508_v6 }
 0x7db   : > { %6956 = vmatprep.subr.bf16.mxu1 %v10315_v45  ;;  %v3316_v63 = vpack.c.bf16 %v3313_v24, %v3313_v24 }
 0x7dd   : > { %v3511_v43 = vpop.xlane.xlu0 %3510 }
 0x7de   : > { %7509 = vrcp.f32 %v3511_v43 }
 0x7df   : > { %v7504_v32 = vpop.eup %7503 }
 0x7e0   : > { %v3520_v27 = vmul.f32 %v7504_v32, %v9406_v44  ;;  %v10421_v44 = vld [vmem:[#allocation86_spill] sm:$0xff] }
 0x7e1   : > { %6899 = vmatmul.mubr.msk.bf16.gmra.mxu1 %vm2422_vm4, %v3316_v63  ;;  %v3514_v55 = vpop.xlane.xlu1 %3513  ;;  %v10422_v0 = vpack.c.bf16 %v10420_v22, %v10421_v44 }
 0x7e2   : > { %6926 = vmatprep.mubr.msk.bf16.mxu1 %vm7834_vm2, %v10315_v45  ;;  %7511 = vrcp.f32 %v3514_v55  ;;  %v10428_v55 = vpack.c.bf16 %v8837_v23, %v8446_v14 }
 0x7e3   : > { %v7506_v30 = vpop.eup %7505 }
 0x7e4   : > { %v3521_v17 = vmul.f32 %v7506_v30, %v9414_v19 }
 0x7e6   : > { %v3525_v31 = vpack.c.bf16 %v3521_v17, %v3520_v27 }
 0x7e7   : > { %v7508_v40 = vpop.eup %7507 }
 0x7e8   : > { %v3522_v50 = vmul.f32 %v7508_v40, %v9424_v37 }
 0x7e9   : > { %6927 = vmatmul.mubr.msk.bf16.vlgmr.msra.gmra.mxu1 %vm2422_vm4, %v3525_v31 }
 0x7ea   : > { %6957 = vmatpush3.bf16.msra.mxu1 %v10419_v61  ;;  %6930 = vmatprep.mubr.msk.bf16.mxu1 %vm7834_vm2, %v10315_v45 }
 0x7eb   : > { %v7510_v52 = vpop.eup %7509  ;;  %6958 = vmatprep.subr.bf16.mxu1 %v10315_v45 }
 0x7ec   : > { %v3523_v9 = vmul.f32 %v7510_v52, %v9432_v58 }
 0x7ee   : > { %6959 = vmatpush3.bf16.msra.mxu1 %v10422_v0  ;;  %v3526_v19 = vpack.c.bf16 %v3523_v9, %v3522_v50  ;;  %v10429_v50 = vld [vmem:[#allocation53_spill] sm:$0xff] }
 0x7ef   : > { %6960 = vmatprep.subr.bf16.mxu1 %v10315_v45  ;;  %v7512_v29 = vpop.eup %7511 }
 0x7f0   : > { %v3524_v37 = vmul.f32 %v7512_v29, %v9437_v1 }
 0x7f1   : > { %6931 = vmatmul.mubr.msk.bf16.gmra.mxu1 %vm2422_vm4, %v3526_v19  ;;  %v10430_v19 = vld [vmem:[#allocation52_spill] sm:$0xff] }
 0x7f2   : > { %6961 = vmatpush3.bf16.msra.mxu1 %v10425_v8  ;;  %6934 = vmatprep.mubr.msk.bf16.mxu1 %vm7834_vm2, %v10315_v45  ;;  %v3527_v58 = vpack.c.bf16 %v3524_v37, %v3524_v37 }
 0x7f3   : > { %6992 = vmatprep.subr.bf16.mxu1 %v10315_v45 }
 0x7f9   : > { %6935 = vmatmul.mubr.msk.bf16.gmra.mxu1 %vm2422_vm4, %v3527_v58 }
 0x7fa   : > { %6962 = vmatprep.mubr.msk.bf16.mxu1 %vm7834_vm2, %v10315_v45 }
 0x804   : > { %v9590_v13 = vpop.f32.mrf.mxu1 }
 0x805   : > { %v2744_v9 = vadd.f32 %v9590_v13, %v10429_v50 }
 0x806   : > { %v6784_v26 = vpop.f32.mrf.mxu1 }
 0x807   : > { %v10432_v26 = vld [vmem:[#allocation51_spill] sm:$0xff] }
 0x808   : > { %v9592_v34 = vpop.f32.mrf.mxu1 }
 0x809   : > { %v2747_v29 = vadd.f32 %v9592_v34, %v10430_v19 }
 0x80a   : > { %v6785_v39 = vpop.f32.mrf.mxu1 }
 0x810   : > { %v9594_v54 = vpop.f32.mrf.mxu1 }
 0x811   : > { %v2752_v8 = vadd.f32 %v9594_v54, %v10431_v51 }
 0x812   : > { %v6788_v12 = vpop.f32.mrf.mxu1 }
 0x814   : > { %v9596_v11 = vpop.f32.mrf.mxu1 }
 0x815   : > { %v2755_v39 = vadd.f32 %v9596_v11, %v10432_v26 }
 0x816   : > { %v6789_v1 = vpop.f32.mrf.mxu1 }
 0x818   : > { %v9598_v35 = vpop.f32.mrf.mxu1 }
 0x81a   : > { %v6792_v2 = vpop.f32.mrf.mxu1 }
 0x81c   : > { %v2762_v56 = vpop.f32.mrf.mxu1 }
 0x81e   : > { %v6793_v25 = vpop.f32.mrf.mxu1 }
 0x81f   : > { %v10433_v25 = vld [vmem:[#allocation57_spill] sm:$0xff] }
 0x820   : > { %v2760_v34 = vadd.f32 %v9598_v35, %v10433_v25 }
 0x82a   : > { %v3713_v57 = vpop.xlane.xlu0 %3712 }
 0x82b   : > { %7513 = vrcp.f32 %v3713_v57 }
 0x82e   : > { %v3716_v41 = vpop.xlane.xlu1 %3715 }
 0x82f   : > { %7515 = vrcp.f32 %v3716_v41 }
 0x832   : > { %v3719_v47 = vpop.xlane.xlu0 %3718 }
 0x833   : > { %7517 = vrcp.f32 %v3719_v47 }
 0x836   : > { %v3722_v46 = vpop.xlane.xlu1 %3721 }
 0x837   : > { %7519 = vrcp.f32 %v3722_v46 }
 0x838   : > { %v7514_v48 = vpop.eup %7513 }
 0x839   : > { %v3731_v42 = vmul.f32 %v7514_v48, %v9451_v3 }
 0x83a   : > { %v3725_v36 = vpop.xlane.xlu0 %3724 }
 0x83b   : > { %7521 = vrcp.f32 %v3725_v36  ;;  %v10434_v36 = vmov 0  }
 0x83c   : > { %v7516_v5 = vpop.eup %7515 }
 0x83d   : > { %v3732_v7 = vmul.f32 %v7516_v5, %v9460_v60  ;;  %v10426_v60 = vld [vmem:[#allocation89_spill] sm:$0xff] }
 0x83e   : > { %v10427_v43 = vpack.c.bf16 %v8828_v4, %v10426_v60 }
 0x83f   : > { %v3736_v53 = vpack.c.bf16 %v3732_v7, %v3731_v42 }
 0x840   : > { %v7518_v6 = vpop.eup %7517 }
 0x841   : > { %6963 = vmatmul.mubr.msk.bf16.vlgmr.msra.gmra.mxu1 %vm2422_vm4, %v3736_v53  ;;  %v3733_v24 = vmul.f32 %v7518_v6, %v9471_v38 }
 0x842   : > { %6993 = vmatpush3.bf16.msra.mxu1 %v8842_v59  ;;  %v3924_v16 = vpop.xlane.xlu1 %3923  ;;  %6966 = vmatprep.mubr.msk.bf16.mxu1 %vm7834_vm2, %v10315_v45 }
 0x843   : > { %6994 = vmatprep.subr.bf16.mxu1 %v10315_v45  ;;  %7523 = vrcp.f32 %v3924_v16 }
 0x844   : > { %v7520_v28 = vpop.eup %7519 }
 0x845   : > { %v3734_v3 = vmul.f32 %v7520_v28, %v9482_v21 }
 0x846   : > { %6995 = vmatpush3.bf16.msra.mxu1 %v10427_v43  ;;  %v3927_v63 = vpop.xlane.xlu0 %3926 }
 0x847   : > { %7525 = vrcp.f32 %v3927_v63  ;;  %6996 = vmatprep.subr.bf16.mxu1 %v10315_v45  ;;  %v3737_v59 = vpack.c.bf16 %v3734_v3, %v3733_v24  ;;  %v7275_v24 = vld [vmem:[%s8189_s26 + $0x38] sm:$0xff]   ;;  %v7276_v63 = vld [vmem:[%s8189_s26 + $0x30] sm:$0xff]  }
 0x848   : > { %v7522_v32 = vpop.eup %7521  ;;  %7011 = vmatpush3.bf16.msra.mxu0 %v7275_v24 }
 0x849   : > { %6967 = vmatmul.mubr.msk.bf16.gmra.mxu1 %vm2422_vm4, %v3737_v59  ;;  %v3735_v38 = vmul.f32 %v7522_v32, %v9489_v62  ;;  %7012 = vmatprep.subr.bf16.mxu0 %v10315_v45 }
 0x84a   : > { %6997 = vmatpush3.bf16.msra.mxu1 %v10428_v55  ;;  %v3930_v30 = vpop.xlane.xlu1 %3929  ;;  %6970 = vmatprep.mubr.msk.bf16.mxu1 %vm7834_vm2, %v10315_v45 }
 0x84b   : > { %7527 = vrcp.f32 %v3930_v30  ;;  %v3738_v21 = vpack.c.bf16 %v3735_v38, %v3735_v38  ;;  %v7277_v30 = vld [vmem:[%s8189_s26 + $0x28] sm:$0xff]  }
 0x84c   : > { %7013 = vmatpush3.bf16.msra.mxu0 %v7276_v63 }
 0x84d   : > { %7014 = vmatprep.subr.bf16.mxu0 %v10315_v45 }
 0x84e   : > { %v3933_v4 = vpop.xlane.xlu0 %3932 }
 0x84f   : > { %7529 = vrcp.f32 %v3933_v4 }
 0x850   : > { %v7524_v27 = vpop.eup %7523  ;;  %7015 = vmatpush3.bf16.msra.mxu0 %v7277_v30 }
 0x851   : > { %6971 = vmatmul.mubr.msk.bf16.gmra.mxu1 %vm2422_vm4, %v3738_v21  ;;  %v3942_v14 = vmul.f32 %v7524_v27, %v9499_v20  ;;  %7016 = vmatprep.subr.bf16.mxu0 %v10315_v45  ;;  %v7278_v21 = vld [vmem:[%s8189_s26 + $0x20] sm:$0xff]  }
 0x852   : > { %6998 = vmatprep.mubr.msk.bf16.mxu1 %vm7834_vm2, %v10315_v45 }
 0x854   : > { %v7526_v17 = vpop.eup %7525  ;;  %7017 = vmatpush3.bf16.msra.mxu0 %v7278_v21 }
 0x855   : > { %v3943_v23 = vmul.f32 %v7526_v17, %v9507_v10  ;;  %7018 = vmatprep.subr.bf16.mxu0 %v10315_v45 }
 0x857   : > { %v3947_v31 = vpack.c.bf16 %v3943_v23, %v3942_v14  ;;  %v7279_v23 = vld [vmem:[%s8189_s26 + $0x18] sm:$0xff]  }
 0x858   : > { %v7528_v40 = vpop.eup %7527  ;;  %7019 = vmatpush3.bf16.msra.mxu0 %v7279_v23 }
 0x859   : > { %6999 = vmatmul.mubr.msk.bf16.vlgmr.msra.gmra.mxu1 %vm2422_vm4, %v3947_v31  ;;  %v3944_v61 = vmul.f32 %v7528_v40, %v9517_v18  ;;  %7020 = vmatprep.subr.bf16.mxu0 %v10315_v45 }
 0x85a   : > { %7002 = vmatprep.mubr.msk.bf16.mxu1 %vm7834_vm2, %v10315_v45 }
 0x85c   : > { %v7530_v62 = vpop.eup %7529 }
 0x85d   : > { %v3945_v52 = vmul.f32 %v7530_v62, %v9528_v33 }
 0x85f   : > { %v3948_v22 = vpack.c.bf16 %v3945_v52, %v3944_v61  ;;  %v7280_v61 = vld [vmem:[%s8189_s26 + $0x10] sm:$0xff]  }
 0x860   : > { %v2949_v44 = vpop.f32.mrf.mxu1  ;;  %7021 = vmatpush3.bf16.msra.mxu0 %v7280_v61 }
 0x861   : > { %v2971_v20 = vadd.f32 %v2949_v44, %v2744_v9  ;;  %7003 = vmatmul.mubr.msk.bf16.gmra.mxu1 %vm2422_vm4, %v3948_v22  ;;  %7022 = vmatprep.subr.bf16.mxu0 %v10315_v45  ;;  %v7281_v22 = vld [vmem:[%s8189_s26 + $0x8] sm:$0xff]  }
 0x862   : > { %v3936_v10 = vpop.xlane.xlu1 %3935  ;;  %v6820_v0 = vpop.f32.mrf.mxu1  ;;  %7006 = vmatprep.mubr.msk.bf16.mxu1 %vm7834_vm2, %v10315_v45 }
 0x863   : > { %7531 = vrcp.f32 %v3936_v10  ;;  %v7282_v0 = vld [vmem:[%s8189_s26] sm:$0xff]   ;;  %s10446_s26 = sld [smem:[#allocation29_spill]] (!%p6384_p9) }
 0x864   : > { %v2952_v18 = vpop.f32.mrf.mxu1  ;;  %7023 = vmatpush3.bf16.msra.mxu0 %v7281_v22 }
 0x865   : > { %v2972_v49 = vadd.f32 %v2952_v18, %v2747_v29  ;;  %7024 = vmatprep.subr.bf16.mxu0 %v10315_v45 }
 0x866   : > { %v6821_v33 = vpop.f32.mrf.mxu1 }
 0x868   : > { %7025 = vmatpush3.bf16.msra.mxu0 %v7282_v0 }
 0x869   : > { %v2957_v37 = vpop.f32.mrf.mxu1 }
 0x86a   : > { %v2973_v58 = vadd.f32 %v2957_v37, %v2752_v8 }
 0x86b   : > { %v6824_v13 = vpop.f32.mrf.mxu1 }
 0x86d   : > { %v2960_v12 = vpop.f32.mrf.mxu1 }
 0x86e   : > { %v2974_v1 = vadd.f32 %v2960_v12, %v2755_v39 }
 0x86f   : > { %v6825_v2 = vpop.f32.mrf.mxu1 }
 0x870   : > { %v7532_v56 = vpop.eup %7531 }
 0x871   : > { %v2965_v57 = vpop.f32.mrf.mxu1  ;;  %v3946_v41 = vmul.f32 %v7532_v56, %v9550_v15 }
 0x872   : > { %v2975_v47 = vadd.f32 %v2965_v57, %v2760_v34 }
 0x873   : > { %v6828_v46 = vpop.f32.mrf.mxu1  ;;  %v3949_v54 = vpack.c.bf16 %v3946_v41, %v3946_v41 }
 0x875   : > { %v2968_v48 = vpop.f32.mrf.mxu1  ;;  %7007 = vmatmul.mubr.msk.bf16.gmra.mxu1 %vm2422_vm4, %v3949_v54 }
 0x876   : > { %4506 = vmatprep.mubr.bf16.mxu1 %v10434_v36 }
 0x877   : > { %v6829_v11 = vpop.f32.mrf.mxu1 }
 0x879   : > { %v3160_v5 = vpop.f32.mrf.mxu1 }
 0x87a   : > { %v3182_v42 = vadd.f32 %v3160_v5, %v2971_v20 }
 0x87b   : > { %v6856_v7 = vpop.f32.mrf.mxu1 }
 0x87d   : > { %v3163_v53 = vpop.f32.mrf.mxu1 }
 0x87e   : > { %v3183_v6 = vadd.f32 %v3163_v53, %v2972_v49 }
 0x87f   : > { %v6857_v35 = vpop.f32.mrf.mxu1 }
 0x881   : > { %v3168_v16 = vpop.f32.mrf.mxu1 }
 0x882   : > { %v3184_v15 = vadd.f32 %v3168_v16, %v2973_v58 }
 0x883   : > { %v6860_v28 = vpop.f32.mrf.mxu1 }
 0x885   : > { %v3171_v3 = vpop.f32.mrf.mxu1 }
 0x886   : > { %v3185_v60 = vadd.f32 %v3171_v3, %v2974_v1 }
 0x887   : > { %v6861_v43 = vpop.f32.mrf.mxu1 }
 0x889   : > { %v3176_v59 = vpop.f32.mrf.mxu1 }
 0x88a   : > { %v3186_v32 = vadd.f32 %v3176_v59, %v2975_v47 }
 0x88b   : > { %v6864_v55 = vpop.f32.mrf.mxu1 }
 0x88d   : > { %v3179_v38 = vpop.f32.mrf.mxu1 }
 0x88f   : > { %v6865_v4 = vpop.f32.mrf.mxu1 }
 0x891   : > { %v3371_v27 = vpop.f32.mrf.mxu1 }
 0x892   : > { %v3393_v17 = vadd.f32 %v3371_v27, %v3182_v42 }
 0x893   : > { %v6892_v14 = vpop.f32.mrf.mxu1 }
 0x895   : > { %v3374_v31 = vpop.f32.mrf.mxu1 }
 0x896   : > { %v3394_v40 = vadd.f32 %v3374_v31, %v3183_v6 }
 0x897   : > { %v6893_v62 = vpop.f32.mrf.mxu1 }
 0x899   : > { %v3379_v52 = vpop.f32.mrf.mxu1 }
 0x89a   : > { %v3395_v50 = vadd.f32 %v3379_v52, %v3184_v15 }
 0x89b   : > { %v6896_v9 = vpop.f32.mrf.mxu1 }
 0x89d   : > { %v3382_v44 = vpop.f32.mrf.mxu1 }
 0x89e   : > { %v3396_v20 = vadd.f32 %v3382_v44, %v3185_v60 }
 0x89f   : > { %v6897_v10 = vpop.f32.mrf.mxu1 }
 0x8a1   : > { %v3387_v19 = vpop.f32.mrf.mxu1 }
 0x8a2   : > { %v3397_v29 = vadd.f32 %v3387_v19, %v3186_v32 }
 0x8a3   : > { %v6900_v18 = vpop.f32.mrf.mxu1 }
 0x8a5   : > { %v3390_v49 = vpop.f32.mrf.mxu1 }
 0x8a7   : > { %v6901_v33 = vpop.f32.mrf.mxu1 }
 0x8a9   : > { %v3582_v51 = vpop.f32.mrf.mxu1 }
 0x8aa   : > { %v3604_v8 = vadd.f32 %v3582_v51, %v3393_v17  ;;  %v7584_v51 = vld [vmem:[#allocation2] sm:$0xff] }
 0x8ab   : > { %v6928_v37 = vpop.f32.mrf.mxu1 }
 0x8ad   : > { %v3585_v58 = vpop.f32.mrf.mxu1 }
 0x8ae   : > { %v3605_v13 = vadd.f32 %v3585_v58, %v3394_v40 }
 0x8af   : > { %v6929_v26 = vpop.f32.mrf.mxu1 }
 0x8b1   : > { %v3590_v39 = vpop.f32.mrf.mxu1 }
 0x8b2   : > { %v3606_v12 = vadd.f32 %v3590_v39, %v3395_v50  ;;  %v7585_v39 = vld [vmem:[#allocation2 + $0x20] sm:$0xff] }
 0x8b3   : > { %v6932_v1 = vpop.f32.mrf.mxu1 }
 0x8b5   : > { %v3593_v2 = vpop.f32.mrf.mxu1 }
 0x8b6   : > { %v3607_v56 = vadd.f32 %v3593_v2, %v3396_v20  ;;  %v6308_v20 = vld [vmem:[%s1308_s7] ss:$0 sm:$0xff]  ;;  %s10447_s7 = sld [smem:[#allocation27_spill]] (!%p6384_p9) }
 0x8b7   : > { %v6933_v25 = vpop.f32.mrf.mxu1 }
 0x8b9   : > { %v3598_v34 = vpop.f32.mrf.mxu1 }
 0x8ba   : > { %v3608_v57 = vadd.f32 %v3598_v34, %v3397_v29  ;;  %v7583_v29 = vld [vmem:[#allocation2 + $0x8] sm:$0xff]  ;;  %v7586_v34 = vld [vmem:[#allocation2 + $0x10] sm:$0xff] }
 0x8bb   : > { %v6936_v41 = vpop.f32.mrf.mxu1 }
 0x8bd   : > { %v3601_v47 = vpop.f32.mrf.mxu1 }
 0x8bf   : > { %v6937_v46 = vpop.f32.mrf.mxu1 }
 0x901   : > { %v3793_v54 = vpop.f32.mrf.mxu1 }
 0x902   : > { %v3815_v60 = vadd.f32 %v3793_v54, %v3604_v8 }
 0x903   : > { %v6964_v48 = vpop.f32.mrf.mxu1 }
 0x905   : > { %v3796_v11 = vpop.f32.mrf.mxu1 }
 0x906   : > { %v3816_v43 = vadd.f32 %v3796_v11, %v3605_v13  ;;  %v7587_v11 = vld [vmem:[#allocation2 + $0x18] sm:$0x3] }
 0x907   : > { %v6965_v5 = vpop.f32.mrf.mxu1 }
 0x909   : > { %v3801_v42 = vpop.f32.mrf.mxu1 }
 0x90a   : > { %v3817_v21 = vadd.f32 %v3801_v42, %v3606_v12 }
 0x90b   : > { %v6968_v7 = vpop.f32.mrf.mxu1 }
 0x90d   : > { %v3804_v53 = vpop.f32.mrf.mxu1 }
 0x90e   : > { %v3818_v27 = vadd.f32 %v3804_v53, %v3607_v56 }
 0x90f   : > { %v6969_v6 = vpop.f32.mrf.mxu1 }
 0x911   : > { %v3809_v35 = vpop.f32.mrf.mxu1 }
 0x912   : > { %v3819_v62 = vadd.f32 %v3809_v35, %v3608_v57 }
 0x913   : > { %v6972_v16 = vpop.f32.mrf.mxu1 }
 0x914   : > { %v7283_v16 = vld [vmem:[%s8171_s23 + $0xe0] ss:$16 sps:$4 sm:$0xff]  }
 0x915   : > { %v3812_v15 = vpop.f32.mrf.mxu1 }
 0x916   : > { %v7285_v15 = vld [vmem:[%s8171_s23 + $0xe4] ss:$16 sps:$4 sm:$0xff]  }
 0x917   : > { %v6973_v28 = vpop.f32.mrf.mxu1  ;;  %4474 = vmatprep.subr.bf16.mxu1 %v7285_v15 }
 0x918   : > { %v7286_v28 = vld [vmem:[%s8171_s23 + $0xe8] ss:$16 sps:$4 sm:$0xff]   ;;  %4475 = vmatpush1.bf16.msra.mxu1 %v7283_v16 }
 0x919   : > { %v4004_v24 = vpop.f32.mrf.mxu1 }
 0x91a   : > { %v4026_v59 = vadd.f32 %v4004_v24, %v3815_v60  ;;  %v7288_v24 = vld [vmem:[%s8171_s23 + $0xec] ss:$16 sps:$4 sm:$0xff]   ;;  %v7291_v60 = vld [vmem:[%s8171_s23 + $0xc4] ss:$16 sps:$4 sm:$0xff]  }
 0x91b   : > { %v7000_v3 = vpop.f32.mrf.mxu1  ;;  %4535 = vmatprep.subr.bf16.mxu0 %v7288_v24  ;;  %4476 = vmatprep.subr.bf16.mxu1 %v7291_v60 }
 0x91c   : > { %v7289_v3 = vld [vmem:[%s8171_s23 + $0xc0] ss:$16 sps:$4 sm:$0xff]  }
 0x91d   : > { %v4007_v63 = vpop.f32.mrf.mxu1  ;;  %4477 = vmatpush1.bf16.msra.mxu1 %v7289_v3 }
 0x91e   : > { %v4027_v32 = vadd.f32 %v4007_v63, %v3816_v43  ;;  %v7292_v43 = vld [vmem:[%s8171_s23 + $0xc8] ss:$16 sps:$4 sm:$0xff]   ;;  %v7294_v63 = vld [vmem:[%s8171_s23 + $0xcc] ss:$16 sps:$4 sm:$0xff]  }
 0x91f   : > { %v7001_v55 = vpop.f32.mrf.mxu1 }
 0x920   : > { %v4031_v30 = vpack.c.bf16 %v4027_v32, %v4026_v59  ;;  %v7297_v59 = vld [vmem:[%s8171_s23 + $0xa4] ss:$16 sps:$4 sm:$0xff]   ;;  %v7300_v32 = vld [vmem:[%s8171_s23 + $0xac] ss:$16 sps:$4 sm:$0xff]   ;;  %v7295_v55 = vld [vmem:[%s8171_s23 + $0xa0] ss:$16 sps:$4 sm:$0xff]  }
 0x921   : > { %v4012_v38 = vpop.f32.mrf.mxu1  ;;  %4478 = vmatprep.subr.bf16.mxu1 %v7297_v59 }
 0x922   : > { %7027 = vmatmul.mubr.bf16.vlgmr.msra.gmra.mxu0 %v4031_v30  ;;  %v4028_v14 = vadd.f32 %v4012_v38, %v3817_v21  ;;  %v7298_v30 = vld [vmem:[%s8171_s23 + $0xa8] ss:$16 sps:$4 sm:$0xff]   ;;  %v7303_v38 = vld [vmem:[%s8171_s23 + $0x84] ss:$16 sps:$4 sm:$0xff]   ;;  %4479 = vmatpush1.bf16.msra.mxu1 %v7295_v55  ;;  %v7301_v21 = vld [vmem:[%s8171_s23 + $0x80] ss:$16 sps:$4 sm:$0xff]  }
 0x923   : > { %v7004_v4 = vpop.f32.mrf.mxu1  ;;  %7030 = vmatprep.mubr.msk.bf16.mxu0 %vm7834_vm2, %v10315_v45  ;;  %4536 = vmatpush1.bf16.msra.mxu0 %v7286_v28 }
 0x924   : > { %4537 = vmatprep.subr.bf16.mxu0 %v7294_v63  ;;  %v7306_v4 = vld [vmem:[%s8171_s23 + $0x8c] ss:$16 sps:$4 sm:$0xff]   ;;  %4480 = vmatprep.subr.bf16.mxu1 %v7303_v38 }
 0x925   : > { %v4015_v17 = vpop.f32.mrf.mxu1 }
 0x926   : > { %v4029_v23 = vadd.f32 %v4015_v17, %v3818_v27  ;;  %v7304_v27 = vld [vmem:[%s8171_s23 + $0x88] ss:$16 sps:$4 sm:$0xff]   ;;  %v7309_v17 = vld [vmem:[%s8171_s23 + $0x64] ss:$16 sps:$4 sm:$0xff]   ;;  %4481 = vmatpush1.bf16.msra.mxu1 %v7301_v21 }
 0x927   : > { %v7005_v31 = vpop.f32.mrf.mxu1  ;;  %4538 = vmatpush1.bf16.msra.mxu0 %v7292_v43  ;;  %4482 = vmatprep.subr.bf16.mxu1 %v7309_v17  ;;  %v6317_v43 = vld [vmem:[%s1311_s29] ss:$0 sm:$0xff]  ;;  %s10448_s29 = sld [smem:[#allocation28_spill]] (!%p6384_p9) }
 0x928   : > { %v4032_v40 = vpack.c.bf16 %v4029_v23, %v4028_v14  ;;  %4539 = vmatprep.subr.bf16.mxu0 %v7300_v32  ;;  %v7312_v14 = vld [vmem:[%s8171_s23 + $0x6c] ss:$16 sps:$4 sm:$0xff]   ;;  %v7307_v23 = vld [vmem:[%s8171_s23 + $0x60] ss:$16 sps:$4 sm:$0xff]   ;;  %v7310_v31 = vld [vmem:[%s8171_s23 + $0x68] ss:$16 sps:$4 sm:$0xff]  }
 0x929   : > { %v6318_v17 = vld [vmem:[%s1314_s16] ss:$0 sm:$0xff]  ;;  %s10449_s16 = sld [smem:[#allocation31_spill]] (!%p6384_p9) }
 0x92a   : > { %7031 = vmatmul.mubr.bf16.gmra.mxu0 %v4032_v40  ;;  %v7315_v40 = vld [vmem:[%s8171_s23 + $0x44] ss:$16 sps:$4 sm:$0xff]   ;;  %4483 = vmatpush1.bf16.msra.mxu1 %v7307_v23 }
 0x92b   : > { %7034 = vmatprep.mubr.msk.bf16.mxu0 %vm7834_vm2, %v10315_v45  ;;  %4540 = vmatpush1.bf16.msra.mxu0 %v7298_v30 }
 0x92c   : > { %4541 = vmatprep.subr.bf16.mxu0 %v7306_v4  ;;  %4484 = vmatprep.subr.bf16.mxu1 %v7315_v40 }
 0x92f   : > { %4542 = vmatpush1.bf16.msra.mxu0 %v7304_v27 }
 0x930   : > { %4543 = vmatprep.subr.bf16.mxu0 %v7312_v14 }
 0x933   : > { %4544 = vmatpush1.bf16.msra.mxu0 %v7310_v31 }
 0x935   : > { %v4020_v61 = vpop.f32.mrf.mxu1 }
 0x936   : > { %v4030_v52 = vadd.f32 %v4020_v61, %v3819_v62  ;;  %v7318_v62 = vld [vmem:[%s8171_s23 + $0x4c] ss:$16 sps:$4 sm:$0xff]   ;;  %v7313_v61 = vld [vmem:[%s8171_s23 + $0x40] ss:$16 sps:$4 sm:$0xff]  }
 0x937   : > { %v7008_v50 = vpop.f32.mrf.mxu1  ;;  %4545 = vmatprep.subr.bf16.mxu0 %v7318_v62  ;;  %4485 = vmatpush1.bf16.msra.mxu1 %v7313_v61 }
 0x938   : > { %v4033_v9 = vpack.c.bf16 %v4030_v52, %v4030_v52  ;;  %v7316_v52 = vld [vmem:[%s8171_s23 + $0x48] ss:$16 sps:$4 sm:$0xff]   ;;  %v7321_v50 = vld [vmem:[%s8171_s23 + $0x24] ss:$16 sps:$4 sm:$0xff]  }
 0x939   : > { %v4023_v22 = vpop.f32.mrf.mxu1  ;;  %4546 = vmatpush1.bf16.msra.mxu0 %v7316_v52  ;;  %4486 = vmatprep.subr.bf16.mxu1 %v7321_v50 }
 0x93a   : > { %7035 = vmatmul.mubr.bf16.gmra.mxu0 %v4033_v9  ;;  %v7324_v9 = vld [vmem:[%s8171_s23 + $0x2c] ss:$16 sps:$4 sm:$0xff]   ;;  %v7319_v22 = vld [vmem:[%s8171_s23 + $0x20] ss:$16 sps:$4 sm:$0xff]  }
 0x93b   : > { %v7009_v44 = vpop.f32.mrf.mxu1  ;;  %4567 = vmatprep.mubr.bf16.mxu0 %v10434_v36  ;;  %4547 = vmatprep.subr.bf16.mxu0 %v7324_v9 }
 0x93c   : > { %v7322_v44 = vld [vmem:[%s8171_s23 + $0x28] ss:$16 sps:$4 sm:$0xff]   ;;  %4487 = vmatpush1.bf16.msra.mxu1 %v7319_v22 }
 0x93d   : > { %4548 = vmatpush1.bf16.msra.mxu0 %v7322_v44 }
 0x9e2   : > { %v4139_v10 = vpop.f32.mrf.mxu0 }
 0x9e3   : > { %v4140_v0 = vadd.f32 %v6308_v20, %v4139_v10  ;;  %v7330_v10 = vld [vmem:[%s8171_s23 + $0xc] ss:$16 sps:$4 sm:$0xff]  }
 0x9e4   : > { %v7028_v19 = vpop.f32.mrf.mxu0  ;;  %4549 = vmatprep.subr.bf16.mxu0 %v7330_v10 }
 0x9e5   : > { %v9669_v18 = vadd.f32 %v7583_v29, %v4140_v0  ;;  %v7325_v0 = vld [vmem:[%s8171_s23] ss:$16 sps:$4 sm:$0xff]   ;;  %v7328_v19 = vld [vmem:[%s8171_s23 + $0x8] ss:$16 sps:$4 sm:$0xff]  }
 0x9e6   : > { %v4142_v49 = vpop.f32.mrf.mxu0  ;;  %4550 = vmatpush1.bf16.msra.mxu0 %v7328_v19 }
 0x9e7   : > { %v4143_v45 = vadd.f32 %v6308_v20, %v4142_v49  ;;  %4168 = vadd.xlane.f32.xlu0 %v9669_v18  ;;  %v4184_v37 = vmul.f32 %v9669_v18, %v9669_v18 }
 0x9e8   : > { %v7029_v33 = vpop.f32.mrf.mxu0 }
 0x9e9   : > { %v9672_v8 = vadd.f32 %v7584_v51, %v4143_v45 }
 0x9ea   : > { %v4147_v58 = vpop.f32.mrf.mxu0 }
 0x9eb   : > { %v4148_v13 = vadd.f32 %v6308_v20, %v4147_v58  ;;  %4189 = vadd.xlane.f32.xlu0 %v4184_v37  ;;  %4170 = vadd.xlane.f32.xlu1 %v9672_v8  ;;  %v4185_v1 = vmul.f32 %v9672_v8, %v9672_v8 }
 0x9ec   : > { %v7032_v26 = vpop.f32.mrf.mxu0 }
 0x9ed   : > { %v9677_v12 = vadd.f32 %v7585_v39, %v4148_v13 }
 0x9ee   : > { %v4150_v2 = vpop.f32.mrf.mxu0 }
 0x9ef   : > { %v4151_v56 = vadd.f32 %v6308_v20, %v4150_v2  ;;  %4191 = vadd.xlane.f32.xlu1 %v4185_v1  ;;  %4172 = vadd.xlane.f32.xlu0 %v9677_v12  ;;  %v4186_v41 = vmul.f32 %v9677_v12, %v9677_v12 }
 0x9f0   : > { %v7033_v25 = vpop.f32.mrf.mxu0 }
 0x9f1   : > { %v9682_v57 = vadd.f32 %v7586_v34, %v4151_v56 }
 0x9f3   : > { %4193 = vadd.xlane.f32.xlu0 %v4186_v41  ;;  %4174 = vadd.xlane.f32.xlu1 %v9682_v57  ;;  %v4187_v47 = vmul.f32 %v9682_v57, %v9682_v57 }
 0x9f7   : > { %4195 = vadd.xlane.f32.xlu1 %v4187_v47 }
 0x9fa   : > { %v4155_v46 = vpop.f32.mrf.mxu0 }
 0x9fb   : > { %v4156_v54 = vadd.f32 %v6308_v20, %v4155_v46  ;;  %v7327_v20 = vld [vmem:[%s8171_s23 + $0x4] ss:$16 sps:$4 sm:$0xff]   ;;  %s10444_s23 = sld [smem:[#allocation12_spill]] (!%p6384_p9) }
 0x9fc   : > { %v7036_v48 = vpop.f32.mrf.mxu0  ;;  %4488 = vmatprep.subr.bf16.mxu1 %v7327_v20 }
 0x9fd   : > { %v9689_v5 = vadd.f32 %v7587_v11, %v4156_v54  ;;  %4489 = vmatpush1.bf16.msra.mxu1 %v7325_v0 }
 0x9fe   : > { %v4158_v42 = vpop.f32.mrf.mxu0 }
 0x9ff   : > { %v4176_v7 = vsel %vm1771_vm1, %v9689_v5, 0.0  ;;  %v4188_v53 = vmul.f32 %v9689_v5, %v9689_v5 }
 0xa00   : > { %4177 = vadd.xlane.f32.xlu0 %v4176_v7  ;;  %v7037_v6 = vpop.f32.mrf.mxu0 }
 0xa01   : > { %v4197_v35 = vsel %vm1771_vm1, %v4188_v53, 0.0 }
 0xa02   : > { %4198 = vadd.xlane.f32.xlu1 %v4197_v35 }
 0xa70   : > { %v4169_v29 = vpop.xlane.xlu0 %4168 }
 0xa71   : > { %v4179_v49 = vmul.f32 0.0078125, %v4169_v29 }
 0xa73   : > { %v4205_v51 = vmul.f32 %v4179_v49, %v4179_v49  ;;  %v4215_v28 = vsub.f32 %v9669_v18, %v4179_v49 }
 0xa74   : > { %v4190_v45 = vpop.xlane.xlu0 %4189  ;;  %v4171_v33 = vpop.xlane.xlu1 %4170 }
 0xa75   : > { %v4200_v37 = vmul.f32 0.0078125, %v4190_v45  ;;  %v4180_v58 = vmul.f32 0.0078125, %v4171_v33 }
 0xa77   : > { %v4210_v13 = vsub.f32 %v4200_v37, %v4205_v51  ;;  %v4206_v2 = vmul.f32 %v4180_v58, %v4180_v58  ;;  %v4216_v59 = vsub.f32 %v9672_v8, %v4180_v58 }
 0xa78   : > { %v4192_v26 = vpop.xlane.xlu1 %4191  ;;  %v4173_v39 = vpop.xlane.xlu0 %4172 }
 0xa79   : > { %v4220_v1 = vadd.f32 1e-05, %v4210_v13  ;;  %v4201_v56 = vmul.f32 0.0078125, %v4192_v26  ;;  %v4181_v25 = vmul.f32 0.0078125, %v4173_v39  ;;  %v7331_v13 = vld [vmem:[%s8209_s10 + $0x78] sm:$0xff]  }
 0xa7a   : > { %v7332_v26 = vld [vmem:[%s8209_s10 + $0xf8] sm:$0xff]   ;;  %6587 = vmatprep.subr.bf16.mxu1 %v7331_v13 }
 0xa7b   : > { %7533 = vrsqrt.f32 %v4220_v1  ;;  %v4211_v34 = vsub.f32 %v4201_v56, %v4206_v2  ;;  %v4207_v54 = vmul.f32 %v4181_v25, %v4181_v25  ;;  %v4217_v23 = vsub.f32 %v9677_v12, %v4181_v25  ;;  %v7333_v39 = vld [vmem:[%s8209_s10 + $0x38] sm:$0xff]   ;;  %6621 = vmatprep.subr.bf16.mxu0 %v7332_v26  ;;  %v7336_v2 = vld [vmem:[%s8209_s10 + $0xf0] sm:$0xff]  }
 0xa7c   : > { %v4194_v41 = vpop.xlane.xlu0 %4193  ;;  %v4175_v47 = vpop.xlane.xlu1 %4174  ;;  %v7334_v1 = vld [vmem:[%s8209_s10 + $0xb8] sm:$0xff]   ;;  %v7337_v56 = vld [vmem:[%s8209_s10 + $0x30] sm:$0xff]  }
 0xa7d   : > { %v4221_v46 = vadd.f32 1e-05, %v4211_v34  ;;  %v4202_v48 = vmul.f32 0.0078125, %v4194_v41  ;;  %v4182_v11 = vmul.f32 0.0078125, %v4175_v47  ;;  %v7338_v25 = vld [vmem:[%s8209_s10 + $0xb0] sm:$0xff]   ;;  %v7339_v34 = vld [vmem:[%s8209_s10 + $0x68] sm:$0xff]  }
 0xa7e   : > { %v7340_v41 = vld [vmem:[%s8209_s10 + $0xe8] sm:$0xff]  }
 0xa7f   : > { %7535 = vrsqrt.f32 %v4221_v46  ;;  %v4212_v42 = vsub.f32 %v4202_v48, %v4207_v54  ;;  %v4208_v6 = vmul.f32 %v4182_v11, %v4182_v11  ;;  %v4218_v50 = vsub.f32 %v9682_v57, %v4182_v11  ;;  %v7341_v47 = vld [vmem:[%s8209_s10 + $0x28] sm:$0xff]   ;;  %v7343_v54 = vld [vmem:[%s8209_s10 + $0x60] sm:$0xff]  }
 0xa80   : > { %v4196_v7 = vpop.xlane.xlu1 %4195  ;;  %v7342_v46 = vld [vmem:[%s8209_s10 + $0xa8] sm:$0xff]   ;;  %v7344_v48 = vld [vmem:[%s8209_s10 + $0xe0] sm:$0xff]  }
 0xa81   : > { %v4222_v53 = vadd.f32 1e-05, %v4212_v42  ;;  %v4203_v35 = vmul.f32 0.0078125, %v4196_v7  ;;  %v7345_v11 = vld [vmem:[%s8209_s10 + $0x20] sm:$0xff]   ;;  %v7347_v7 = vld [vmem:[%s8209_s10 + $0x58] sm:$0xff]  }
 0xa82   : > { %v7346_v42 = vld [vmem:[%s8209_s10 + $0xa0] sm:$0xff]  }
 0xa83   : > { %7537 = vrsqrt.f32 %v4222_v53  ;;  %v4213_v16 = vsub.f32 %v4203_v35, %v4208_v6  ;;  %v7348_v53 = vld [vmem:[%s8209_s10 + $0xd8] sm:$0xff]  }
 0xa84   : > { %v7349_v6 = vld [vmem:[%s8209_s10 + $0x18] sm:$0xff]  }
 0xa85   : > { %v4223_v15 = vadd.f32 1e-05, %v4213_v16  ;;  %v7350_v35 = vld [vmem:[%s8209_s10 + $0x98] sm:$0xff]   ;;  %v7351_v16 = vld [vmem:[%s8209_s10 + $0x50] sm:$0xff]  }
 0xa87   : > { %7539 = vrsqrt.f32 %v4223_v15  ;;  %v7352_v15 = vld [vmem:[%s8209_s10 + $0xd0] sm:$0xff]  }
 0xa88   : > { %v7534_v24 = vpop.eup %7533 }
 0xa89   : > { %v4230_v3 = vmul.f32 %v7534_v24, %v4215_v28  ;;  %v4178_v60 = vpop.xlane.xlu0 %4177  ;;  %v7353_v28 = vld [vmem:[%s8209_s10 + $0x10] sm:$0xff]  }
 0xa8a   : > { %v4183_v63 = vmul.f32 0.0078125, %v4178_v60  ;;  %v7354_v24 = vld [vmem:[%s8209_s10 + $0x90] sm:$0xff]   ;;  %v7356_v60 = vld [vmem:[%s8209_s10 + $0xc8] sm:$0xff]  }
 0xa8b   : > { %v4199_v32 = vpop.xlane.xlu1 %4198  ;;  %v4241_v4 = vmul.f32 %v6317_v43, %v4230_v3  ;;  %v7355_v3 = vld [vmem:[%s8209_s10 + $0x48] sm:$0xff]  }
 0xa8c   : > { %v7536_v55 = vpop.eup %7535  ;;  %v4209_v30 = vmul.f32 %v4183_v63, %v4183_v63  ;;  %v4204_v38 = vmul.f32 0.0078125, %v4199_v32  ;;  %v4219_v49 = vsub.f32 %v9689_v5, %v4183_v63  ;;  %v7358_v63 = vld [vmem:[%s8209_s10 + $0x88] sm:$0xff]   ;;  %v7360_v32 = vld [vmem:[%s8209_s10 + $0xc0] sm:$0xff]  }
 0xa8d   : > { %v4231_v21 = vmul.f32 %v7536_v55, %v4216_v59  ;;  %v4252_v62 = vadd.f32 %v6318_v17, %v4241_v4  ;;  %v7359_v59 = vld [vmem:[%s8209_s10 + $0x40] sm:$0xff]   ;;  %v10435_v4 = vld [vmem:[#allocation40_spill] sm:$0xff] }
 0xa8e   : > { %v4214_v27 = vsub.f32 %v4204_v38, %v4209_v30  ;;  %v7361_v55 = vld [vmem:[%s8209_s10] sm:$0xff]   ;;  %v4292_v38 = vld [vmem:[%s8205_s3] sm:$0xf]  ;;  %s10441_s3 = sld [smem:[#allocation24_spill]] (!%p6384_p9) }
 0xa8f   : > { %v4242_v14 = vmul.f32 %v6317_v43, %v4231_v21  ;;  %v7362_v30 = vld [vmem:[%s8209_s10 + $0x80] sm:$0xff]   ;;  %v9777_v21 = vrot.slane %v4292_v38, %v10435_v4 }
 0xa90   : > { %v7538_v31 = vpop.eup %7537  ;;  %v4224_v40 = vadd.f32 1e-05, %v4214_v27  ;;  %v10436_v27 = vld [vmem:[#allocation41_spill] sm:$0xff] }
 0xa91   : > { %v4253_v61 = vadd.f32 %v6318_v17, %v4242_v14  ;;  %v4232_v52 = vmul.f32 %v7538_v31, %v4217_v23  ;;  %v10437_v14 = vld [vmem:[#allocation84_spill] sm:$0xff]  ;;  %v10438_v31 = vld [vmem:[#allocation39_spill] sm:$0xff] }
 0xa92   : > { %7541 = vrsqrt.f32 %v4224_v40  ;;  %v9783_v23 = vrot.slane %v4292_v38, %v10437_v14  ;;  %v10439_v40 = vsub.s32 3, %v10438_v31 }
 0xa93   : > { %v4257_v9 = vpack.c.bf16 %v4253_v61, %v4252_v62  ;;  %v4243_v20 = vmul.f32 %v6317_v43, %v4232_v52 }
 0xa94   : > { %v7540_v22 = vpop.eup %7539  ;;  %v9787_v62 = vrot.slane %v4292_v38, %v10439_v40 }
 0xa95   : > { %4507 = vmatmul.mubr.bf16.vlgmr.msra.gmra.mxu1 %v4257_v9  ;;  %4568 = vmatmul.mubr.bf16.vlgmr.msra.gmra.mxu0 %v4257_v9  ;;  %v4233_v44 = vmul.f32 %v7540_v22, %v4218_v50  ;;  %v4254_v0 = vadd.f32 %v6318_v17, %v4243_v20 }
 0xa96   : > { %4516 = vmatprep.mubr.bf16.mxu1 %v10434_v36  ;;  %4577 = vmatprep.mubr.bf16.mxu0 %v10434_v36 }
 0xa97   : > { %v4244_v10 = vmul.f32 %v6317_v43, %v4233_v44  ;;  %6588 = vmatpush3.bf16.msra.mxu1 %v7333_v39  ;;  %6622 = vmatpush3.bf16.msra.mxu0 %v7334_v1 }
 0xa98   : > { %6623 = vmatprep.subr.bf16.mxu0 %v7336_v2 }
 0xa99   : > { %v4255_v19 = vadd.f32 %v6318_v17, %v4244_v10 }
 0xa9b   : > { %v4258_v29 = vpack.c.bf16 %v4255_v19, %v4254_v0  ;;  %6624 = vmatpush3.bf16.msra.mxu0 %v7338_v25 }
 0xa9c   : > { %6625 = vmatprep.subr.bf16.mxu0 %v7340_v41 }
 0xa9d   : > { %4517 = vmatmul.mubr.bf16.gmra.mxu1 %v4258_v29  ;;  %4578 = vmatmul.mubr.bf16.gmra.mxu0 %v4258_v29 }
 0xa9e   : > { %4526 = vmatprep.mubr.bf16.mxu1 %v10434_v36  ;;  %4587 = vmatprep.mubr.bf16.mxu0 %v10434_v36  ;;  %v7335_v36 = vld [vmem:[%s8209_s10 + $0x70] sm:$0xff]  }
 0xa9f   : > { %v7542_v45 = vpop.eup %7541  ;;  %6589 = vmatprep.subr.bf16.mxu1 %v7335_v36  ;;  %6626 = vmatpush3.bf16.msra.mxu0 %v7342_v46 }
 0xaa0   : > { %v4234_v33 = vmul.f32 %v7542_v45, %v4219_v49  ;;  %6590 = vmatpush3.bf16.msra.mxu1 %v7337_v56  ;;  %6627 = vmatprep.subr.bf16.mxu0 %v7344_v48 }
 0xaa1   : > { %6591 = vmatprep.subr.bf16.mxu1 %v7339_v34 }
 0xaa2   : > { %v4245_v51 = vmul.f32 %v6317_v43, %v4234_v33  ;;  %v7357_v43 = vld [vmem:[%s8209_s10 + $0x8] sm:$0xff]   ;;  %s10442_s10 = sld [smem:[#allocation25_spill]] (!%p6384_p9) }
 0xaa3   : > { %6628 = vmatpush3.bf16.msra.mxu0 %v7346_v42 }
 0xaa4   : > { %v4256_v37 = vadd.f32 %v6318_v17, %v4245_v51  ;;  %6592 = vmatpush3.bf16.msra.mxu1 %v7341_v47  ;;  %6629 = vmatprep.subr.bf16.mxu0 %v7348_v53  ;;  %v9780_v17 = vrot.slane %v4292_v38, %v10436_v27 }
 0xaa5   : > { %6593 = vmatprep.subr.bf16.mxu1 %v7343_v54 }
 0xaa6   : > { %v4259_v58 = vpack.c.bf16 %v4256_v37, %v4256_v37 }
 0xaa7   : > { %6630 = vmatpush3.bf16.msra.mxu0 %v7350_v35 }
 0xaa8   : > { %4527 = vmatmul.mubr.bf16.gmra.mxu1 %v4259_v58  ;;  %4588 = vmatmul.mubr.bf16.gmra.mxu0 %v4259_v58 }
 0xaa9   : > { %6594 = vmatpush3.bf16.msra.mxu1 %v7345_v11  ;;  %6631 = vmatprep.subr.bf16.mxu0 %v7352_v15 }
 0xaaa   : > { %6595 = vmatprep.subr.bf16.mxu1 %v7347_v7 }
 0xaab   : > { %6632 = vmatpush3.bf16.msra.mxu0 %v7354_v24 }
 0xaac   : > { %6633 = vmatprep.subr.bf16.mxu0 %v7356_v60 }
 0xaad   : > { %6596 = vmatpush3.bf16.msra.mxu1 %v7349_v6 }
 0xaae   : > { %6597 = vmatprep.subr.bf16.mxu1 %v7351_v16 }
 0xaaf   : > { %6634 = vmatpush3.bf16.msra.mxu0 %v7358_v63 }
 0xab0   : > { %6635 = vmatprep.subr.bf16.mxu0 %v7360_v32 }
 0xab1   : > { %6598 = vmatpush3.bf16.msra.mxu1 %v7353_v28 }
 0xab2   : > { %6599 = vmatprep.subr.bf16.mxu1 %v7355_v3 }
 0xab3   : > { %6636 = vmatpush3.bf16.msra.mxu0 %v7362_v30 }
 0xab5   : > { %6600 = vmatpush3.bf16.msra.mxu1 %v7357_v43 }
 0xab6   : > { %6601 = vmatprep.subr.bf16.mxu1 %v7359_v59 }
 0xab9   : > { %6602 = vmatpush3.bf16.msra.mxu1 %v7361_v55 }
 0xb55   : > { %v4508_v61 = vpop.f32.mrf.mxu1  ;;  %v4569_v52 = vpop.f32.mrf.mxu0 }
 0xb56   : > { %v9790_v50 = vadd.f32 %v4508_v61, %v9777_v21  ;;  %v9793_v9 = vadd.f32 %v4569_v52, %v9780_v17 }
 0xb57   : > { %v4510_v22 = vpop.f32.mrf.mxu1  ;;  %v4571_v44 = vpop.f32.mrf.mxu0 }
 0xb58   : > { %v4596_v20 = vmul.f32 %v9790_v50, %v9790_v50  ;;  %v4598_v10 = vmul.f32 %v9793_v9, %v9793_v9  ;;  %v9800_v0 = vadd.f32 %v4510_v22, %v9783_v23  ;;  %v9803_v19 = vadd.f32 %v4571_v44, %v9787_v62 }
 0xb59   : > { %v4512_v29 = vpop.f32.mrf.mxu1  ;;  %v4573_v49 = vpop.f32.mrf.mxu0 }
 0xb5a   : > { %v4616_v45 = vmul.f32 %v4596_v20, %v9790_v50  ;;  %v4618_v33 = vmul.f32 %v4598_v10, %v9793_v9  ;;  %v4597_v51 = vmul.f32 %v9800_v0, %v9800_v0  ;;  %v4599_v37 = vmul.f32 %v9803_v19, %v9803_v19 }
 0xb5b   : > { %v9812_v58 = vadd.f32 %v4512_v29, %v9777_v21  ;;  %v9815_v13 = vadd.f32 %v4573_v49, %v9780_v17  ;;  %v4514_v26 = vpop.f32.mrf.mxu1  ;;  %v4575_v39 = vpop.f32.mrf.mxu0 }
 0xb5c   : > { %v4636_v1 = vmul.f32 0.044715, %v4616_v45  ;;  %v4638_v36 = vmul.f32 0.044715, %v4618_v33  ;;  %v4617_v2 = vmul.f32 %v4597_v51, %v9800_v0  ;;  %v4619_v56 = vmul.f32 %v4599_v37, %v9803_v19 }
 0xb5d   : > { %v4600_v25 = vmul.f32 %v9812_v58, %v9812_v58  ;;  %v4602_v34 = vmul.f32 %v9815_v13, %v9815_v13  ;;  %v9824_v41 = vadd.f32 %v4514_v26, %v9783_v23  ;;  %v9827_v47 = vadd.f32 %v4575_v39, %v9787_v62  ;;  %v4518_v46 = vpop.f32.mrf.mxu1  ;;  %v4579_v54 = vpop.f32.mrf.mxu0 }
 0xb5e   : > { %v4656_v48 = vadd.f32 %v4636_v1, %v9790_v50  ;;  %v4658_v11 = vadd.f32 %v4638_v36, %v9793_v9  ;;  %v4637_v42 = vmul.f32 0.044715, %v4617_v2  ;;  %v4639_v7 = vmul.f32 0.044715, %v4619_v56 }
 0xb5f   : > { %v4620_v53 = vmul.f32 %v4600_v25, %v9812_v58  ;;  %v4622_v6 = vmul.f32 %v4602_v34, %v9815_v13  ;;  %v4601_v35 = vmul.f32 %v9824_v41, %v9824_v41  ;;  %v4603_v16 = vmul.f32 %v9827_v47, %v9827_v47  ;;  %v4520_v15 = vpop.f32.mrf.mxu1  ;;  %v4581_v28 = vpop.f32.mrf.mxu0 }
 0xb60   : > { %v4676_v24 = vmul.f32 0.7978846, %v4656_v48  ;;  %v4678_v3 = vmul.f32 0.7978846, %v4658_v11  ;;  %v4657_v60 = vadd.f32 %v4637_v42, %v9800_v0  ;;  %v4659_v30 = vadd.f32 %v4639_v7, %v9803_v19 }
 0xb61   : > { %v4640_v43 = vmul.f32 0.044715, %v4620_v53  ;;  %v4642_v63 = vmul.f32 0.044715, %v4622_v6  ;;  %v4621_v59 = vmul.f32 %v4601_v35, %v9824_v41  ;;  %v4623_v32 = vmul.f32 %v4603_v16, %v9827_v47  ;;  %v4522_v4 = vpop.f32.mrf.mxu1  ;;  %v4583_v27 = vpop.f32.mrf.mxu0 }
 0xb62   : > { %v4677_v55 = vmul.f32 0.7978846, %v4657_v60  ;;  %v9842_v38 = vadd.f32 %v4518_v46, %v9777_v21  ;;  %7543 = vtanh.f32 %v4676_v24  ;;  %v9849_v22 = vadd.f32 %v4579_v54, %v9780_v17 }
 0xb63   : > { %v4660_v14 = vadd.f32 %v4640_v43, %v9812_v58  ;;  %v4662_v31 = vadd.f32 %v4642_v63, %v9815_v13  ;;  %v4641_v40 = vmul.f32 0.044715, %v4621_v59  ;;  %7545 = vtanh.f32 %v4678_v3  ;;  %v4524_v51 = vpop.f32.mrf.mxu1  ;;  %v4585_v37 = vpop.f32.mrf.mxu0 }
 0xb64   : > { %v4643_v61 = vmul.f32 0.044715, %v4623_v32  ;;  %v4604_v52 = vmul.f32 %v9842_v38, %v9842_v38  ;;  %7547 = vtanh.f32 %v4677_v55  ;;  %v4606_v45 = vmul.f32 %v9849_v22, %v9849_v22 }
 0xb65   : > { %v4680_v44 = vmul.f32 0.7978846, %v4660_v14  ;;  %v4682_v20 = vmul.f32 0.7978846, %v4662_v31  ;;  %v4661_v10 = vadd.f32 %v4641_v40, %v9824_v41  ;;  %v9857_v33 = vadd.f32 %v4520_v15, %v9783_v23 }
 0xb66   : > { %v4663_v29 = vadd.f32 %v4643_v61, %v9827_v47  ;;  %v4624_v49 = vmul.f32 %v4604_v52, %v9842_v38  ;;  %v9860_v39 = vadd.f32 %v4581_v28, %v9787_v62  ;;  %v9863_v1 = vadd.f32 %v4522_v4, %v9777_v21 }
 0xb67   : > { %7549 = vtanh.f32 %v4680_v44  ;;  %v4681_v26 = vmul.f32 0.7978846, %v4661_v10  ;;  %v4679_v36 = vmul.f32 0.7978846, %v4659_v30  ;;  %v4626_v56 = vmul.f32 %v4606_v45, %v9849_v22 }
 0xb68   : > { %7551 = vtanh.f32 %v4682_v20  ;;  %v4644_v2 = vmul.f32 0.044715, %v4624_v49  ;;  %v4528_v25 = vpop.f32.mrf.mxu1  ;;  %v9866_v34 = vpop.f32.mrf.mxu0  ;;  %v4683_v46 = vmul.f32 0.7978846, %v4663_v29  ;;  %v4605_v54 = vmul.f32 %v9857_v33, %v9857_v33 }
 0xb69   : > { %v4607_v48 = vmul.f32 %v9860_v39, %v9860_v39  ;;  %v4608_v11 = vmul.f32 %v9863_v1, %v9863_v1  ;;  %7553 = vtanh.f32 %v4681_v26  ;;  %v4646_v7 = vmul.f32 0.044715, %v4626_v56 }
 0xb6a   : > { %v4664_v42 = vadd.f32 %v4644_v2, %v9842_v38  ;;  %v9876_v53 = vadd.f32 %v4583_v27, %v9780_v17  ;;  %v4530_v6 = vpop.f32.mrf.mxu1  ;;  %v4591_v35 = vpop.f32.mrf.mxu0  ;;  %v4625_v16 = vmul.f32 %v4605_v54, %v9857_v33  ;;  %v9882_v24 = vadd.f32 %v4524_v51, %v9783_v23 }
 0xb6b   : > { %v4627_v15 = vmul.f32 %v4607_v48, %v9860_v39  ;;  %v4628_v28 = vmul.f32 %v4608_v11, %v9863_v1  ;;  %v4666_v60 = vadd.f32 %v4646_v7, %v9849_v22  ;;  %v9888_v63 = vadd.f32 %v4585_v37, %v9787_v62 }
 0xb6c   : > { %v4684_v3 = vmul.f32 0.7978846, %v4664_v42  ;;  %v4610_v43 = vmul.f32 %v9876_v53, %v9876_v53  ;;  %v4532_v59 = vpop.f32.mrf.mxu1  ;;  %v4593_v32 = vpop.f32.mrf.mxu0  ;;  %v4645_v55 = vmul.f32 0.044715, %v4625_v16  ;;  %v4609_v27 = vmul.f32 %v9882_v24, %v9882_v24 }
 0xb6d   : > { %v4647_v30 = vmul.f32 0.044715, %v4627_v15  ;;  %v4648_v4 = vmul.f32 0.044715, %v4628_v28  ;;  %7555 = vtanh.f32 %v4679_v36  ;;  %v4686_v14 = vmul.f32 0.7978846, %v4666_v60 }
 0xb6e   : > { %v4630_v31 = vmul.f32 %v4610_v43, %v9876_v53  ;;  %v4611_v40 = vmul.f32 %v9888_v63, %v9888_v63  ;;  %v4533_v61 = vpop.f32.mrf.mxu1  ;;  %v4594_v52 = vpop.f32.mrf.mxu0  ;;  %v4665_v44 = vadd.f32 %v4645_v55, %v9857_v33  ;;  %v4629_v29 = vmul.f32 %v4609_v27, %v9882_v24 }
 0xb6f   : > { %v4667_v20 = vadd.f32 %v4647_v30, %v9860_v39  ;;  %v4668_v10 = vadd.f32 %v4648_v4, %v9863_v1  ;;  %v7544_v49 = vpop.eup %7543  ;;  %7557 = vtanh.f32 %v4683_v46  ;;  %v9901_v2 = vadd.f32 %v4528_v25, %v9777_v21 }
 0xb70   : > { %v4650_v45 = vmul.f32 0.044715, %v4630_v31  ;;  %v4631_v51 = vmul.f32 %v4611_v40, %v9888_v63  ;;  %v7546_v37 = vpop.eup %7545  ;;  %7559 = vtanh.f32 %v4684_v3  ;;  %v4685_v26 = vmul.f32 0.7978846, %v4665_v44 }
 0xb71   : > { %v4687_v36 = vmul.f32 0.7978846, %v4667_v20  ;;  %v7548_v56 = vpop.eup %7547  ;;  %7561 = vtanh.f32 %v4686_v14  ;;  %v4688_v54 = vmul.f32 0.7978846, %v4668_v10  ;;  %v4649_v11 = vmul.f32 0.044715, %v4629_v29 }
 0xb72   : > { %v4670_v48 = vadd.f32 %v4650_v45, %v9876_v53  ;;  %7563 = vtanh.f32 %v4685_v26  ;;  %v4651_v42 = vmul.f32 0.044715, %v4631_v51  ;;  %v4612_v46 = vmul.f32 %v9901_v2, %v9901_v2 }
 0xb73   : > { %7565 = vtanh.f32 %v4687_v36  ;;  %v4669_v15 = vadd.f32 %v4649_v11, %v9882_v24  ;;  %v4716_v25 = vadd.f32 1.0, %v7544_v49  ;;  %v9911_v55 = vadd.f32 %v9866_v34, %v9780_v17 }
 0xb74   : > { %v7550_v7 = vpop.eup %7549  ;;  %v4690_v16 = vmul.f32 0.7978846, %v4670_v48  ;;  %7567 = vtanh.f32 %v4688_v54  ;;  %v4671_v21 = vadd.f32 %v4651_v42, %v9888_v63  ;;  %v4632_v43 = vmul.f32 %v4612_v46, %v9901_v2 }
 0xb75   : > { %v7552_v28 = vpop.eup %7551  ;;  %v4720_v3 = vadd.f32 1.0, %v7550_v7  ;;  %v4689_v60 = vmul.f32 0.7978846, %v4669_v15  ;;  %v9914_v30 = vadd.f32 %v4530_v6, %v9783_v23  ;;  %v9917_v14 = vadd.f32 %v4591_v35, %v9787_v62 }
 0xb76   : > { %7569 = vtanh.f32 %v4690_v16  ;;  %v7554_v59 = vpop.eup %7553  ;;  %v4691_v32 = vmul.f32 0.7978846, %v4671_v21  ;;  %v4652_v27 = vmul.f32 0.044715, %v4632_v43  ;;  %v4718_v31 = vadd.f32 1.0, %v7546_v37 }
 0xb77   : > { %v4740_v4 = vmul.f32 0.5, %v4720_v3  ;;  %7571 = vtanh.f32 %v4689_v60  ;;  %v4614_v40 = vmul.f32 %v9911_v55, %v9911_v55  ;;  %v4613_v61 = vmul.f32 %v9914_v30, %v9914_v30 }
 0xb78   : > { %7573 = vtanh.f32 %v4691_v32  ;;  %v4736_v52 = vmul.f32 0.5, %v4716_v25  ;;  %v4672_v17 = vadd.f32 %v4652_v27, %v9901_v2  ;;  %v4615_v23 = vmul.f32 %v9917_v14, %v9917_v14 }
 0xb79   : > { %v4717_v34 = vadd.f32 1.0, %v7548_v56  ;;  %v4634_v44 = vmul.f32 %v4614_v40, %v9911_v55  ;;  %v4633_v62 = vmul.f32 %v4613_v61, %v9914_v30  ;;  %v4721_v35 = vadd.f32 1.0, %v7554_v59 }
 0xb7a   : > { %v7556_v6 = vpop.eup %7555  ;;  %v4760_v20 = vmul.f32 %v4740_v4, %v9812_v58  ;;  %v4722_v10 = vadd.f32 1.0, %v7552_v28  ;;  %v4692_v29 = vmul.f32 0.7978846, %v4672_v17  ;;  %v4635_v49 = vmul.f32 %v4615_v23, %v9917_v14 }
 0xb7b   : > { %v4654_v51 = vmul.f32 0.044715, %v4634_v44  ;;  %v4653_v37 = vmul.f32 0.044715, %v4633_v62  ;;  %v4737_v26 = vmul.f32 0.5, %v4717_v34  ;;  %v4741_v36 = vmul.f32 0.5, %v4721_v35 }
 0xb7c   : > { %v7558_v45 = vpop.eup %7557  ;;  %v4756_v56 = vmul.f32 %v4736_v52, %v9790_v50  ;;  %v4738_v48 = vmul.f32 0.5, %v4718_v31  ;;  %7575 = vtanh.f32 %v4692_v29  ;;  %v4655_v11 = vmul.f32 0.044715, %v4635_v49 }
 0xb7d   : > { %v7560_v54 = vpop.eup %7559  ;;  %v4674_v46 = vadd.f32 %v4654_v51, %v9911_v55  ;;  %v4673_v58 = vadd.f32 %v4653_v37, %v9914_v30  ;;  %v4757_v7 = vmul.f32 %v4737_v26, %v9800_v0  ;;  %v4761_v16 = vmul.f32 %v4741_v36, %v9824_v41 }
 0xb7e   : > { %v7562_v42 = vpop.eup %7561  ;;  %v4776_v28 = vpack.c.bf16 %v4760_v20, %v4756_v56  ;;  %v4742_v3 = vmul.f32 0.5, %v4722_v10  ;;  %v4675_v21 = vadd.f32 %v4655_v11, %v9917_v14  ;;  %v4719_v25 = vadd.f32 1.0, %v7556_v6 }
 0xb7f   : > { %v7564_v15 = vpop.eup %7563  ;;  %v4694_v50 = vmul.f32 0.7978846, %v4674_v46  ;;  %v4693_v43 = vmul.f32 0.7978846, %v4673_v58  ;;  %v4777_v59 = vpack.c.bf16 %v4761_v16, %v4757_v7  ;;  %v4723_v32 = vadd.f32 1.0, %v7558_v45 }
 0xb80   : > { %v7566_v60 = vpop.eup %7565  ;;  %v4724_v27 = vadd.f32 1.0, %v7560_v54  ;;  %v4695_v31 = vmul.f32 0.7978846, %v4675_v21  ;;  %v4739_v40 = vmul.f32 0.5, %v4719_v25  ;;  %v4725_v61 = vadd.f32 1.0, %v7564_v15 }
 0xb81   : > { %v7568_v4 = vpop.eup %7567  ;;  %7577 = vtanh.f32 %v4694_v50  ;;  %5083 = vmatprep.mubr.bf16.mxu1 %v4777_v59  ;;  %v4743_v41 = vmul.f32 0.5, %v4723_v32  ;;  %v4727_v17 = vadd.f32 1.0, %v7566_v60  ;;  %v4762_v23 = vmul.f32 %v4742_v3, %v9815_v13 }
 0xb82   : > { %v4728_v0 = vadd.f32 1.0, %v7568_v4  ;;  %7579 = vtanh.f32 %v4693_v43  ;;  %5084 = vmatmul.mubr.bf16.vlgmr.msra.gmra.mxu1 %v4776_v28  ;;  %v4759_v62 = vmul.f32 %v4739_v40, %v9803_v19  ;;  %v4758_v10 = vmul.f32 %v4738_v48, %v9793_v9 }
 0xb83   : > { %v7570_v52 = vpop.eup %7569  ;;  %7581 = vtanh.f32 %v4695_v31  ;;  %v4763_v35 = vmul.f32 %v4743_v41, %v9827_v47  ;;  %v4726_v29 = vadd.f32 1.0, %v7562_v42  ;;  %v4745_v45 = vmul.f32 0.5, %v4725_v61 }
 0xb84   : > { %v4730_v34 = vadd.f32 1.0, %v7570_v52  ;;  %v7572_v6 = vpop.eup %7571  ;;  %v4748_v44 = vmul.f32 0.5, %v4728_v0  ;;  %v4744_v51 = vmul.f32 0.5, %v4724_v27  ;;  %v4747_v13 = vmul.f32 0.5, %v4727_v17 }
 0xb85   : > { %v7574_v20 = vpop.eup %7573  ;;  %v4729_v49 = vadd.f32 1.0, %v7572_v6  ;;  %v4779_v37 = vpack.c.bf16 %v4763_v35, %v4759_v62  ;;  %v4778_v36 = vpack.c.bf16 %v4762_v23, %v4758_v10  ;;  %v4746_v19 = vmul.f32 0.5, %v4726_v29  ;;  %v6351_v23 = vld [vmem:[%s1321_s21] ss:$0 sm:$0xff]  ;;  %s10440_s21 = sld [smem:[#allocation23_spill]] (!%p6384_p9) }
 0xb86   : > { %v4731_v26 = vadd.f32 1.0, %v7574_v20  ;;  %v4750_v54 = vmul.f32 0.5, %v4730_v34  ;;  %v4768_v11 = vmul.f32 %v4748_v44, %v9863_v1  ;;  %v4765_v47 = vmul.f32 %v4745_v45, %v9857_v33 }
 0xb87   : > { %v4749_v56 = vmul.f32 0.5, %v4729_v49  ;;  %5139 = vmatprep.mubr.bf16.mxu0 %v4779_v37  ;;  %v4764_v42 = vmul.f32 %v4744_v51, %v9842_v38  ;;  %v4767_v58 = vmul.f32 %v4747_v13, %v9860_v39  ;;  %v4766_v21 = vmul.f32 %v4746_v19, %v9849_v22 }
 0xb88   : > { %v4751_v46 = vmul.f32 0.5, %v4731_v26  ;;  %5140 = vmatmul.mubr.bf16.vlgmr.msra.gmra.mxu0 %v4778_v36  ;;  %v4770_v16 = vmul.f32 %v4750_v54, %v9876_v53 }
 0xb89   : > { %v4769_v9 = vmul.f32 %v4749_v56, %v9882_v24  ;;  %v7576_v48 = vpop.eup %7575  ;;  %v4780_v1 = vpack.c.bf16 %v4768_v11, %v4764_v42 }
 0xb8a   : > { %v4771_v7 = vmul.f32 %v4751_v46, %v9888_v63  ;;  %v4732_v3 = vadd.f32 1.0, %v7576_v48  ;;  %v4782_v24 = vpack.c.bf16 %v4770_v16, %v4766_v21 }
 0xb8b   : > { %v4781_v15 = vpack.c.bf16 %v4769_v9, %v4765_v47 }
 0xb8c   : > { %v4783_v28 = vpack.c.bf16 %v4771_v7, %v4767_v58  ;;  %v4752_v60 = vmul.f32 0.5, %v4732_v3 }
 0xb8d   : > { %5091 = vmatprep.mubr.bf16.mxu1 %v4781_v15 }
 0xb8e   : > { %5147 = vmatprep.mubr.bf16.mxu0 %v4783_v28  ;;  %5092 = vmatmul.mubr.bf16.gmra.mxu1 %v4780_v1  ;;  %v7578_v33 = vpop.eup %7577  ;;  %v4772_v32 = vmul.f32 %v4752_v60, %v9901_v2 }
 0xb8f   : > { %v7580_v25 = vpop.eup %7579  ;;  %v4734_v38 = vadd.f32 1.0, %v7578_v33 }
 0xb90   : > { %v7582_v50 = vpop.eup %7581  ;;  %5148 = vmatmul.mubr.bf16.gmra.mxu0 %v4782_v24  ;;  %v4733_v39 = vadd.f32 1.0, %v7580_v25  ;;  %v4784_v61 = vpack.c.bf16 %v4772_v32, %v4772_v32 }
 0xb91   : > { %v4735_v63 = vadd.f32 1.0, %v7582_v50  ;;  %v4754_v43 = vmul.f32 0.5, %v4734_v38 }
 0xb92   : > { %v4753_v53 = vmul.f32 0.5, %v4733_v39 }
 0xb93   : > { %v4755_v59 = vmul.f32 0.5, %v4735_v63  ;;  %v4774_v4 = vmul.f32 %v4754_v43, %v9911_v55 }
 0xb94   : > { %v4773_v22 = vmul.f32 %v4753_v53, %v9914_v30 }
 0xb95   : > { %v4775_v27 = vmul.f32 %v4755_v59, %v9917_v14  ;;  %v4786_v52 = vpack.c.bf16 %v4774_v4, %v4774_v4 }
 0xb96   : > { %v4785_v31 = vpack.c.bf16 %v4773_v22, %v4773_v22 }
 0xb97   : > { %v4787_v40 = vpack.c.bf16 %v4775_v27, %v4775_v27 }
 0xb98   : > { %5099 = vmatprep.mubr.bf16.mxu1 %v4785_v31 }
 0xb99   : > { %5155 = vmatprep.mubr.bf16.mxu0 %v4787_v40  ;;  %5100 = vmatmul.mubr.bf16.gmra.mxu1 %v4784_v61 }
 0xb9a   : > { %5156 = vmatmul.mubr.bf16.gmra.mxu0 %v4786_v52 }
 0xc42   : > { %v6603_v0 = vpop.f32.mrf.mxu1 }
 0xc44   : > { %v6604_v41 = vpop.f32.mrf.mxu1 }
 0xc45   : > { %v6605_v17 = vadd.f32 %v6604_v41, %v6603_v0 }
 0xc46   : > { %v6606_v2 = vpop.f32.mrf.mxu1 }
 0xc47   : > { %v5086_v6 = vadd.f32 %v6605_v17, %v6351_v23 }
 0xc48   : > { %v6637_v34 = vpop.f32.mrf.mxu0  ;;  %v6607_v30 = vpop.f32.mrf.mxu1 }
 0xc49   : > { %v6608_v55 = vadd.f32 %v6607_v30, %v6606_v2 }
 0xc4a   : > { %v6638_v44 = vpop.f32.mrf.mxu0 }
 0xc4b   : > { %v6639_v14 = vadd.f32 %v6638_v44, %v6637_v34  ;;  %v5089_v20 = vadd.f32 %v6608_v55, %v6351_v23 }
 0xc4c   : > { %v6640_v62 = vpop.f32.mrf.mxu0 }
 0xc4d   : > { %v5142_v35 = vadd.f32 %v6639_v14, %v5086_v6 }
 0xc4e   : > { %v6609_v10 = vpop.f32.mrf.mxu1  ;;  %v6641_v29 = vpop.f32.mrf.mxu0 }
 0xc4f   : > { %v9956_v49 = vadd.f32 %v5142_v35, %v9669_v18  ;;  %v6642_v45 = vadd.f32 %v6641_v29, %v6640_v62 }
 0xc50   : > { %v6610_v51 = vpop.f32.mrf.mxu1  ;;  %v6643_v37 = vpop.f32.mrf.mxu0 }
 0xc51   : > { %v6611_v26 = vadd.f32 %v6610_v51, %v6609_v10  ;;  %5168 = vst [vmem:[#allocation2 + $0x8] sm:$0xff] %v9956_v49  ;;  %v5145_v13 = vadd.f32 %v6642_v45, %v5089_v20 }
 0xc52   : > { %v6612_v36 = vpop.f32.mrf.mxu1  ;;  %v6644_v56 = vpop.f32.mrf.mxu0 }
 0xc53   : > { %v5094_v54 = vadd.f32 %v6611_v26, %v6351_v23  ;;  %v9960_v11 = vadd.f32 %v5145_v13, %v9672_v8  ;;  %v6645_v46 = vadd.f32 %v6644_v56, %v6643_v37 }
 0xc54   : > { %v6613_v19 = vpop.f32.mrf.mxu1  ;;  %v6646_v47 = vpop.f32.mrf.mxu0 }
 0xc55   : > { %v6614_v9 = vadd.f32 %v6613_v19, %v6612_v36  ;;  %5169 = vst [vmem:[#allocation2] sm:$0xff] %v9960_v11  ;;  %v5150_v18 = vadd.f32 %v6645_v46, %v5094_v54 }
 0xc56   : > { %v6647_v42 = vpop.f32.mrf.mxu0 }
 0xc57   : > { %v5097_v48 = vadd.f32 %v6614_v9, %v6351_v23  ;;  %v9964_v58 = vadd.f32 %v5150_v18, %v9677_v12  ;;  %v6648_v7 = vadd.f32 %v6647_v42, %v6646_v47 }
 0xc59   : > { %5170 = vst [vmem:[#allocation2 + $0x20] sm:$0xff] %v9964_v58  ;;  %v5153_v16 = vadd.f32 %v6648_v7, %v5097_v48  ;;  %v6615_v15 = vpop.f32.mrf.mxu1 }
 0xc5a   : > { %v6649_v28 = vpop.f32.mrf.mxu0 }
 0xc5b   : > { %v9968_v8 = vadd.f32 %v5153_v16, %v9682_v57  ;;  %v6616_v1 = vpop.f32.mrf.mxu1 }
 0xc5c   : > { %v6617_v3 = vadd.f32 %v6616_v1, %v6615_v15  ;;  %v6650_v21 = vpop.f32.mrf.mxu0 }
 0xc5d   : > { %5171 = vst [vmem:[#allocation2 + $0x10] sm:$0xff] %v9968_v8  ;;  %v6618_v33 = vpop.f32.mrf.mxu1  ;;  %v6651_v25 = vadd.f32 %v6650_v21, %v6649_v28 }
 0xc5e   : > { %v5102_v24 = vadd.f32 %v6617_v3, %v6351_v23  ;;  %v6652_v60 = vpop.f32.mrf.mxu0 }
 0xc5f   : > { %v6619_v12 = vpop.f32.mrf.mxu1 }
 0xc60   : > { %v5158_v38 = vadd.f32 %v6651_v25, %v5102_v24  ;;  %v6653_v50 = vpop.f32.mrf.mxu0  ;;  %5176 = sbr.rel (%p6384_p9) target bundleno = 3966 (0xf7e), region = 168 }
 0xc62   : > { %v9972_v39 = vadd.f32 %v5158_v38, %v9689_v5 }
 0xc64   : > { %5172 = vst [vmem:[#allocation2 + $0x18] sm:$0x3] %v9972_v39 }
 0xc65   : > { %5179 = vadd.xlane.f32.xlu0 %v9956_v49  ;;  %v5195_v57 = vmul.f32 %v9956_v49, %v9956_v49  ;;  %v5196_v63 = vmul.f32 %v9960_v11, %v9960_v11  ;;  %v5197_v5 = vmul.f32 %v9964_v58, %v9964_v58  ;;  %v5198_v43 = vmul.f32 %v9968_v8, %v9968_v8  ;;  %v6385_v48 = vld [vmem:[%s10440_s21] ss:$0 sm:$0xff]  ;;  %v5268_v3 = vld [vmem:[#allocation3] sm:$0xff]  ;;  %v5269_v60 = vld [vmem:[#allocation3 + $0x8] sm:$0xff] }
 0xc66   : > { %v5199_v53 = vmul.f32 %v9972_v39, %v9972_v39  ;;  %v5187_v59 = vsel %vm1771_vm1, %v9972_v39, 0.0  ;;  %v6386_v16 = vld [vmem:[%s10441_s3] ss:$0 sm:$0xff]  ;;  %vm7837_vm6 = vmmov 0  }
 0xc67   : > { %5200 = vadd.xlane.f32.xlu1 %v5195_v57 }
 0xc68   : > { %v5208_v32 = vsel %vm1771_vm1, %v5199_v53, 0.0 }
 0xc69   : > { %5181 = vadd.xlane.f32.xlu0 %v9960_v11 }
 0xc6b   : > { %5202 = vadd.xlane.f32.xlu1 %v5196_v63 }
 0xc6d   : > { %5183 = vadd.xlane.f32.xlu0 %v9964_v58 }
 0xc6f   : > { %5185 = vadd.xlane.f32.xlu1 %v9968_v8 }
 0xc71   : > { %5204 = vadd.xlane.f32.xlu0 %v5197_v5 }
 0xc73   : > { %5206 = vadd.xlane.f32.xlu1 %v5198_v43 }
 0xc75   : > { %5188 = vadd.xlane.f32.xlu0 %v5187_v59  ;;  %v5270_v59 = vld [vmem:[#allocation3 + $0x20] sm:$0xff] }
 0xc77   : > { %5209 = vadd.xlane.f32.xlu1 %v5208_v32 }
 0xcee   : > { %v5180_v22 = vpop.xlane.xlu0 %5179 }
 0xcef   : > { %v5190_v4 = vmul.f32 0.0078125, %v5180_v22 }
 0xcf0   : > { %v5201_v27 = vpop.xlane.xlu1 %5200 }
 0xcf1   : > { %v5216_v31 = vmul.f32 %v5190_v4, %v5190_v4  ;;  %v5211_v40 = vmul.f32 0.0078125, %v5201_v27  ;;  %v5226_v47 = vsub.f32 %v9956_v49, %v5190_v4  ;;  %v5271_v4 = vld [vmem:[#allocation3 + $0x18] sm:$0xff] }
 0xcf2   : > { %v5182_v61 = vpop.xlane.xlu0 %5181 }
 0xcf3   : > { %v5221_v52 = vsub.f32 %v5211_v40, %v5216_v31  ;;  %v5191_v0 = vmul.f32 0.0078125, %v5182_v61 }
 0xcf4   : > { %v5203_v41 = vpop.xlane.xlu1 %5202 }
 0xcf5   : > { %v5231_v17 = vadd.f32 1e-05, %v5221_v52  ;;  %v5217_v23 = vmul.f32 %v5191_v0, %v5191_v0  ;;  %v5212_v2 = vmul.f32 0.0078125, %v5203_v41  ;;  %v5227_v15 = vsub.f32 %v9960_v11, %v5191_v0 }
 0xcf6   : > { %v5184_v34 = vpop.xlane.xlu0 %5183 }
 0xcf7   : > { %7622 = vrsqrt.f32 %v5231_v17  ;;  %v5222_v30 = vsub.f32 %v5212_v2, %v5217_v23  ;;  %v5192_v6 = vmul.f32 0.0078125, %v5184_v34  ;;  %v5272_v17 = vld [vmem:[#allocation3 + $0x10] sm:$0x3] }
 0xcf8   : > { %v5186_v55 = vpop.xlane.xlu1 %5185 }
 0xcf9   : > { %v5232_v44 = vadd.f32 1e-05, %v5222_v30  ;;  %v5193_v14 = vmul.f32 0.0078125, %v5186_v55  ;;  %v5218_v35 = vmul.f32 %v5192_v6, %v5192_v6  ;;  %v5228_v49 = vsub.f32 %v9964_v58, %v5192_v6 }
 0xcfa   : > { %v5205_v62 = vpop.xlane.xlu0 %5204 }
 0xcfb   : > { %7624 = vrsqrt.f32 %v5232_v44  ;;  %v5219_v20 = vmul.f32 %v5193_v14, %v5193_v14  ;;  %v5213_v10 = vmul.f32 0.0078125, %v5205_v62  ;;  %v5229_v50 = vsub.f32 %v9968_v8, %v5193_v14 }
 0xcfc   : > { %v5207_v29 = vpop.xlane.xlu1 %5206 }
 0xcfd   : > { %v5223_v45 = vsub.f32 %v5213_v10, %v5218_v35  ;;  %v5214_v51 = vmul.f32 0.0078125, %v5207_v29 }
 0xcfe   : > { %v5189_v37 = vpop.xlane.xlu0 %5188 }
 0xcff   : > { %v5233_v26 = vadd.f32 1e-05, %v5223_v45  ;;  %v5224_v13 = vsub.f32 %v5214_v51, %v5219_v20  ;;  %v5194_v36 = vmul.f32 0.0078125, %v5189_v37 }
 0xd00   : > { %v5210_v54 = vpop.xlane.xlu1 %5209 }
 0xd01   : > { %7626 = vrsqrt.f32 %v5233_v26  ;;  %v5234_v56 = vadd.f32 1e-05, %v5224_v13  ;;  %v5220_v46 = vmul.f32 %v5194_v36, %v5194_v36  ;;  %v5215_v19 = vmul.f32 0.0078125, %v5210_v54 }
 0xd02   : > { %v5230_v8 = vsub.f32 %v9972_v39, %v5194_v36 }
 0xd03   : > { %7628 = vrsqrt.f32 %v5234_v56  ;;  %v5225_v18 = vsub.f32 %v5215_v19, %v5220_v46 }
 0xd04   : > { %v7623_v9 = vpop.eup %7622 }
 0xd05   : > { %v5241_v42 = vmul.f32 %v7623_v9, %v5226_v47  ;;  %v5235_v7 = vadd.f32 1e-05, %v5225_v18 }
 0xd07   : > { %v5252_v28 = vmul.f32 %v6385_v48, %v5241_v42  ;;  %7630 = vrsqrt.f32 %v5235_v7 }
 0xd08   : > { %v7625_v1 = vpop.eup %7624 }
 0xd09   : > { %v5263_v21 = vadd.f32 %v6386_v16, %v5252_v28  ;;  %v5242_v33 = vmul.f32 %v7625_v1, %v5227_v15 }
 0xd0b   : > { %v9997_v24 = vadd.f32 %v5268_v3, %v5263_v21  ;;  %v5253_v25 = vmul.f32 %v6385_v48, %v5242_v33 }
 0xd0d   : > { %5280 = vadd.xlane.f32.xlu0 %v9997_v24  ;;  %v5264_v12 = vadd.f32 %v6386_v16, %v5253_v25  ;;  %v5296_v11 = vmul.f32 %v9997_v24, %v9997_v24 }
 0xd0e   : > { %v7627_v38 = vpop.eup %7626 }
 0xd0f   : > { %v10002_v57 = vadd.f32 %v5269_v60, %v5264_v12  ;;  %v5243_v63 = vmul.f32 %v7627_v38, %v5228_v49 }
 0xd10   : > { %v7629_v5 = vpop.eup %7628 }
 0xd11   : > { %5282 = vadd.xlane.f32.xlu1 %v10002_v57  ;;  %5301 = vadd.xlane.f32.xlu0 %v5296_v11  ;;  %v5254_v43 = vmul.f32 %v6385_v48, %v5243_v63  ;;  %v5244_v53 = vmul.f32 %v7629_v5, %v5229_v50  ;;  %v5297_v58 = vmul.f32 %v10002_v57, %v10002_v57  ;;  %v6387_v50 = vld [vmem:[%s10442_s10] ss:$0 sm:$0xff] }
 0xd12   : > { %v6388_v5 = vld [vmem:[%s10443_s15] ss:$0 sm:$0xff] }
 0xd13   : > { %v5265_v32 = vadd.f32 %v6386_v16, %v5254_v43  ;;  %v5255_v22 = vmul.f32 %v6385_v48, %v5244_v53 }
 0xd14   : > { %v7631_v27 = vpop.eup %7630 }
 0xd15   : > { %5303 = vadd.xlane.f32.xlu1 %v5297_v58  ;;  %v10010_v31 = vadd.f32 %v5270_v59, %v5265_v32  ;;  %v5266_v40 = vadd.f32 %v6386_v16, %v5255_v22  ;;  %v5245_v61 = vmul.f32 %v7631_v27, %v5230_v8  ;;  %v5369_v58 = vld [vmem:[%s10444_s23] sm:$0xff]  ;;  %v5370_v27 = vld [vmem:[%s10444_s23 + $0x8] sm:$0xff] }
 0xd16   : > { %v5379_v8 = vld [vmem:[%s10445_s13] sm:$0xff] }
 0xd17   : > { %5284 = vadd.xlane.f32.xlu0 %v10010_v31  ;;  %v10013_v52 = vadd.f32 %v5271_v4, %v5266_v40  ;;  %v5256_v0 = vmul.f32 %v6385_v48, %v5245_v61  ;;  %v5298_v41 = vmul.f32 %v10010_v31, %v10010_v31 }
 0xd19   : > { %5286 = vadd.xlane.f32.xlu1 %v10013_v52  ;;  %v5267_v23 = vadd.f32 %v6386_v16, %v5256_v0  ;;  %v5299_v39 = vmul.f32 %v10013_v52, %v10013_v52 }
 0xd1b   : > { %5305 = vadd.xlane.f32.xlu0 %v5298_v41  ;;  %v10020_v2 = vadd.f32 %v5272_v17, %v5267_v23  ;;  %v5380_v17 = vld [vmem:[%s10445_s13 + $0x8] sm:$0xff] }
 0xd1d   : > { %5307 = vadd.xlane.f32.xlu1 %v5299_v39  ;;  %v5288_v34 = vsel %vm1771_vm1, %v10020_v2, 0.0  ;;  %v5300_v30 = vmul.f32 %v10020_v2, %v10020_v2 }
 0xd1f   : > { %5289 = vadd.xlane.f32.xlu0 %v5288_v34  ;;  %v5309_v6 = vsel %vm1771_vm1, %v5300_v30, 0.0 }
 0xd21   : > { %5310 = vadd.xlane.f32.xlu1 %v5309_v6 }
 0xd96   : > { %v5281_v55 = vpop.xlane.xlu0 %5280 }
 0xd97   : > { %v5291_v44 = vmul.f32 0.0078125, %v5281_v55 }
 0xd99   : > { %v5317_v35 = vmul.f32 %v5291_v44, %v5291_v44  ;;  %v5327_v49 = vsub.f32 %v9997_v24, %v5291_v44  ;;  %v5371_v44 = vld [vmem:[%s10444_s23 + $0x10] sm:$0xff] }
 0xd9a   : > { %v5283_v14 = vpop.xlane.xlu1 %5282  ;;  %v5302_v62 = vpop.xlane.xlu0 %5301 }
 0xd9b   : > { %v5292_v20 = vmul.f32 0.0078125, %v5283_v14  ;;  %v5312_v10 = vmul.f32 0.0078125, %v5302_v62 }
 0xd9d   : > { %v5322_v29 = vsub.f32 %v5312_v10, %v5317_v35  ;;  %v5318_v51 = vmul.f32 %v5292_v20, %v5292_v20  ;;  %v5328_v43 = vsub.f32 %v10002_v57, %v5292_v20  ;;  %v5381_v35 = vld [vmem:[%s10445_s13 + $0x10] sm:$0xff]  ;;  %v5372_v20 = vld [vmem:[%s10444_s23 + $0x18] sm:$0xff] }
 0xd9e   : > { %v5304_v45 = vpop.xlane.xlu1 %5303 }
 0xd9f   : > { %v5332_v37 = vadd.f32 1e-05, %v5322_v29  ;;  %v5313_v26 = vmul.f32 0.0078125, %v5304_v45 }
 0xda0   : > { %v5285_v13 = vpop.xlane.xlu0 %5284 }
 0xda1   : > { %7632 = vrsqrt.f32 %v5332_v37  ;;  %v5323_v36 = vsub.f32 %v5313_v26, %v5318_v51  ;;  %v5293_v54 = vmul.f32 0.0078125, %v5285_v13  ;;  %v5382_v37 = vld [vmem:[%s10445_s13 + $0x18] sm:$0xff] }
 0xda2   : > { %v5287_v56 = vpop.xlane.xlu1 %5286 }
 0xda3   : > { %v5333_v46 = vadd.f32 1e-05, %v5323_v36  ;;  %v5294_v19 = vmul.f32 0.0078125, %v5287_v56  ;;  %v5319_v9 = vmul.f32 %v5293_v54, %v5293_v54  ;;  %v5329_v40 = vsub.f32 %v10010_v31, %v5293_v54  ;;  %v5373_v56 = vld [vmem:[%s10444_s23 + $0x20] sm:$0x3] }
 0xda4   : > { %v5306_v47 = vpop.xlane.xlu0 %5305 }
 0xda5   : > { %7634 = vrsqrt.f32 %v5333_v46  ;;  %v5314_v18 = vmul.f32 0.0078125, %v5306_v47  ;;  %v5320_v42 = vmul.f32 %v5294_v19, %v5294_v19  ;;  %v5330_v57 = vsub.f32 %v10013_v52, %v5294_v19  ;;  %v5383_v47 = vld [vmem:[%s10445_s13 + $0x20] sm:$0x3] }
 0xda6   : > { %v5308_v48 = vpop.xlane.xlu1 %5307 }
 0xda7   : > { %v5324_v7 = vsub.f32 %v5314_v18, %v5319_v9  ;;  %v5315_v16 = vmul.f32 0.0078125, %v5308_v48  ;;  %v7590_v18 = vld [vmem:[%s10446_s26 + $0xac] ss:$12 sps:$4 sm:$0xff]  }
 0xda8   : > { %v5290_v15 = vpop.xlane.xlu0 %5289  ;;  %5660 = vmatprep.subr.bf16.mxu0 %v7590_v18 }
 0xda9   : > { %v5334_v28 = vadd.f32 1e-05, %v5324_v7  ;;  %v5325_v1 = vsub.f32 %v5315_v16, %v5320_v42  ;;  %v5295_v3 = vmul.f32 0.0078125, %v5290_v15  ;;  %v7592_v42 = vld [vmem:[%s10446_s26 + $0xa8] ss:$12 sps:$4 sm:$0xff]   ;;  %v7835_v15 = vmov 0.0  }
 0xdaa   : > { %v5311_v21 = vpop.xlane.xlu1 %5310  ;;  %v7593_v7 = vld [vmem:[%s10446_s26 + $0xb0] ss:$12 sps:$4 sm:$0xff]   ;;  %7038 = vmatprep.subr.bf16.mxu1 %v7835_v15  ;;  %5661 = vmatpush1.bf16.msra.mxu0 %v7592_v42 }
 0xdab   : > { %7636 = vrsqrt.f32 %v5334_v28  ;;  %v5335_v33 = vadd.f32 1e-05, %v5325_v1  ;;  %v5321_v25 = vmul.f32 %v5295_v3, %v5295_v3  ;;  %v5316_v60 = vmul.f32 0.0078125, %v5311_v21  ;;  %7039 = vmatpush3.bf16.msra.mxu1 %v7593_v7  ;;  %v7596_v21 = vld [vmem:[%s10446_s26 + $0x90] ss:$12 sps:$4 sm:$0xff]   ;;  %7054 = vmatprep.mubr.msk.bf16.mxu1 %vm7837_vm6, %v7835_v15 }
 0xdac   : > { %v5331_v62 = vsub.f32 %v10020_v2, %v5295_v3  ;;  %v7594_v3 = vld [vmem:[%s10446_s26 + $0x94] ss:$12 sps:$4 sm:$0xff]   ;;  %7040 = vmatprep.subr.bf16.mxu1 %v7835_v15 }
 0xdad   : > { %7638 = vrsqrt.f32 %v5335_v33  ;;  %v5326_v38 = vsub.f32 %v5316_v60, %v5321_v25  ;;  %v7597_v33 = vld [vmem:[%s10446_s26 + $0x98] ss:$12 sps:$4 sm:$0xff]   ;;  %5662 = vmatprep.subr.bf16.mxu0 %v7594_v3  ;;  %v7598_v60 = vld [vmem:[%s10446_s26 + $0x7c] ss:$12 sps:$4 sm:$0xff]  }
 0xdae   : > { %v7633_v12 = vpop.eup %7632  ;;  %5663 = vmatpush1.bf16.msra.mxu0 %v7596_v21  ;;  %v6389_v21 = vld [vmem:[%s10447_s7] ss:$0 sm:$0xff] }
 0xdaf   : > { %v5342_v11 = vmul.f32 %v7633_v12, %v5327_v49  ;;  %v5336_v63 = vadd.f32 1e-05, %v5326_v38  ;;  %7041 = vmatpush3.bf16.msra.mxu1 %v7597_v33  ;;  %v7600_v49 = vld [vmem:[%s10446_s26 + $0x78] ss:$12 sps:$4 sm:$0xff]   ;;  %v7601_v12 = vld [vmem:[%s10446_s26 + $0x80] ss:$12 sps:$4 sm:$0xff]   ;;  %5664 = vmatprep.subr.bf16.mxu0 %v7598_v60 }
 0xdb0   : > { %7042 = vmatprep.subr.bf16.mxu1 %v7835_v15  ;;  %v7602_v38 = vld [vmem:[%s10446_s26 + $0x64] ss:$12 sps:$4 sm:$0xff]   ;;  %v6390_v60 = vld [vmem:[%s10448_s29] ss:$0 sm:$0xff] }
 0xdb1   : > { %v5353_v53 = vmul.f32 %v6387_v50, %v5342_v11  ;;  %7640 = vrsqrt.f32 %v5336_v63  ;;  %v7605_v11 = vld [vmem:[%s10446_s26 + $0x68] ss:$12 sps:$4 sm:$0xff]   ;;  %v7606_v63 = vld [vmem:[%s10446_s26 + $0x4c] ss:$12 sps:$4 sm:$0xff]  }
 0xdb2   : > { %v7635_v59 = vpop.eup %7634  ;;  %5665 = vmatpush1.bf16.msra.mxu0 %v7600_v49 }
 0xdb3   : > { %v5364_v32 = vadd.f32 %v6388_v5, %v5353_v53  ;;  %v5343_v22 = vmul.f32 %v7635_v59, %v5328_v43  ;;  %7043 = vmatpush3.bf16.msra.mxu1 %v7601_v12  ;;  %5666 = vmatprep.subr.bf16.mxu0 %v7602_v38  ;;  %v7609_v43 = vld [vmem:[%s10446_s26 + $0x50] ss:$12 sps:$4 sm:$0xff]   ;;  %v7610_v53 = vld [vmem:[%s10446_s26 + $0x34] ss:$12 sps:$4 sm:$0xff]  }
 0xdb4   : > { %7044 = vmatprep.subr.bf16.mxu1 %v7835_v15  ;;  %v7612_v59 = vld [vmem:[%s10446_s26 + $0x30] ss:$12 sps:$4 sm:$0xff]  }
 0xdb5   : > { %v5374_v4 = vmul.f32 %v5369_v58, %v5364_v32  ;;  %v5354_v24 = vmul.f32 %v6387_v50, %v5343_v22  ;;  %v7613_v58 = vld [vmem:[%s10446_s26 + $0x38] ss:$12 sps:$4 sm:$0xff]   ;;  %v7614_v32 = vld [vmem:[%s10446_s26 + $0x1c] ss:$12 sps:$4 sm:$0xff]  }
 0xdb6   : > { %v7616_v22 = vld [vmem:[%s10446_s26 + $0x18] ss:$12 sps:$4 sm:$0xff]  }
 0xdb7   : > { %v10035_v61 = vadd.f32 %v5379_v8, %v5374_v4  ;;  %v5365_v0 = vadd.f32 %v6388_v5, %v5354_v24  ;;  %7045 = vmatpush3.bf16.msra.mxu1 %v7605_v11  ;;  %v7617_v8 = vld [vmem:[%s10446_s26 + $0x20] ss:$12 sps:$4 sm:$0xff]   ;;  %v7618_v4 = vld [vmem:[%s10446_s26 + $0x4] ss:$12 sps:$4 sm:$0xff]  }
 0xdb8   : > { %v7637_v41 = vpop.eup %7636  ;;  %7046 = vmatprep.subr.bf16.mxu1 %v7835_v15  ;;  %v7620_v24 = vld [vmem:[%s10446_s26] ss:$12 sps:$4 sm:$0xff]  }
 0xdb9   : > { %5391 = vadd.xlane.f32.xlu0 %v10035_v61  ;;  %v5375_v23 = vmul.f32 %v5370_v27, %v5365_v0  ;;  %v5344_v39 = vmul.f32 %v7637_v41, %v5329_v40  ;;  %v5407_v31 = vmul.f32 %v10035_v61, %v10035_v61  ;;  %v7621_v27 = vld [vmem:[%s10446_s26 + $0x8] ss:$12 sps:$4 sm:$0xff]   ;;  %v7836_v40 = vmov 0  }
 0xdba   : > { %v7639_v34 = vpop.eup %7638  ;;  %5692 = vmatprep.mubr.bf16.mxu0 %v7836_v40  ;;  %7588 = vset.pattern.permute.xlu1 %v7836_v40 }
 0xdbb   : > { %v10040_v30 = vadd.f32 %v5380_v17, %v5375_v23  ;;  %v5355_v6 = vmul.f32 %v6387_v50, %v5344_v39  ;;  %v5345_v55 = vmul.f32 %v7639_v34, %v5330_v57  ;;  %7047 = vmatpush3.bf16.msra.mxu1 %v7609_v43  ;;  %7589 = vset.pattern.permute.xlu0 %v7836_v40 }
 0xdbc   : > { %7048 = vmatprep.subr.bf16.mxu1 %v7835_v15 }
 0xdbd   : > { %5393 = vadd.xlane.f32.xlu1 %v10040_v30  ;;  %5412 = vadd.xlane.f32.xlu0 %v5407_v31  ;;  %v5366_v14 = vadd.f32 %v6388_v5, %v5355_v6  ;;  %v5356_v52 = vmul.f32 %v6387_v50, %v5345_v55  ;;  %v5408_v29 = vmul.f32 %v10040_v30, %v10040_v30 }
 0xdbe   : > { %v7641_v10 = vpop.eup %7640 }
 0xdbf   : > { %v5376_v45 = vmul.f32 %v5371_v44, %v5366_v14  ;;  %v5367_v51 = vadd.f32 %v6388_v5, %v5356_v52  ;;  %v5346_v26 = vmul.f32 %v7641_v10, %v5331_v62  ;;  %7049 = vmatpush3.bf16.msra.mxu1 %v7613_v58 }
 0xdc0   : > { %7050 = vmatprep.subr.bf16.mxu1 %v7835_v15 }
 0xdc1   : > { %5414 = vadd.xlane.f32.xlu1 %v5408_v29  ;;  %v10052_v13 = vadd.f32 %v5381_v35, %v5376_v45  ;;  %v5377_v36 = vmul.f32 %v5372_v20, %v5367_v51  ;;  %v5357_v54 = vmul.f32 %v6387_v50, %v5346_v26  ;;  %v7604_v50 = vld [vmem:[%s10446_s26 + $0x60] ss:$12 sps:$4 sm:$0xff]  }
 0xdc2   : > { %5667 = vmatpush1.bf16.msra.mxu0 %v7604_v50  ;;  %v6415_v50 = vld [vmem:[%s10449_s16] ss:$0 sm:$0xff] }
 0xdc3   : > { %5395 = vadd.xlane.f32.xlu0 %v10052_v13  ;;  %v10055_v2 = vadd.f32 %v5382_v37, %v5377_v36  ;;  %v5368_v46 = vadd.f32 %v6388_v5, %v5357_v54  ;;  %v5409_v19 = vmul.f32 %v10052_v13, %v10052_v13  ;;  %v7608_v5 = vld [vmem:[%s10446_s26 + $0x48] ss:$12 sps:$4 sm:$0xff]   ;;  %5668 = vmatprep.subr.bf16.mxu0 %v7606_v63 }
 0xdc4   : > { %7051 = vmatpush3.bf16.msra.mxu1 %v7617_v8 }
 0xdc5   : > { %5397 = vadd.xlane.f32.xlu1 %v10055_v2  ;;  %v5378_v9 = vmul.f32 %v5373_v56, %v5368_v46  ;;  %v5410_v48 = vmul.f32 %v10055_v2, %v10055_v2  ;;  %7052 = vmatprep.subr.bf16.mxu1 %v7835_v15 }
 0xdc6   : > { %5669 = vmatpush1.bf16.msra.mxu0 %v7608_v5 }
 0xdc7   : > { %5416 = vadd.xlane.f32.xlu0 %v5409_v19  ;;  %v10067_v16 = vadd.f32 %v5383_v47, %v5378_v9  ;;  %5670 = vmatprep.subr.bf16.mxu0 %v7610_v53 }
 0xdc8   : > { %7053 = vmatpush3.bf16.msra.mxu1 %v7621_v27 }
 0xdc9   : > { %5418 = vadd.xlane.f32.xlu1 %v5410_v48  ;;  %v5399_v28 = vsel %vm1771_vm1, %v10067_v16, 0.0  ;;  %v5411_v1 = vmul.f32 %v10067_v16, %v10067_v16 }
 0xdca   : > { %5671 = vmatpush1.bf16.msra.mxu0 %v7612_v59 }
 0xdcb   : > { %5400 = vadd.xlane.f32.xlu0 %v5399_v28  ;;  %v5420_v25 = vsel %vm1771_vm1, %v5411_v1, 0.0  ;;  %5672 = vmatprep.subr.bf16.mxu0 %v7614_v32 }
 0xdcd   : > { %5421 = vadd.xlane.f32.xlu1 %v5420_v25 }
 0xdce   : > { %5673 = vmatpush1.bf16.msra.mxu0 %v7616_v22 }
 0xdcf   : > { %5674 = vmatprep.subr.bf16.mxu0 %v7618_v4 }
 0xdd2   : > { %5675 = vmatpush1.bf16.msra.mxu0 %v7620_v24 }
 0xe42   : > { %v5392_v0 = vpop.xlane.xlu0 %5391 }
 0xe43   : > { %v5402_v41 = vmul.f32 0.0078125, %v5392_v0 }
 0xe45   : > { %v5428_v23 = vmul.f32 %v5402_v41, %v5402_v41  ;;  %v5438_v28 = vsub.f32 %v10035_v61, %v5402_v41 }
 0xe46   : > { %v5394_v17 = vpop.xlane.xlu1 %5393  ;;  %v5413_v57 = vpop.xlane.xlu0 %5412 }
 0xe47   : > { %v5403_v39 = vmul.f32 0.0078125, %v5394_v17  ;;  %v5423_v34 = vmul.f32 0.0078125, %v5413_v57 }
 0xe49   : > { %v5433_v31 = vsub.f32 %v5423_v34, %v5428_v23  ;;  %v5429_v55 = vmul.f32 %v5403_v39, %v5403_v39  ;;  %v5439_v49 = vsub.f32 %v10040_v30, %v5403_v39 }
 0xe4a   : > { %v5415_v6 = vpop.xlane.xlu1 %5414 }
 0xe4b   : > { %v5443_v44 = vadd.f32 1e-05, %v5433_v31  ;;  %v5424_v14 = vmul.f32 0.0078125, %v5415_v6 }
 0xe4c   : > { %v5396_v52 = vpop.xlane.xlu0 %5395 }
 0xe4d   : > { %7642 = vrsqrt.f32 %v5443_v44  ;;  %v5434_v62 = vsub.f32 %v5424_v14, %v5429_v55  ;;  %v5404_v35 = vmul.f32 0.0078125, %v5396_v52  ;;  %v6416_v44 = vld [vmem:[#allocation4] ss:$0 sm:$0xff] }
 0xe4e   : > { %v5398_v20 = vpop.xlane.xlu1 %5397 }
 0xe4f   : > { %v5444_v10 = vadd.f32 1e-05, %v5434_v62  ;;  %v5405_v29 = vmul.f32 0.0078125, %v5398_v20  ;;  %v5430_v51 = vmul.f32 %v5404_v35, %v5404_v35  ;;  %v5440_v53 = vsub.f32 %v10052_v13, %v5404_v35 }
 0xe50   : > { %v5417_v45 = vpop.xlane.xlu0 %5416 }
 0xe51   : > { %7644 = vrsqrt.f32 %v5444_v10  ;;  %v5425_v37 = vmul.f32 0.0078125, %v5417_v45  ;;  %v5431_v36 = vmul.f32 %v5405_v29, %v5405_v29  ;;  %v5441_v58 = vsub.f32 %v10055_v2, %v5405_v29 }
 0xe52   : > { %v5419_v26 = vpop.xlane.xlu1 %5418 }
 0xe53   : > { %v5435_v54 = vsub.f32 %v5425_v37, %v5430_v51  ;;  %v5426_v56 = vmul.f32 0.0078125, %v5419_v26  ;;  %v5515_v51 = vld [vmem:[%s10450_s9] sm:$0x7] }
 0xe54   : > { %v5401_v46 = vpop.xlane.xlu0 %5400  ;;  %v10452_v37 = vld [vmem:[#allocation40_spill] sm:$0xff] }
 0xe55   : > { %v5445_v19 = vadd.f32 1e-05, %v5435_v54  ;;  %v5436_v47 = vsub.f32 %v5426_v56, %v5431_v36  ;;  %v5406_v9 = vmul.f32 0.0078125, %v5401_v46  ;;  %v5520_v26 = vrot.slane %v5515_v51, %v10452_v37  ;;  %v10453_v36 = vld [vmem:[#allocation41_spill] sm:$0xff]  ;;  %v10454_v56 = vld [vmem:[#allocation84_spill] sm:$0xff] }
 0xe56   : > { %v5422_v18 = vpop.xlane.xlu1 %5421  ;;  %v5528_v54 = vrot.slane %v5515_v51, %v10453_v36  ;;  %v5524_v46 = vrot.slane %v5515_v51, %v10454_v56 }
 0xe57   : > { %7646 = vrsqrt.f32 %v5445_v19  ;;  %v5446_v48 = vadd.f32 1e-05, %v5436_v47  ;;  %v5432_v42 = vmul.f32 %v5406_v9, %v5406_v9  ;;  %v5427_v7 = vmul.f32 0.0078125, %v5422_v18 }
 0xe58   : > { %v5442_v0 = vsub.f32 %v10067_v16, %v5406_v9 }
 0xe59   : > { %7648 = vrsqrt.f32 %v5446_v48  ;;  %v5437_v3 = vsub.f32 %v5427_v7, %v5432_v42 }
 0xe5a   : > { %v7643_v1 = vpop.eup %7642 }
 0xe5b   : > { %v5453_v33 = vmul.f32 %v7643_v1, %v5438_v28  ;;  %v5447_v25 = vadd.f32 1e-05, %v5437_v3 }
 0xe5d   : > { %v5464_v12 = vmul.f32 %v6389_v21, %v5453_v33  ;;  %7650 = vrsqrt.f32 %v5447_v25 }
 0xe5e   : > { %v7645_v38 = vpop.eup %7644 }
 0xe5f   : > { %v5475_v11 = vadd.f32 %v6390_v60, %v5464_v12  ;;  %v5454_v63 = vmul.f32 %v7645_v38, %v5439_v49 }
 0xe61   : > { %v5799_v5 = vmul.f32 %v6415_v50, %v5475_v11  ;;  %v5465_v43 = vmul.f32 %v6389_v21, %v5454_v63 }
 0xe63   : > { %5804 = vadd.xlane.f32.xlu0 %v5799_v5  ;;  %v5476_v61 = vadd.f32 %v6390_v60, %v5465_v43 }
 0xe64   : > { %v7647_v59 = vpop.eup %7646 }
 0xe65   : > { %v5800_v32 = vmul.f32 %v6415_v50, %v5476_v61  ;;  %v5480_v22 = vpack.c.bf16 %v5476_v61, %v5475_v11  ;;  %v5455_v8 = vmul.f32 %v7647_v59, %v5440_v53 }
 0xe66   : > { %v7649_v4 = vpop.eup %7648 }
 0xe67   : > { %5806 = vadd.xlane.f32.xlu1 %v5800_v32  ;;  %5693 = vmatmul.mubr.bf16.vlgmr.msra.gmra.mxu0 %v5480_v22  ;;  %v5466_v30 = vmul.f32 %v6389_v21, %v5455_v8  ;;  %v5456_v24 = vmul.f32 %v7649_v4, %v5441_v58 }
 0xe68   : > { %7055 = vmatmul.mubr.bf16.vlgmr.msra.gmra.mxu1 %v5480_v22  ;;  %5702 = vmatprep.mubr.bf16.mxu0 %v7836_v40 }
 0xe69   : > { %v5477_v27 = vadd.f32 %v6390_v60, %v5466_v30  ;;  %7058 = vmatprep.mubr.msk.bf16.mxu1 %vm7837_vm6, %v7835_v15  ;;  %v5467_v13 = vmul.f32 %v6389_v21, %v5456_v24 }
 0xe6a   : > { %v7651_v41 = vpop.eup %7650 }
 0xe6b   : > { %v5801_v2 = vmul.f32 %v6415_v50, %v5477_v27  ;;  %v5478_v17 = vadd.f32 %v6390_v60, %v5467_v13  ;;  %v5457_v57 = vmul.f32 %v7651_v41, %v5442_v0 }
 0xe6d   : > { %5808 = vadd.xlane.f32.xlu0 %v5801_v2  ;;  %v5802_v23 = vmul.f32 %v6415_v50, %v5478_v17  ;;  %v5481_v39 = vpack.c.bf16 %v5478_v17, %v5477_v27  ;;  %v5468_v34 = vmul.f32 %v6389_v21, %v5457_v57 }
 0xe6f   : > { %5810 = vadd.xlane.f32.xlu1 %v5802_v23  ;;  %5703 = vmatmul.mubr.bf16.gmra.mxu0 %v5481_v39  ;;  %v5479_v31 = vadd.f32 %v6390_v60, %v5468_v34 }
 0xe70   : > { %7059 = vmatmul.mubr.bf16.gmra.mxu1 %v5481_v39  ;;  %5712 = vmatprep.mubr.bf16.mxu0 %v7836_v40 }
 0xe71   : > { %7062 = vmatprep.mubr.msk.bf16.mxu1 %vm7837_vm6, %v7835_v15  ;;  %v5803_v6 = vmul.f32 %v6415_v50, %v5479_v31  ;;  %v5482_v55 = vpack.c.bf16 %v5479_v31, %v5479_v31 }
 0xe73   : > { %v5812_v16 = vsel %vm1771_vm1, %v5803_v6, 0.0 }
 0xe74   : > { %5813 = vadd.xlane.f32.xlu0 %v5812_v16 }
 0xe77   : > { %5713 = vmatmul.mubr.bf16.gmra.mxu0 %v5482_v55 }
 0xe78   : > { %7063 = vmatmul.mubr.bf16.gmra.mxu1 %v5482_v55 }
 0xeec   : > { %v5805_v14 = vpop.xlane.xlu0 %5804 }
 0xeed   : > { %v5822_v52 = vadd.f32 %v6416_v44, %v5805_v14 }
 0xeef   : > { %5829 = vperm.xlu1 %7588, %v5822_v52  }
 0xef0   : > { %v5807_v62 = vpop.xlane.xlu1 %5806 }
 0xef1   : > { %v5823_v35 = vadd.f32 %v6416_v44, %v5807_v62 }
 0xef3   : > { %5834 = vperm.xlu0 %7589, %v5823_v35  }
 0xef6   : > { %v5809_v20 = vpop.xlane.xlu0 %5808 }
 0xef7   : > { %v5824_v40 = vadd.f32 %v6416_v44, %v5809_v20 }
 0xef8   : > { %v5811_v10 = vpop.xlane.xlu1 %5810 }
 0xef9   : > { %5839 = vperm.xlu1 %7588, %v5824_v40   ;;  %v5825_v15 = vadd.f32 %v6416_v44, %v5811_v10 }
 0xefd   : > { %5844 = vperm.xlu1 %7588, %v5825_v15   ;;  %v5814_v29 = vpop.xlane.xlu0 %5813 }
 0xefe   : > { %v5826_v45 = vadd.f32 %v6416_v44, %v5814_v29 }
 0xf01   : > { %5849 = vperm.xlu1 %7588, %v5826_v45  }
 0xf27   : > { %v5694_v19 = vpop.f32.mrf.mxu0 }
 0xf28   : > { %v5695_v47 = vadd.f32 %v5694_v19, %v5520_v26  ;;  %v5755_v9 = vpop.f32.mrf.mxu1 }
 0xf29   : > { %v5756_v18 = vadd.f32 %v5755_v9, %v5528_v54  ;;  %v5696_v48 = vpop.f32.mrf.mxu0 }
 0xf2a   : > { %5777 = vst [vmem:[%s10451_s1] sm:$0xff] %v5695_v47  ;;  %v5697_v42 = vadd.f32 %v5696_v48, %v5524_v46  ;;  %v7056_v7 = vpop.f32.mrf.mxu1 }
 0xf2b   : > { %5779 = vst [vmem:[%s10451_s1 + $0x10] sm:$0xff] %v5756_v18  ;;  %v5698_v28 = vpop.f32.mrf.mxu0 }
 0xf2c   : > { %5778 = vst [vmem:[%s10451_s1 + $0x8] sm:$0xff] %v5697_v42  ;;  %v5699_v1 = vadd.f32 %v5698_v28, %v5520_v26  ;;  %v5758_v3 = vpop.f32.mrf.mxu1 }
 0xf2d   : > { %v5759_v21 = vadd.f32 %v5758_v3, %v5528_v54  ;;  %v5700_v33 = vpop.f32.mrf.mxu0 }
 0xf2e   : > { %5780 = vst [vmem:[%s10451_s1 + $0x18] sm:$0xff] %v5699_v1  ;;  %v5701_v25 = vadd.f32 %v5700_v33, %v5524_v46  ;;  %v7057_v60 = vpop.f32.mrf.mxu1 }
 0xf2f   : > { %5782 = vst [vmem:[%s10451_s1 + $0x28] sm:$0xff] %v5759_v21  ;;  %v5704_v49 = vpop.f32.mrf.mxu0 }
 0xf30   : > { %5781 = vst [vmem:[%s10451_s1 + $0x20] sm:$0xff] %v5701_v25  ;;  %v5705_v12 = vadd.f32 %v5704_v49, %v5520_v26  ;;  %v5763_v38 = vpop.f32.mrf.mxu1 }
 0xf31   : > { %v5764_v50 = vadd.f32 %v5763_v38, %v5528_v54  ;;  %v5706_v11 = vpop.f32.mrf.mxu0 }
 0xf32   : > { %5783 = vst [vmem:[%s10451_s1 + $0x30] sm:$0xff] %v5705_v12  ;;  %v5707_v63 = vadd.f32 %v5706_v11, %v5524_v46  ;;  %v7060_v5 = vpop.f32.mrf.mxu1 }
 0xf33   : > { %5785 = vst [vmem:[%s10451_s1 + $0x40] sm:$0xff] %v5764_v50  ;;  %v5708_v43 = vpop.f32.mrf.mxu0 }
 0xf34   : > { %5784 = vst [vmem:[%s10451_s1 + $0x38] sm:$0xff] %v5707_v63  ;;  %v5709_v53 = vadd.f32 %v5708_v43, %v5520_v26  ;;  %v5766_v61 = vpop.f32.mrf.mxu1 }
 0xf35   : > { %v5767_v59 = vadd.f32 %v5766_v61, %v5528_v54  ;;  %v5710_v58 = vpop.f32.mrf.mxu0 }
 0xf36   : > { %5786 = vst [vmem:[%s10451_s1 + $0x48] sm:$0xff] %v5709_v53  ;;  %v5711_v32 = vadd.f32 %v5710_v58, %v5524_v46  ;;  %v7061_v22 = vpop.f32.mrf.mxu1 }
 0xf37   : > { %5788 = vst [vmem:[%s10451_s1 + $0x58] sm:$0xff] %v5767_v59  ;;  %v5714_v8 = vpop.f32.mrf.mxu0 }
 0xf38   : > { %5787 = vst [vmem:[%s10451_s1 + $0x50] sm:$0xff] %v5711_v32  ;;  %v5715_v4 = vadd.f32 %v5714_v8, %v5520_v26  ;;  %v5771_v30 = vpop.f32.mrf.mxu1 }
 0xf39   : > { %v5772_v24 = vadd.f32 %v5771_v30, %v5528_v54  ;;  %v5716_v27 = vpop.f32.mrf.mxu0 }
 0xf3a   : > { %5789 = vst [vmem:[%s10451_s1 + $0x60] sm:$0x3] %v5715_v4  ;;  %v5717_v13 = vadd.f32 %v5716_v27, %v5524_v46  ;;  %v7064_v0 = vpop.f32.mrf.mxu1 }
 0xf3b   : > { %5791 = vst [vmem:[%s10451_s1 + $0x70] sm:$0x3] %v5772_v24  ;;  %v5718_v41 = vpop.f32.mrf.mxu0 }
 0xf3c   : > { %5790 = vst [vmem:[%s10451_s1 + $0x68] sm:$0x3] %v5717_v13  ;;  %v5774_v2 = vpop.f32.mrf.mxu1 }
 0xf3d   : > { %v5719_v17 = vpop.f32.mrf.mxu0 }
 0xf3e   : > { %v7065_v57 = vpop.f32.mrf.mxu1 }
 0xf6a   : > { %v5830_v23 = vpop.permute.xlu1 %5829 }
 0xf6b   : > { %5852 = vst [vmem:[%s10455_s22] sm:$0xff] %v5830_v23 }
 0xf6e   : > { %v5835_v39 = vpop.permute.xlu0 %5834 }
 0xf6f   : > { %5853 = vst [vmem:[%s10455_s22 + $0x8] sm:$0xff] %v5835_v39 }
 0xf74   : > { %v5840_v34 = vpop.permute.xlu1 %5839 }
 0xf75   : > { %5854 = vst [vmem:[%s10455_s22 + $0x10] sm:$0xff] %v5840_v34 }
 0xf78   : > { %v5845_v31 = vpop.permute.xlu1 %5844 }
 0xf79   : > { %5855 = vst [vmem:[%s10455_s22 + $0x18] sm:$0xff] %v5845_v31 }
 0xf7c   : > { %v5850_v6 = vpop.permute.xlu1 %5849 }
 0xf7d   : > { %5856 = vst [vmem:[%s10455_s22 + $0x20] sm:$0x3] %v5850_v6 }
 0xf7e PF: > { %s84_s18 = sadd.s32 1, %s7788_s18   ;;  %s10456_s7 = sld [smem:[#allocation34_spill]] }
 0xf7f   : > { %p81_p8 = scmp.ge.s32.totalorder %s84_s18, 8   ;;  %s10457_s10 = sld [smem:[#allocation35_spill]] }
 0xf80   : > { %s10458_s11 = sld [smem:[#allocation38_spill]] }
 0xf81   : > { %s10459_s15 = sld [smem:[#allocation36_spill]]  ;;  %83 = sbr.rel (!%p81_p8) target bundleno = 66 (0x42), region = 303 }
 0xf82   : > { %s10460_s16 = sld [smem:[#allocation37_spill]] }
 0xf86   :  { %5894 = vsyncpa [#allocation6], 1 }
 0xf87   :  { %5896 = vsyncpa [#allocation6 + $0x1], 1 }
 0xf88   :  { %5897 = vsyncpa [#allocation8], 1 }
 0xf89   :  { %5899 = vsyncpa [#allocation8 + $0x1], 1 }

</bundles_post_ra>
